<compile_context>
chip_gen: v7x
topology: tpu7x:2x2x1
jax: 0.10.0
libtpu: 0.0.40
codegen_flags: <defaults>
</compile_context>

<pallas_src>
import functools

import jax
import jax.numpy as jnp
from jax import lax
from jax.experimental import pallas as pl
from jax.experimental.pallas import tpu as pltpu

LANE = 128
SUB = 16   # stored W is padded to a multiple of this (bf16 sublane packing)


def _round_up(n, m):
    return ((n + m - 1) // m) * m


def _pick_th(ho, stride):
    """Output rows per in-kernel row block (dense rows = stride*th <= 8)."""
    cap = max(1, 8 // stride)
    for d in range(min(cap, ho), 0, -1):
        if ho % d == 0:
            return d
    return 1


# ----------------------------- kernel helpers ------------------------------ #
# Stored layout of an activation with valid size (H, W, C):
#   shape (H + 3, Ws, Cp), Ws = round_up(W + 2, 16), Cp = round_up(C, 128)
#   row 0 / rows >= H+1 are zero; col 0 / cols >= W+1 are zero;
#   valid pixel (v, u, c) lives at stored [v + 1, u + 1, c].


def _dense_conv_block(x_ref, w_ref, rb, *, td, ws_in):
    """f32 accumulator of the dense (stride-1) 3x3 conv for dense output rows
    [rb*td, rb*td + td).  Flat index d*ws_in + c == dense output (row, col).
    Columns >= valid width hold junk and are masked / dropped by the caller."""
    ci = w_ref.shape[1]
    co = w_ref.shape[2]
    row0 = pl.multiple_of(rb * td, td)
    slab = x_ref[0, pl.ds(row0, td + 3), :, :]              # (td+3, ws_in, ci)
    sf0 = slab.reshape((td + 3) * ws_in, ci)
    sf1 = sf0[1:1 + (td + 2) * ws_in, :]                    # column shift +1
    sf2 = sf0[2:2 + (td + 2) * ws_in, :]                    # column shift +2
    shifted = (sf0, sf1, sf2)
    acc = jnp.zeros((td * ws_in, co), jnp.float32)
    for kh in range(3):                                     # 9 chained MXU pushes
        base = kh * ws_in
        for kw in range(3):
            lhs = shifted[kw][base:base + td * ws_in, :]
            acc = acc + jnp.dot(lhs, w_ref[kh * 3 + kw],
                                preferred_element_type=jnp.float32)
    return acc


def _residual_slab(r_ref, rb, *, td, ws):
    """(td*ws, C) slab; flat d*ws + c == residual value at output pixel
    (rb*td + d, c) of a stored-layout residual array."""
    c = r_ref.shape[3]
    slab = r_ref[0, pl.ds(rb * td + 1, td + 1), :, :]       # (td+1, ws, c)
    flat = slab.reshape((td + 1) * ws, c)
    return flat[1:1 + td * ws, :]                           # +1 column shift


def _make_sel(*, th, ws_out, td, ws_in, wo, stride):
    """0/1 f32 matrix decimating the dense accumulator to the strided output
    (and zeroing out-of-range columns) with one MXU matmul."""
    rows, cols = th * ws_out, td * ws_in
    ri = lax.broadcasted_iota(jnp.int32, (rows, cols), 0)
    ci = lax.broadcasted_iota(jnp.int32, (rows, cols), 1)
    o = ri // ws_out
    c2 = ri % ws_out
    tgt = stride * o * ws_in + stride * c2
    keep = (ci == tgt) & (c2 < wo)
    return jnp.where(keep, 1.0, 0.0).astype(jnp.float32)


def _col_mask(*, th, ws_out, wo):
    i = lax.broadcasted_iota(jnp.int32, (th * ws_out, 1), 0)
    return (i % ws_out) < wo


def _store_rows(o_ref, rb, val, *, th, ws_out):
    """Store one block of output rows into the stored (halo) layout."""
    co = o_ref.shape[3]
    v = val.reshape(th, ws_out, co)[:, :ws_out - 1, :].astype(o_ref.dtype)
    o_ref[0, pl.ds(rb * th + 1, th), pl.ds(1, ws_out - 1), :] = v


# -------------------------------- kernels ----------------------------------- #

def _conv_bn_relu_kernel(x_ref, w_ref, b_ref, o_ref, *,
                         stride, th, nblk, wo, ws_in, ws_out):
    # out = relu(conv3x3(x) * bn_scale + bn_bias)   (scale folded into w)
    td = stride * th
    o_ref[...] = jnp.zeros(o_ref.shape, o_ref.dtype)        # zero halo/pad once
    mask = _col_mask(th=th, ws_out=ws_out, wo=wo)
    sel = (_make_sel(th=th, ws_out=ws_out, td=td, ws_in=ws_in, wo=wo,
                     stride=stride) if stride > 1 else None)

    def body(rb, carry):
        acc = _dense_conv_block(x_ref, w_ref, rb, td=td, ws_in=ws_in) + b_ref[...]
        out = (jnp.dot(sel, acc, preferred_element_type=jnp.float32)
               if stride > 1 else acc)
        out = jnp.where(mask, jnp.maximum(out, 0.0), 0.0)
        _store_rows(o_ref, rb, out, th=th, ws_out=ws_out)
        return carry

    lax.fori_loop(0, nblk, body, None, unroll=True)


def _conv_bn_relu_proj_kernel(x_ref, w_ref, b_ref, wr_ref, br_ref,
                              o_ref, r_ref, *,
                              stride, th, nblk, wo, ws_in, ws_out):
    # Main path: out1 = relu(conv3x3(x) + bias); side output: the folded 1x1
    # projection shortcut, emitted at the (strided) output size/layout.
    td = stride * th
    o_ref[...] = jnp.zeros(o_ref.shape, o_ref.dtype)
    r_ref[...] = jnp.zeros(r_ref.shape, r_ref.dtype)
    mask = _col_mask(th=th, ws_out=ws_out, wo=wo)
    sel = (_make_sel(th=th, ws_out=ws_out, td=td, ws_in=ws_in, wo=wo,
                     stride=stride) if stride > 1 else None)

    def body(rb, carry):
        acc = _dense_conv_block(x_ref, w_ref, rb, td=td, ws_in=ws_in) + b_ref[...]
        xres = _residual_slab(x_ref, rb, td=td, ws=ws_in)
        res = jnp.dot(xres, wr_ref[...],
                      preferred_element_type=jnp.float32) + br_ref[...]
        if stride > 1:
            acc = jnp.dot(sel, acc, preferred_element_type=jnp.float32)
            res = jnp.dot(sel, res, preferred_element_type=jnp.float32)
        out = jnp.where(mask, jnp.maximum(acc, 0.0), 0.0)
        res = jnp.where(mask, res, 0.0)
        _store_rows(o_ref, rb, out, th=th, ws_out=ws_out)
        _store_rows(r_ref, rb, res, th=th, ws_out=ws_out)
        return carry

    lax.fori_loop(0, nblk, body, None, unroll=True)


def _conv_bn_add_relu_kernel(x_ref, w_ref, b_ref, res_ref, o_ref, *,
                             th, nblk, wo, ws_in, ws_out):
    # stride-1 conv2: out = relu(conv3x3(x) + bias + residual)
    o_ref[...] = jnp.zeros(o_ref.shape, o_ref.dtype)
    mask = _col_mask(th=th, ws_out=ws_out, wo=wo)

    def body(rb, carry):
        acc = _dense_conv_block(x_ref, w_ref, rb, td=th, ws_in=ws_in) + b_ref[...]
        res = _residual_slab(res_ref, rb, td=th, ws=ws_out).astype(jnp.float32)
        out = jnp.where(mask, jnp.maximum(acc + res, 0.0), 0.0)
        _store_rows(o_ref, rb, out, th=th, ws_out=ws_out)
        return carry

    lax.fori_loop(0, nblk, body, None, unroll=True)


# ---------------------------- pallas_call wrapper --------------------------- #

def _fused_conv3x3(x_st, w9, bias, *, h_in, w_in, stride, out_dtype,
                   residual=None, wres=None, bres=None):
    """Fused 3x3 conv + folded BN (+ shortcut) + ReLU over stored layouts."""
    n, hs_in, ws_in, ci = x_st.shape
    co = w9.shape[-1]
    ho = (h_in - 1) // stride + 1
    wo = (w_in - 1) // stride + 1
    th = _pick_th(ho, stride)
    nblk = ho // th
    ws_out = _round_up(wo + 2, SUB)
    hs_out = ho + 3
    assert hs_in >= stride * ho + 3 and ws_in >= w_in + 2 and ws_in % SUB == 0

    in_specs = [
        pl.BlockSpec((1, hs_in, ws_in, ci), lambda i: (i, 0, 0, 0)),
        pl.BlockSpec((9, ci, co), lambda i: (0, 0, 0)),
        pl.BlockSpec((1, co), lambda i: (0, 0)),
    ]
    args = [x_st, w9, bias]
    kparams = dict(th=th, nblk=nblk, wo=wo, ws_in=ws_in, ws_out=ws_out)

    if residual is not None:                                  # conv2 (+shortcut)
        assert stride == 1 and ws_in == ws_out
        assert residual.shape[2] == ws_out and residual.shape[3] == co
        assert residual.shape[1] >= ho + 2
        in_specs.append(pl.BlockSpec(
            (1, residual.shape[1], ws_out, co), lambda i: (i, 0, 0, 0)))
        args.append(residual)
        kernel = functools.partial(_conv_bn_add_relu_kernel, **kparams)
        out_shape = jax.ShapeDtypeStruct((n, hs_out, ws_out, co), out_dtype)
        out_specs = pl.BlockSpec((1, hs_out, ws_out, co), lambda i: (i, 0, 0, 0))
    elif wres is not None:                                    # conv1 + projection
        if stride == 1:
            assert ws_in == ws_out
        in_specs += [
            pl.BlockSpec((ci, co), lambda i: (0, 0)),
            pl.BlockSpec((1, co), lambda i: (0, 0)),
        ]
        args += [wres, bres]
        kernel = functools.partial(_conv_bn_relu_proj_kernel,
                                   stride=stride, **kparams)
        out_shape = (jax.ShapeDtypeStruct((n, hs_out, ws_out, co), out_dtype),
                     jax.ShapeDtypeStruct((n, hs_out, ws_out, co), out_dtype))
        out_specs = (
            pl.BlockSpec((1, hs_out, ws_out, co), lambda i: (i, 0, 0, 0)),
            pl.BlockSpec((1, hs_out, ws_out, co), lambda i: (i, 0, 0, 0)))
    else:                                                     # conv1, identity
        kernel = functools.partial(_conv_bn_relu_kernel,
                                   stride=stride, **kparams)
        out_shape = jax.ShapeDtypeStruct((n, hs_out, ws_out, co), out_dtype)
        out_specs = pl.BlockSpec((1, hs_out, ws_out, co), lambda i: (i, 0, 0, 0))

    return pl.pallas_call(
        kernel,
        out_shape=out_shape,
        grid=(n,),
        in_specs=in_specs,
        out_specs=out_specs,
        compiler_params=pltpu.CompilerParams(
            dimension_semantics=("parallel",),
            vmem_limit_bytes=48 * 1024 * 1024),   # sized for v7x's 64 MiB VMEM
    )(*args)


# ------------------------------ ResidualBlock ------------------------------ #

class ResidualBlockPallas:
    def __init__(self, key, in_channels, out_channels, stride=1):
        self.cin = in_channels
        self.cout = out_channels
        self.stride = stride
        self.identity = (in_channels == out_channels and stride == 1)
        self.cin_p = _round_up(in_channels, LANE)
        self.cout_p = _round_up(out_channels, LANE)
        eps = 1e-5
        ks = jax.random.split(key, 6)

        def conv_w(k, cout, cin, kh, kw):
            fan_in = cin * kh * kw
            return (jax.random.normal(k, (cout, cin, kh, kw), jnp.float32)
                    * (2.0 / fan_in) ** 0.5)

        def bn_fold(k, c):
            kg, kb, km, kv = jax.random.split(k, 4)
            gamma = 1.0 + 0.1 * jax.random.normal(kg, (c,), jnp.float32)
            beta = 0.1 * jax.random.normal(kb, (c,), jnp.float32)
            mean = 0.1 * jax.random.normal(km, (c,), jnp.float32)
            var = 1.0 + 0.1 * jnp.abs(jax.random.normal(kv, (c,), jnp.float32))
            scale = gamma / jnp.sqrt(var + eps)
            bias = beta - mean * scale
            return scale, bias

        def pack3x3(w_oihw, scale, bias, cin, cin_p, cout, cout_p):
            w = jnp.transpose(w_oihw, (2, 3, 1, 0)) * scale[None, None, None, :]
            w = jnp.pad(w, ((0, 0), (0, 0),
                            (0, cin_p - cin), (0, cout_p - cout)))
            w9 = w.reshape(9, cin_p, cout_p).astype(jnp.bfloat16)
            b = jnp.pad(bias, (0, cout_p - cout)).reshape(
                1, cout_p).astype(jnp.float32)
            return w9, b

        w1 = conv_w(ks[0], out_channels, in_channels, 3, 3)
        s1, b1 = bn_fold(ks[1], out_channels)
        w2 = conv_w(ks[2], out_channels, out_channels, 3, 3)
        s2, b2 = bn_fold(ks[3], out_channels)
        self.w1_k, self.b1_k = pack3x3(w1, s1, b1, in_channels, self.cin_p,
                                       out_channels, self.cout_p)
        self.w2_k, self.b2_k = pack3x3(w2, s2, b2, out_channels, self.cout_p,
                                       out_channels, self.cout_p)

        if not self.identity:
            wr = conv_w(ks[4], out_channels, in_channels, 1, 1)
            sr, br = bn_fold(ks[5], out_channels)
            wr2d = wr[:, :, 0, 0].T * sr[None, :]
            wr2d = jnp.pad(wr2d, ((0, self.cin_p - in_channels),
                                  (0, self.cout_p - out_channels)))
            self.wres_k = wr2d.astype(jnp.bfloat16)
            self.bres_k = jnp.pad(br, (0, self.cout_p - out_channels)).reshape(
                1, self.cout_p).astype(jnp.float32)

    def __call__(self, x_nchw):
        n, c, h, w = x_nchw.shape
        s = self.stride
        ho = (h - 1) // s + 1
        wo = (w - 1) // s + 1

        # Boundary conversion: NCHW f32 -> stored NHWC bf16.  Channel pad,
        # W halo/align pad and H halo pad are merged into a single jnp.pad.
        hs_x = max(h, s * ho) + 3
        ws_x = _round_up(w + 2, SUB)
        x = jnp.transpose(x_nchw, (0, 2, 3, 1)).astype(jnp.bfloat16)
        x_st = jnp.pad(x, ((0, 0), (1, hs_x - h - 1), (1, ws_x - w - 1),
                           (0, self.cin_p - c)))

        if self.identity:
            out1 = _fused_conv3x3(x_st, self.w1_k, self.b1_k, h_in=h, w_in=w,
                                  stride=s, out_dtype=jnp.bfloat16)
            res = x_st
        else:
            out1, res = _fused_conv3x3(x_st, self.w1_k, self.b1_k, h_in=h,
                                       w_in=w, stride=s,
                                       out_dtype=jnp.bfloat16,
                                       wres=self.wres_k, bres=self.bres_k)

        out2 = _fused_conv3x3(out1, self.w2_k, self.b2_k, h_in=ho, w_in=wo,
                              stride=1, out_dtype=jnp.bfloat16, residual=res)

        # Boundary conversion back to the PyTorch interface (NCHW, f32).
        # TODO(synk): when chaining residual blocks keep the channel/halo
        # padded NHWC bf16 layout between blocks instead of slicing/transposing.
        y = out2[:, 1:ho + 1, 1:wo + 1, :self.cout]
        return jnp.transpose(y, (0, 3, 1, 2)).astype(jnp.float32)

    def reference(self, x_nchw):
        """Pure-JAX (lax.conv) reference mirroring the kernel's rounding."""
        f32 = jnp.float32
        cin, cout = self.cin, self.cout
        x = jnp.transpose(x_nchw, (0, 2, 3, 1)).astype(jnp.bfloat16).astype(f32)

        def conv(a, w_hwio, s, pad):
            return lax.conv_general_dilated(
                a, w_hwio, (s, s), pad,
                dimension_numbers=("NHWC", "HWIO", "NHWC"),
                precision=lax.Precision.HIGHEST)

        w1 = self.w1_k.reshape(3, 3, self.cin_p, self.cout_p)[
            :, :, :cin, :cout].astype(f32)
        w2 = self.w2_k.reshape(3, 3, self.cout_p, self.cout_p)[
            :, :, :cout, :cout].astype(f32)
        b1 = self.b1_k[0, :cout]
        b2 = self.b2_k[0, :cout]

        o = jnp.maximum(conv(x, w1, self.stride, ((1, 1), (1, 1))) + b1, 0.0)
        o = o.astype(jnp.bfloat16).astype(f32)          # out1 stored in bf16
        o = conv(o, w2, 1, ((1, 1), (1, 1))) + b2

        if self.identity:
            r = x
        else:
            wr = self.wres_k[:cin, :cout].astype(f32).reshape(1, 1, cin, cout)
            r = conv(x, wr, self.stride, ((0, 0), (0, 0))) + self.bres_k[0, :cout]
            r = r.astype(jnp.bfloat16).astype(f32)      # shortcut emitted in bf16

        out = jnp.maximum(o + r, 0.0)
        out = out.astype(jnp.bfloat16).astype(f32)      # conv2 stores bf16
        return jnp.transpose(out, (0, 3, 1, 2))


# ---------------------------------- main ----------------------------------- #

if __name__ == "__main__":
    key = jax.random.PRNGKey(0)
    kx1, kx2, kp1, kp2 = jax.random.split(key, 4)

    # Case 1: identity shortcut (in == out, stride == 1)
    blk1 = ResidualBlockPallas(kp1, in_channels=8, out_channels=8, stride=1)
    x1 = jax.random.normal(kx1, (2, 8, 16, 16), jnp.float32)   # NCHW like torch
    y1 = blk1(x1)

    # Case 2: projection shortcut (in != out, stride == 2)
    blk2 = ResidualBlockPallas(kp2, in_channels=4, out_channels=8, stride=2)
    x2 = jax.random.normal(kx2, (2, 4, 16, 16), jnp.float32)
    y2 = blk2(x2)

    jax.block_until_ready((y1, y2))

    r1 = blk1.reference(x1)
    r2 = blk2.reference(x2)
    assert y1.shape == (2, 8, 16, 16) and y2.shape == (2, 8, 8, 8)
    err1 = float(jnp.max(jnp.abs(y1 - r1)))
    err2 = float(jnp.max(jnp.abs(y2 - r2)))
    assert jnp.allclose(y1, r1, atol=2e-2, rtol=2e-2), err1
    assert jnp.allclose(y2, r2, atol=2e-2, rtol=2e-2), err2

    print("KERNEL_OK")
</pallas_src>

<mosaic_0001>
module attributes {stable_mosaic.version = 11 : i64} {
  func.func @_conv_bn_relu_kernel(%arg0: i32, %arg1: memref<1x19x32x128xbf16, #tpu.memory_space<vmem>>, %arg2: memref<9x128x128xbf16, #tpu.memory_space<vmem>>, %arg3: memref<1x128xf32, #tpu.memory_space<vmem>>, %arg4: memref<1x19x32x128xbf16, #tpu.memory_space<vmem>>) attributes {dimension_semantics = [#tpu.dimension_semantics<parallel>], iteration_bounds = array<i64: 2>, scalar_prefetch = 0 : i64, scratch_operands = 0 : i64, tpu.core_type = #tpu.core_type<tc>, window_params = [{transform_indices = @transform_0, window_bounds = array<i64: 1, 19, 32, 128>}, {pipeline_mode = #tpu.pipeline_mode<synchronous>, transform_indices = @transform_1, window_bounds = array<i64: 9, 128, 128>}, {pipeline_mode = #tpu.pipeline_mode<synchronous>, transform_indices = @transform_2, window_bounds = array<i64: 1, 128>}, {transform_indices = @transform_3, window_bounds = array<i64: 1, 19, 32, 128>}]} {
    %cst = arith.constant 0.000000e+00 : bf16
    %0 = vector.broadcast %cst : bf16 to vector<1x19x32x128xbf16>
    %c0 = arith.constant 0 : index
    %c0_0 = arith.constant 0 : index
    %c0_1 = arith.constant 0 : index
    %c0_2 = arith.constant 0 : index
    %1 = vector.load %arg4[%c0, %c0_0, %c0_1, %c0_2] : memref<1x19x32x128xbf16, #tpu.memory_space<vmem>>, vector<1x19x32x128xbf16>
    tpu.vector_store %arg4[%c0, %c0_0, %c0_1, %c0_2], %0 {strides = array<i32>} : memref<1x19x32x128xbf16, #tpu.memory_space<vmem>>, vector<1x19x32x128xbf16>,
    %2 = tpu.iota {dimensions = array<i32: 0>} : vector<256x1xi32>
    %c32_i32 = arith.constant 32 : i32
    %c0_i32 = arith.constant 0 : i32
    %3 = arith.cmpi eq, %c32_i32, %c0_i32 : i32
    %c1_i32 = arith.constant 1 : i32
    %4 = arith.select %3, %c1_i32, %c32_i32 : i32
    %5 = vector.broadcast %4 : i32 to vector<256x1xi32>
    %6 = arith.remsi %2, %5 : vector<256x1xi32>
    %c0_i32_3 = arith.constant 0 : i32
    %7 = vector.broadcast %c0_i32_3 : i32 to vector<256x1xi32>
    %8 = arith.cmpi ne, %6, %7 : vector<256x1xi32>
    %c0_i32_4 = arith.constant 0 : i32
    %9 = vector.broadcast %c0_i32_4 : i32 to vector<256x1xi32>
    %10 = arith.cmpi slt, %6, %9 : vector<256x1xi32>
    %c0_i32_5 = arith.constant 0 : i32
    %11 = arith.cmpi slt, %4, %c0_i32_5 : i32
    %12 = vector.broadcast %11 : i1 to vector<256x1xi1>
    %13 = vector.broadcast %12 : vector<256x1xi1> to vector<256x1xi1>
    %14 = arith.xori %10, %13 : vector<256x1xi1>
    %15 = arith.andi %14, %8 : vector<256x1xi1>
    %16 = vector.broadcast %4 : i32 to vector<256x1xi32>
    %17 = arith.addi %6, %16 : vector<256x1xi32>
    %18 = arith.select %15, %17, %6 : vector<256x1xi1>, vector<256x1xi32>
    %c16_i32 = arith.constant 16 : i32
    %19 = vector.broadcast %c16_i32 : i32 to vector<256x1xi32>
    %20 = arith.cmpi slt, %18, %19 : vector<256x1xi32>
    %c0_i32_6 = arith.constant 0 : i32
    %c8_i32 = arith.constant 8 : i32
    %21 = arith.muli %c0_i32_6, %c8_i32 : i32
    %22 = tpu.assume_multiple %21, 8 : i32
    %c0_7 = arith.constant 0 : index
    %23 = arith.index_cast %22 : i32 to index
    %c0_8 = arith.constant 0 : index
    %c0_9 = arith.constant 0 : index
    %24 = vector.load %arg1[%c0_7, %23, %c0_8, %c0_9] : memref<1x19x32x128xbf16, #tpu.memory_space<vmem>>, vector<1x11x32x128xbf16>
    %25 = vector.shape_cast %24 : vector<1x11x32x128xbf16> to vector<11x32x128xbf16>
    %26 = vector.shape_cast %25 : vector<11x32x128xbf16> to vector<352x128xbf16>
    %27 = vector.extract_strided_slice %26 {offsets = [1, 0], sizes = [320, 128], strides = [1, 1]} : vector<352x128xbf16> to vector<320x128xbf16>
    %28 = vector.extract_strided_slice %26 {offsets = [2, 0], sizes = [320, 128], strides = [1, 1]} : vector<352x128xbf16> to vector<320x128xbf16>
    %cst_10 = arith.constant 0.000000e+00 : f32
    %29 = vector.broadcast %cst_10 : f32 to vector<256x128xf32>
    %30 = vector.extract_strided_slice %26 {offsets = [0, 0], sizes = [256, 128], strides = [1, 1]} : vector<352x128xbf16> to vector<256x128xbf16>
    %c0_11 = arith.constant 0 : index
    %c0_12 = arith.constant 0 : index
    %c0_13 = arith.constant 0 : index
    %31 = vector.load %arg2[%c0_11, %c0_12, %c0_13] : memref<9x128x128xbf16, #tpu.memory_space<vmem>>, vector<1x128x128xbf16>
    %32 = vector.shape_cast %31 : vector<1x128x128xbf16> to vector<128x128xbf16>
    %cst_14 = arith.constant dense<0.000000e+00> : vector<256x128xf32>
    %33 = tpu.matmul %30, %32, %cst_14 {dimension_numbers = #tpu.dot_dimension_numbers<[1], [0], [0], [1], [0, 0, 1, 1], [], []>} : vector<256x128xbf16>, vector<128x128xbf16>, vector<256x128xf32> -> vector<256x128xf32>
    %34 = arith.addf %29, %33 : vector<256x128xf32>
    %35 = vector.extract_strided_slice %27 {offsets = [0, 0], sizes = [256, 128], strides = [1, 1]} : vector<320x128xbf16> to vector<256x128xbf16>
    %c1 = arith.constant 1 : index
    %c0_15 = arith.constant 0 : index
    %c0_16 = arith.constant 0 : index
    %36 = vector.load %arg2[%c1, %c0_15, %c0_16] : memref<9x128x128xbf16, #tpu.memory_space<vmem>>, vector<1x128x128xbf16>
    %37 = vector.shape_cast %36 : vector<1x128x128xbf16> to vector<128x128xbf16>
    %cst_17 = arith.constant dense<0.000000e+00> : vector<256x128xf32>
    %38 = tpu.matmul %35, %37, %cst_17 {dimension_numbers = #tpu.dot_dimension_numbers<[1], [0], [0], [1], [0, 0, 1, 1], [], []>} : vector<256x128xbf16>, vector<128x128xbf16>, vector<256x128xf32> -> vector<256x128xf32>
    %39 = arith.addf %34, %38 : vector<256x128xf32>
    %40 = vector.extract_strided_slice %28 {offsets = [0, 0], sizes = [256, 128], strides = [1, 1]} : vector<320x128xbf16> to vector<256x128xbf16>
    %c2 = arith.constant 2 : index
    %c0_18 = arith.constant 0 : index
    %c0_19 = arith.constant 0 : index
    %41 = vector.load %arg2[%c2, %c0_18, %c0_19] : memref<9x128x128xbf16, #tpu.memory_space<vmem>>, vector<1x128x128xbf16>
    %42 = vector.shape_cast %41 : vector<1x128x128xbf16> to vector<128x128xbf16>
    %cst_20 = arith.constant dense<0.000000e+00> : vector<256x128xf32>
    %43 = tpu.matmul %40, %42, %cst_20 {dimension_numbers = #tpu.dot_dimension_numbers<[1], [0], [0], [1], [0, 0, 1, 1], [], []>} : vector<256x128xbf16>, vector<128x128xbf16>, vector<256x128xf32> -> vector<256x128xf32>
    %44 = arith.addf %39, %43 : vector<256x128xf32>
    %45 = vector.extract_strided_slice %26 {offsets = [32, 0], sizes = [256, 128], strides = [1, 1]} : vector<352x128xbf16> to vector<256x128xbf16>
    %c3 = arith.constant 3 : index
    %c0_21 = arith.constant 0 : index
    %c0_22 = arith.constant 0 : index
    %46 = vector.load %arg2[%c3, %c0_21, %c0_22] : memref<9x128x128xbf16, #tpu.memory_space<vmem>>, vector<1x128x128xbf16>
    %47 = vector.shape_cast %46 : vector<1x128x128xbf16> to vector<128x128xbf16>
    %cst_23 = arith.constant dense<0.000000e+00> : vector<256x128xf32>
    %48 = tpu.matmul %45, %47, %cst_23 {dimension_numbers = #tpu.dot_dimension_numbers<[1], [0], [0], [1], [0, 0, 1, 1], [], []>} : vector<256x128xbf16>, vector<128x128xbf16>, vector<256x128xf32> -> vector<256x128xf32>
    %49 = arith.addf %44, %48 : vector<256x128xf32>
    %50 = vector.extract_strided_slice %27 {offsets = [32, 0], sizes = [256, 128], strides = [1, 1]} : vector<320x128xbf16> to vector<256x128xbf16>
    %c4 = arith.constant 4 : index
    %c0_24 = arith.constant 0 : index
    %c0_25 = arith.constant 0 : index
    %51 = vector.load %arg2[%c4, %c0_24, %c0_25] : memref<9x128x128xbf16, #tpu.memory_space<vmem>>, vector<1x128x128xbf16>
    %52 = vector.shape_cast %51 : vector<1x128x128xbf16> to vector<128x128xbf16>
    %cst_26 = arith.constant dense<0.000000e+00> : vector<256x128xf32>
    %53 = tpu.matmul %50, %52, %cst_26 {dimension_numbers = #tpu.dot_dimension_numbers<[1], [0], [0], [1], [0, 0, 1, 1], [], []>} : vector<256x128xbf16>, vector<128x128xbf16>, vector<256x128xf32> -> vector<256x128xf32>
    %54 = arith.addf %49, %53 : vector<256x128xf32>
    %55 = vector.extract_strided_slice %28 {offsets = [32, 0], sizes = [256, 128], strides = [1, 1]} : vector<320x128xbf16> to vector<256x128xbf16>
    %c5 = arith.constant 5 : index
    %c0_27 = arith.constant 0 : index
    %c0_28 = arith.constant 0 : index
    %56 = vector.load %arg2[%c5, %c0_27, %c0_28] : memref<9x128x128xbf16, #tpu.memory_space<vmem>>, vector<1x128x128xbf16>
    %57 = vector.shape_cast %56 : vector<1x128x128xbf16> to vector<128x128xbf16>
    %cst_29 = arith.constant dense<0.000000e+00> : vector<256x128xf32>
    %58 = tpu.matmul %55, %57, %cst_29 {dimension_numbers = #tpu.dot_dimension_numbers<[1], [0], [0], [1], [0, 0, 1, 1], [], []>} : vector<256x128xbf16>, vector<128x128xbf16>, vector<256x128xf32> -> vector<256x128xf32>
    %59 = arith.addf %54, %58 : vector<256x128xf32>
    %60 = vector.extract_strided_slice %26 {offsets = [64, 0], sizes = [256, 128], strides = [1, 1]} : vector<352x128xbf16> to vector<256x128xbf16>
    %c6 = arith.constant 6 : index
    %c0_30 = arith.constant 0 : index
    %c0_31 = arith.constant 0 : index
    %61 = vector.load %arg2[%c6, %c0_30, %c0_31] : memref<9x128x128xbf16, #tpu.memory_space<vmem>>, vector<1x128x128xbf16>
    %62 = vector.shape_cast %61 : vector<1x128x128xbf16> to vector<128x128xbf16>
    %cst_32 = arith.constant dense<0.000000e+00> : vector<256x128xf32>
    %63 = tpu.matmul %60, %62, %cst_32 {dimension_numbers = #tpu.dot_dimension_numbers<[1], [0], [0], [1], [0, 0, 1, 1], [], []>} : vector<256x128xbf16>, vector<128x128xbf16>, vector<256x128xf32> -> vector<256x128xf32>
    %64 = arith.addf %59, %63 : vector<256x128xf32>
    %65 = vector.extract_strided_slice %27 {offsets = [64, 0], sizes = [256, 128], strides = [1, 1]} : vector<320x128xbf16> to vector<256x128xbf16>
    %c7 = arith.constant 7 : index
    %c0_33 = arith.constant 0 : index
    %c0_34 = arith.constant 0 : index
    %66 = vector.load %arg2[%c7, %c0_33, %c0_34] : memref<9x128x128xbf16, #tpu.memory_space<vmem>>, vector<1x128x128xbf16>
    %67 = vector.shape_cast %66 : vector<1x128x128xbf16> to vector<128x128xbf16>
    %cst_35 = arith.constant dense<0.000000e+00> : vector<256x128xf32>
    %68 = tpu.matmul %65, %67, %cst_35 {dimension_numbers = #tpu.dot_dimension_numbers<[1], [0], [0], [1], [0, 0, 1, 1], [], []>} : vector<256x128xbf16>, vector<128x128xbf16>, vector<256x128xf32> -> vector<256x128xf32>
    %69 = arith.addf %64, %68 : vector<256x128xf32>
    %70 = vector.extract_strided_slice %28 {offsets = [64, 0], sizes = [256, 128], strides = [1, 1]} : vector<320x128xbf16> to vector<256x128xbf16>
    %c8 = arith.constant 8 : index
    %c0_36 = arith.constant 0 : index
    %c0_37 = arith.constant 0 : index
    %71 = vector.load %arg2[%c8, %c0_36, %c0_37] : memref<9x128x128xbf16, #tpu.memory_space<vmem>>, vector<1x128x128xbf16>
    %72 = vector.shape_cast %71 : vector<1x128x128xbf16> to vector<128x128xbf16>
    %cst_38 = arith.constant dense<0.000000e+00> : vector<256x128xf32>
    %73 = tpu.matmul %70, %72, %cst_38 {dimension_numbers = #tpu.dot_dimension_numbers<[1], [0], [0], [1], [0, 0, 1, 1], [], []>} : vector<256x128xbf16>, vector<128x128xbf16>, vector<256x128xf32> -> vector<256x128xf32>
    %74 = arith.addf %69, %73 : vector<256x128xf32>
    %c0_39 = arith.constant 0 : index
    %c0_40 = arith.constant 0 : index
    %75 = vector.load %arg3[%c0_39, %c0_40] : memref<1x128xf32, #tpu.memory_space<vmem>>, vector<1x128xf32>
    %76 = vector.broadcast %75 : vector<1x128xf32> to vector<256x128xf32>
    %77 = arith.addf %74, %76 : vector<256x128xf32>
    %cst_41 = arith.constant 0.000000e+00 : f32
    %78 = vector.broadcast %cst_41 : f32 to vector<256x128xf32>
    %79 = arith.maximumf %77, %78 : vector<256x128xf32>
    %cst_42 = arith.constant 0.000000e+00 : f32
    %80 = vector.shape_cast %20 : vector<256x1xi1> to vector<256x1xi1>
    %81 = vector.broadcast %80 : vector<256x1xi1> to vector<256x128xi1>
    %82 = vector.broadcast %cst_42 : f32 to vector<256x128xf32>
    %83 = arith.select %81, %79, %82 : vector<256x128xi1>, vector<256x128xf32>
    %84 = vector.shape_cast %83 : vector<256x128xf32> to vector<8x32x128xf32>
    %85 = vector.extract_strided_slice %84 {offsets = [0, 0, 0], sizes = [8, 31, 128], strides = [1, 1, 1]} : vector<8x32x128xf32> to vector<8x31x128xf32>
    %86 = arith.truncf %85 : vector<8x31x128xf32> to vector<8x31x128xbf16>
    %c8_i32_43 = arith.constant 8 : i32
    %87 = arith.muli %c0_i32_6, %c8_i32_43 : i32
    %c1_i32_44 = arith.constant 1 : i32
    %88 = arith.addi %87, %c1_i32_44 : i32
    %c0_45 = arith.constant 0 : index
    %89 = arith.index_cast %88 : i32 to index
    %c1_46 = arith.constant 1 : index
    %c0_47 = arith.constant 0 : index
    %90 = vector.load %arg4[%c0_45, %89, %c1_46, %c0_47] : memref<1x19x32x128xbf16, #tpu.memory_space<vmem>>, vector<1x8x31x128xbf16>
    %91 = vector.shape_cast %90 : vector<1x8x31x128xbf16> to vector<8x31x128xbf16>
    %92 = vector.shape_cast %86 : vector<8x31x128xbf16> to vector<1x8x31x128xbf16>
    tpu.vector_store %arg4[%c0_45, %89, %c1_46, %c0_47], %92 {strides = array<i32>} : memref<1x19x32x128xbf16, #tpu.memory_space<vmem>>, vector<1x8x31x128xbf16>,
    %c1_i32_48 = arith.constant 1 : i32
    %c8_i32_49 = arith.constant 8 : i32
    %93 = arith.muli %c1_i32_48, %c8_i32_49 : i32
    %94 = tpu.assume_multiple %93, 8 : i32
    %c0_50 = arith.constant 0 : index
    %95 = arith.index_cast %94 : i32 to index
    %c0_51 = arith.constant 0 : index
    %c0_52 = arith.constant 0 : index
    %96 = vector.load %arg1[%c0_50, %95, %c0_51, %c0_52] : memref<1x19x32x128xbf16, #tpu.memory_space<vmem>>, vector<1x11x32x128xbf16>
    %97 = vector.shape_cast %96 : vector<1x11x32x128xbf16> to vector<11x32x128xbf16>
    %98 = vector.shape_cast %97 : vector<11x32x128xbf16> to vector<352x128xbf16>
    %99 = vector.extract_strided_slice %98 {offsets = [1, 0], sizes = [320, 128], strides = [1, 1]} : vector<352x128xbf16> to vector<320x128xbf16>
    %100 = vector.extract_strided_slice %98 {offsets = [2, 0], sizes = [320, 128], strides = [1, 1]} : vector<352x128xbf16> to vector<320x128xbf16>
    %cst_53 = arith.constant 0.000000e+00 : f32
    %101 = vector.broadcast %cst_53 : f32 to vector<256x128xf32>
    %102 = vector.extract_strided_slice %98 {offsets = [0, 0], sizes = [256, 128], strides = [1, 1]} : vector<352x128xbf16> to vector<256x128xbf16>
    %c0_54 = arith.constant 0 : index
    %c0_55 = arith.constant 0 : index
    %c0_56 = arith.constant 0 : index
    %103 = vector.load %arg2[%c0_54, %c0_55, %c0_56] : memref<9x128x128xbf16, #tpu.memory_space<vmem>>, vector<1x128x128xbf16>
    %104 = vector.shape_cast %103 : vector<1x128x128xbf16> to vector<128x128xbf16>
    %cst_57 = arith.constant dense<0.000000e+00> : vector<256x128xf32>
    %105 = tpu.matmul %102, %104, %cst_57 {dimension_numbers = #tpu.dot_dimension_numbers<[1], [0], [0], [1], [0, 0, 1, 1], [], []>} : vector<256x128xbf16>, vector<128x128xbf16>, vector<256x128xf32> -> vector<256x128xf32>
    %106 = arith.addf %101, %105 : vector<256x128xf32>
    %107 = vector.extract_strided_slice %99 {offsets = [0, 0], sizes = [256, 128], strides = [1, 1]} : vector<320x128xbf16> to vector<256x128xbf16>
    %c1_58 = arith.constant 1 : index
    %c0_59 = arith.constant 0 : index
    %c0_60 = arith.constant 0 : index
    %108 = vector.load %arg2[%c1_58, %c0_59, %c0_60] : memref<9x128x128xbf16, #tpu.memory_space<vmem>>, vector<1x128x128xbf16>
    %109 = vector.shape_cast %108 : vector<1x128x128xbf16> to vector<128x128xbf16>
    %cst_61 = arith.constant dense<0.000000e+00> : vector<256x128xf32>
    %110 = tpu.matmul %107, %109, %cst_61 {dimension_numbers = #tpu.dot_dimension_numbers<[1], [0], [0], [1], [0, 0, 1, 1], [], []>} : vector<256x128xbf16>, vector<128x128xbf16>, vector<256x128xf32> -> vector<256x128xf32>
    %111 = arith.addf %106, %110 : vector<256x128xf32>
    %112 = vector.extract_strided_slice %100 {offsets = [0, 0], sizes = [256, 128], strides = [1, 1]} : vector<320x128xbf16> to vector<256x128xbf16>
    %c2_62 = arith.constant 2 : index
    %c0_63 = arith.constant 0 : index
    %c0_64 = arith.constant 0 : index
    %113 = vector.load %arg2[%c2_62, %c0_63, %c0_64] : memref<9x128x128xbf16, #tpu.memory_space<vmem>>, vector<1x128x128xbf16>
    %114 = vector.shape_cast %113 : vector<1x128x128xbf16> to vector<128x128xbf16>
    %cst_65 = arith.constant dense<0.000000e+00> : vector<256x128xf32>
    %115 = tpu.matmul %112, %114, %cst_65 {dimension_numbers = #tpu.dot_dimension_numbers<[1], [0], [0], [1], [0, 0, 1, 1], [], []>} : vector<256x128xbf16>, vector<128x128xbf16>, vector<256x128xf32> -> vector<256x128xf32>
    %116 = arith.addf %111, %115 : vector<256x128xf32>
    %117 = vector.extract_strided_slice %98 {offsets = [32, 0], sizes = [256, 128], strides = [1, 1]} : vector<352x128xbf16> to vector<256x128xbf16>
    %c3_66 = arith.constant 3 : index
    %c0_67 = arith.constant 0 : index
    %c0_68 = arith.constant 0 : index
    %118 = vector.load %arg2[%c3_66, %c0_67, %c0_68] : memref<9x128x128xbf16, #tpu.memory_space<vmem>>, vector<1x128x128xbf16>
    %119 = vector.shape_cast %118 : vector<1x128x128xbf16> to vector<128x128xbf16>
    %cst_69 = arith.constant dense<0.000000e+00> : vector<256x128xf32>
    %120 = tpu.matmul %117, %119, %cst_69 {dimension_numbers = #tpu.dot_dimension_numbers<[1], [0], [0], [1], [0, 0, 1, 1], [], []>} : vector<256x128xbf16>, vector<128x128xbf16>, vector<256x128xf32> -> vector<256x128xf32>
    %121 = arith.addf %116, %120 : vector<256x128xf32>
    %122 = vector.extract_strided_slice %99 {offsets = [32, 0], sizes = [256, 128], strides = [1, 1]} : vector<320x128xbf16> to vector<256x128xbf16>
    %c4_70 = arith.constant 4 : index
    %c0_71 = arith.constant 0 : index
    %c0_72 = arith.constant 0 : index
    %123 = vector.load %arg2[%c4_70, %c0_71, %c0_72] : memref<9x128x128xbf16, #tpu.memory_space<vmem>>, vector<1x128x128xbf16>
    %124 = vector.shape_cast %123 : vector<1x128x128xbf16> to vector<128x128xbf16>
    %cst_73 = arith.constant dense<0.000000e+00> : vector<256x128xf32>
    %125 = tpu.matmul %122, %124, %cst_73 {dimension_numbers = #tpu.dot_dimension_numbers<[1], [0], [0], [1], [0, 0, 1, 1], [], []>} : vector<256x128xbf16>, vector<128x128xbf16>, vector<256x128xf32> -> vector<256x128xf32>
    %126 = arith.addf %121, %125 : vector<256x128xf32>
    %127 = vector.extract_strided_slice %100 {offsets = [32, 0], sizes = [256, 128], strides = [1, 1]} : vector<320x128xbf16> to vector<256x128xbf16>
    %c5_74 = arith.constant 5 : index
    %c0_75 = arith.constant 0 : index
    %c0_76 = arith.constant 0 : index
    %128 = vector.load %arg2[%c5_74, %c0_75, %c0_76] : memref<9x128x128xbf16, #tpu.memory_space<vmem>>, vector<1x128x128xbf16>
    %129 = vector.shape_cast %128 : vector<1x128x128xbf16> to vector<128x128xbf16>
    %cst_77 = arith.constant dense<0.000000e+00> : vector<256x128xf32>
    %130 = tpu.matmul %127, %129, %cst_77 {dimension_numbers = #tpu.dot_dimension_numbers<[1], [0], [0], [1], [0, 0, 1, 1], [], []>} : vector<256x128xbf16>, vector<128x128xbf16>, vector<256x128xf32> -> vector<256x128xf32>
    %131 = arith.addf %126, %130 : vector<256x128xf32>
    %132 = vector.extract_strided_slice %98 {offsets = [64, 0], sizes = [256, 128], strides = [1, 1]} : vector<352x128xbf16> to vector<256x128xbf16>
    %c6_78 = arith.constant 6 : index
    %c0_79 = arith.constant 0 : index
    %c0_80 = arith.constant 0 : index
    %133 = vector.load %arg2[%c6_78, %c0_79, %c0_80] : memref<9x128x128xbf16, #tpu.memory_space<vmem>>, vector<1x128x128xbf16>
    %134 = vector.shape_cast %133 : vector<1x128x128xbf16> to vector<128x128xbf16>
    %cst_81 = arith.constant dense<0.000000e+00> : vector<256x128xf32>
    %135 = tpu.matmul %132, %134, %cst_81 {dimension_numbers = #tpu.dot_dimension_numbers<[1], [0], [0], [1], [0, 0, 1, 1], [], []>} : vector<256x128xbf16>, vector<128x128xbf16>, vector<256x128xf32> -> vector<256x128xf32>
    %136 = arith.addf %131, %135 : vector<256x128xf32>
    %137 = vector.extract_strided_slice %99 {offsets = [64, 0], sizes = [256, 128], strides = [1, 1]} : vector<320x128xbf16> to vector<256x128xbf16>
    %c7_82 = arith.constant 7 : index
    %c0_83 = arith.constant 0 : index
    %c0_84 = arith.constant 0 : index
    %138 = vector.load %arg2[%c7_82, %c0_83, %c0_84] : memref<9x128x128xbf16, #tpu.memory_space<vmem>>, vector<1x128x128xbf16>
    %139 = vector.shape_cast %138 : vector<1x128x128xbf16> to vector<128x128xbf16>
    %cst_85 = arith.constant dense<0.000000e+00> : vector<256x128xf32>
    %140 = tpu.matmul %137, %139, %cst_85 {dimension_numbers = #tpu.dot_dimension_numbers<[1], [0], [0], [1], [0, 0, 1, 1], [], []>} : vector<256x128xbf16>, vector<128x128xbf16>, vector<256x128xf32> -> vector<256x128xf32>
    %141 = arith.addf %136, %140 : vector<256x128xf32>
    %142 = vector.extract_strided_slice %100 {offsets = [64, 0], sizes = [256, 128], strides = [1, 1]} : vector<320x128xbf16> to vector<256x128xbf16>
    %c8_86 = arith.constant 8 : index
    %c0_87 = arith.constant 0 : index
    %c0_88 = arith.constant 0 : index
    %143 = vector.load %arg2[%c8_86, %c0_87, %c0_88] : memref<9x128x128xbf16, #tpu.memory_space<vmem>>, vector<1x128x128xbf16>
    %144 = vector.shape_cast %143 : vector<1x128x128xbf16> to vector<128x128xbf16>
    %cst_89 = arith.constant dense<0.000000e+00> : vector<256x128xf32>
    %145 = tpu.matmul %142, %144, %cst_89 {dimension_numbers = #tpu.dot_dimension_numbers<[1], [0], [0], [1], [0, 0, 1, 1], [], []>} : vector<256x128xbf16>, vector<128x128xbf16>, vector<256x128xf32> -> vector<256x128xf32>
    %146 = arith.addf %141, %145 : vector<256x128xf32>
    %c0_90 = arith.constant 0 : index
    %c0_91 = arith.constant 0 : index
    %147 = vector.load %arg3[%c0_90, %c0_91] : memref<1x128xf32, #tpu.memory_space<vmem>>, vector<1x128xf32>
    %148 = vector.broadcast %147 : vector<1x128xf32> to vector<256x128xf32>
    %149 = arith.addf %146, %148 : vector<256x128xf32>
    %cst_92 = arith.constant 0.000000e+00 : f32
    %150 = vector.broadcast %cst_92 : f32 to vector<256x128xf32>
    %151 = arith.maximumf %149, %150 : vector<256x128xf32>
    %cst_93 = arith.constant 0.000000e+00 : f32
    %152 = vector.shape_cast %20 : vector<256x1xi1> to vector<256x1xi1>
    %153 = vector.broadcast %152 : vector<256x1xi1> to vector<256x128xi1>
    %154 = vector.broadcast %cst_93 : f32 to vector<256x128xf32>
    %155 = arith.select %153, %151, %154 : vector<256x128xi1>, vector<256x128xf32>
    %156 = vector.shape_cast %155 : vector<256x128xf32> to vector<8x32x128xf32>
    %157 = vector.extract_strided_slice %156 {offsets = [0, 0, 0], sizes = [8, 31, 128], strides = [1, 1, 1]} : vector<8x32x128xf32> to vector<8x31x128xf32>
    %158 = arith.truncf %157 : vector<8x31x128xf32> to vector<8x31x128xbf16>
    %c8_i32_94 = arith.constant 8 : i32
    %159 = arith.muli %c1_i32_48, %c8_i32_94 : i32
    %c1_i32_95 = arith.constant 1 : i32
    %160 = arith.addi %159, %c1_i32_95 : i32
    %c0_96 = arith.constant 0 : index
    %161 = arith.index_cast %160 : i32 to index
    %c1_97 = arith.constant 1 : index
    %c0_98 = arith.constant 0 : index
    %162 = vector.load %arg4[%c0_96, %161, %c1_97, %c0_98] : memref<1x19x32x128xbf16, #tpu.memory_space<vmem>>, vector<1x8x31x128xbf16>
    %163 = vector.shape_cast %162 : vector<1x8x31x128xbf16> to vector<8x31x128xbf16>
    %164 = vector.shape_cast %158 : vector<8x31x128xbf16> to vector<1x8x31x128xbf16>
    tpu.vector_store %arg4[%c0_96, %161, %c1_97, %c0_98], %164 {strides = array<i32>} : memref<1x19x32x128xbf16, #tpu.memory_space<vmem>>, vector<1x8x31x128xbf16>,
    %c2_i32 = arith.constant 2 : i32
    return
  }
  func.func @transform_0(%arg0: i32) -> (i32, i32, i32, i32) {
    %c0_i32 = arith.constant 0 : i32
    %c0_i32_0 = arith.constant 0 : i32
    %c0_i32_1 = arith.constant 0 : i32
    %c0_i32_2 = arith.constant 0 : i32
    return %arg0, %c0_i32, %c0_i32_0, %c0_i32_1 : i32, i32, i32, i32
  }
  func.func @transform_1(%arg0: i32) -> (i32, i32, i32) {
    %c0_i32 = arith.constant 0 : i32
    %c0_i32_0 = arith.constant 0 : i32
    %c0_i32_1 = arith.constant 0 : i32
    %c0_i32_2 = arith.constant 0 : i32
    return %c0_i32, %c0_i32_0, %c0_i32_1 : i32, i32, i32
  }
  func.func @transform_2(%arg0: i32) -> (i32, i32) {
    %c0_i32 = arith.constant 0 : i32
    %c0_i32_0 = arith.constant 0 : i32
    %c0_i32_1 = arith.constant 0 : i32
    return %c0_i32, %c0_i32_0 : i32, i32
  }
  func.func @transform_3(%arg0: i32) -> (i32, i32, i32, i32) {
    %c0_i32 = arith.constant 0 : i32
    %c0_i32_0 = arith.constant 0 : i32
    %c0_i32_1 = arith.constant 0 : i32
    %c0_i32_2 = arith.constant 0 : i32
    return %arg0, %c0_i32, %c0_i32_0, %c0_i32_1 : i32, i32, i32, i32
  }
}

</mosaic_0001>

<bundles_post_ra>
// kernel: tpu_custom_call.1
= control target key start
LH: loop header
LB: loop body
LE: loop exit
PB: predicated region body
PF: predicated region fallthrough
CT: control target
= control target key end

     0   :  { %8 = vsyncpa [#allocation3], 0  ;;  %s11429_s0 = inlined_call_operand.hbm [shape: bf16[2,19,32,128], index: 0, kind: input, shape index: {}]   ;;  %s11430_s1 = inlined_call_operand.hbm [shape: bf16[9,128,128], index: 1, kind: input, shape index: {}]   ;;  %s11431_s2 = inlined_call_operand.vmem [shape: f32[1,128], index: 2, kind: input, shape index: {}]   ;;  %s11432_s3 = inlined_call_operand.hbm [shape: bf16[2,19,32,128], index: 3, kind: output, shape index: {}]  }
   0x1   :  { %10 = vsyncpa [#allocation3 + $0x1], 0 }
   0x2   :  { %11 = vsyncpa [#allocation6], 0 }
   0x3   :  { %12 = vsyncpa [#allocation4], 0 }
   0x4   :  { %14 = vsyncpa [#allocation4 + $0x1], 0  ;;  %s9531_s12 = smov 0   ;;  %s9533_s13 = smov 0  }
   0x5   :  { %s9535_s14 = smov 0   ;;  %s9537_s15 = smov 0  }
   0x6 LB: > { %s9552_s16 = sadd.s32 4294967295, %s9500_s15   ;;  %s7374_s17 = sadd.s32 4294967294, %s9500_s15   ;;  %s9500_s15 = sphi %s9537_s15, %s11512_s15   ;;  %s9496_s14 = sphi %s9535_s14, %s11511_s14   ;;  %s9492_s13 = sphi %s9533_s13, %s11510_s13   ;;  %s9488_s12 = sphi %s9531_s12, %s11509_s12  }
   0x7   : > { %p40_p0 = scmp.ne.s32.totalorder %s9492_s13, %s9488_s12  ;;  %p11433_p1 = scmp.eq.s32.totalorder %s9552_s16, 0 }
   0x8   : > { %p112_p3 = scmp.eq.s32.totalorder %s7374_s17, 1  ;;  %p7375_p5 = scmp.ge.s32.totalorder %s9500_s15, 1 }
   0x9   : > { %p9561_p4 = por %p11433_p1, %p40_p0  ;;  %p119_p7 = scmp.lt.s32.totalorder %s9500_s15, 3 }
   0xa   : > { %p9566_p6 = por %p112_p3, %p40_p0  ;;  %s9502_s21 = smov [#allocation5]  }
   0xb   : > { %s11456_s18 = scalar_select %p9561_p4, 1, 0 }
   0xc   : > { %s11457_s19 = scalar_select %p9566_p6, 1, 0 }
   0xd   : > { %p9571_p8 = pnand %p7375_p5, %p119_p7  ;;  %s131_s22 = sshll.u32 %s9502_s21, 4  ;;  %s9575_s22 = int_to_ptr.vmem [resolvable:$true] %s131_s22 }
   0xe   : > { %s9587_s24 = sadd.s32 1, %s9500_s15   ;;  %s27_s25 = sadd.s32 1, %s9496_s14 }
   0xf   : > { %s11458_s20 = scalar_select %p9571_p8, 1, 0 }
  0x10   : > { %p9101_p9 = pneg %p9571_p8  ;;  %s24_s26 = ssub.s32 %s9500_s15, %s9587_s24 }
  0x11   : > { %s9372_s29 = scalar_lea.hbm %s11430_s1, 9216 }
  0x12   : > { %p9582_p11 = pnand %p9101_p9, %p11433_p1  ;;  %p9373_p12 = scmp.ne.s32.totalorder %s11430_s1, %s9372_s29 }
  0x13   : > { %p9379_p5 = scmp.lt.u32.totalorder %s9372_s29, %s11430_s1 }
  0x14   : > { %p9374_p13 = pneg %p9582_p11 }
  0x16   : > { %p9375_p0 = pnand %p9374_p13, %p9373_p12 }
  0x18   : > { %p9376_p3 = pneg %p9375_p0 }
  0x1a   : > { %p9381_p7 = pnand %p9379_p5, %p9376_p3 }
  0x1c   : > { %9384 = shalt.err (!%p9381_p7)
}
  0x1d   : > { %s9385_s7 = scalar_lea.vmem %s9575_s22, 9216  ;;  %p9393_p2 = scmp.lt.s32.totalorder %s9575_s22, %s9575_s22 }
  0x1e   : > { %p9386_p9 = scmp.ne.s32.totalorder %s9575_s22, %s9385_s7  ;;  %p9394_p6 = scmp.lt.s32.totalorder %s9385_s7, %s9385_s7 }
  0x20   : > { %p9388_p10 = pnand %p9386_p9, %p9374_p13  ;;  %p9395_p4 = por %p9394_p6, %p9393_p2 }
  0x22   : > { %p9389_p1 = pneg %p9388_p10 }
  0x24   : > { %p9396_p8 = pnand %p9395_p4, %p9389_p1 }
  0x26   : > { %9399 = shalt.err (!%p9396_p8)
}
  0x27   : > { %s9503_s8 = smov 64   ;;  %s9504_s9 = smov 4  }
  0x28   : > { %9104 = dma.hbm_to_vmem [thread:$0]  (!%p9582_p11), %s11430_s1, 9216, %s9575_s22, [#allocation6], %s9503_s8, %s9503_s8, %s9504_s9  }
  0x29   : > { %p25_p1 = scmp.eq.s32.totalorder %s24_s26, 0  ;;  %p34_p2 = scmp.ne.s32.totalorder %s9496_s14, %s9492_s13 }
  0x2a   : > { %p35_p4 = scmp.eq.s32.totalorder %s9500_s15, 0  ;;  %p9114_p6 = scmp.lt.s32.totalorder %s9500_s15, 2 }
  0x2b   : > { %s9621_s17 = scalar_select %p25_p1, %s9496_s14, %s27_s25  }
  0x2c   : > { %p36_p8 = por %p35_p4, %p34_p2  ;;  %p11460_p10 = scmp.eq.s32.totalorder %s9552_s16, 1 }
  0x2d   : > { %s148_s23 = sand.u32 1, %s9496_s14   ;;  %s9090_s27 = smul.u32 4864, %s9500_s15 }
  0x2e   : > { %p9625_p12 = por %p11460_p10, %p34_p2  ;;  %s9089_s28 = smul.u32 304, %s148_s23 }
  0x2f   : > { %p9631_p13 = pnand %p9114_p6, %p36_p8  ;;  %s9638_s25 = scalar_lea.hbm %s11429_s0, %s9090_s27 }
  0x30   : > { %s152_s30 = scalar_lea.vmem [#allocation2], %s9089_s28  ;;  %s9642_s5 = scalar_lea.sflag [#allocation3], %s148_s23 }
  0x31   : > { %s159_s4 = sshll.u32 %s152_s30, 4  ;;  %s9400_s6 = scalar_lea.hbm %s9638_s25, 4864  ;;  %s9640_s4 = int_to_ptr.vmem [resolvable:$true] %s159_s4 }
  0x32   : > { %p9401_p11 = scmp.ne.s32.totalorder %s9638_s25, %s9400_s6  ;;  %p9402_p0 = pneg %p9631_p13 }
  0x33   : > { %s9405_s11 = scalar_lea.hbm %s11429_s0, 9728  ;;  %p9406_p7 = scmp.lt.u32.totalorder %s9638_s25, %s11429_s0 }
  0x34   : > { %p9403_p3 = pnand %p9402_p0, %p9401_p11  ;;  %p9407_p9 = scmp.lt.u32.totalorder %s9405_s11, %s9400_s6 }
  0x35   : > { %p9409_p2 = scmp.lt.u32.totalorder %s9400_s6, %s9638_s25 }
  0x36   : > { %p9404_p5 = pneg %p9403_p3  ;;  %p9408_p1 = por %p9407_p9, %p9406_p7 }
  0x38   : > { %p9410_p4 = por %p9409_p2, %p9408_p1 }
  0x3a   : > { %p9411_p6 = pnand %p9410_p4, %p9404_p5 }
  0x3c   : > { %9414 = shalt.err (!%p9411_p6)
}
  0x3d   : > { %s9415_s23 = scalar_lea.vmem %s9640_s4, 4864  ;;  %s9505_s28 = smov [#allocation2]  }
  0x3e   : > { %p9416_p8 = scmp.ne.s32.totalorder %s9640_s4, %s9415_s23  ;;  %s9420_s26 = sshll.u32 %s9505_s28, 4  ;;  %s9421_s26 = int_to_ptr.vmem [resolvable:$false] %s9420_s26 }
  0x3f   : > { %s9422_s30 = scalar_lea.vmem %s9421_s26, 9728  ;;  %p9423_p3 = scmp.lt.s32.totalorder %s9640_s4, %s9421_s26 }
  0x40   : > { %p9418_p10 = pnand %p9416_p8, %p9402_p0  ;;  %p9424_p7 = scmp.lt.s32.totalorder %s9422_s30, %s9415_s23 }
  0x42   : > { %p9419_p11 = pneg %p9418_p10  ;;  %p9425_p9 = por %p9424_p7, %p9423_p3 }
  0x44   : > { %p9426_p1 = pnand %p9425_p9, %p9419_p11 }
  0x46   : > { %9429 = shalt.err (!%p9426_p1)
}
  0x47   : > { %9108 = dma.hbm_to_vmem [thread:$0]  (!%p9631_p13), %s9638_s25, 4864, %s9640_s4, %s9642_s5, %s9503_s8, %s9503_s8, %s9504_s9  }
  0x48   : > { %p11463_p0 = scmp.ne.s32.totalorder %s11458_s20, 0 }
  0x4a   : > { %171 = sbr.rel (%p11463_p0) target bundleno = 952 (0x3b8), region = 32 }
  0x51   : > { %s9676_s6 = sand.u32 1, %s9492_s13   ;;  %p11464_p5 = scmp.ne.s32.totalorder %s11456_s18, 0 }
  0x52   : > { %s9091_s7 = smul.u32 304, %s9676_s6  ;;  %s174_s10 = scalar_lea.sflag [#allocation3], %s9676_s6 }
  0x54   : > { %s9682_s29 = scalar_lea.vmem [#allocation2], %s9091_s7 }
  0x55   : > { %9475 = dma.done.wait (%p11464_p5), %s174_s10, 4864  }
  0x56   : > { %9477 = vsyncadd (%p11464_p5), %s174_s10, 4294962432  ;;  %p11465_p13 = scmp.eq.s32.totalorder %s9552_s16, 0 }
  0x58   : > { %9479 = dma.done.wait (%p11465_p13), [#allocation6], 9216   ;;  %p11466_p2 = pmov %p11465_p13 }
  0x59   : > { %v9156_v0 = vld [vmem:[#allocation5 + $0x40] sm:$0xff]   ;;  %v9158_v2 = vld [vmem:[#allocation5 + $0x48] sm:$0xff]   ;;  %v9160_v4 = vld [vmem:[#allocation5 + $0x50] sm:$0xff]   ;;  %vm890_vm0 = vsmask.f32 7424  ;;  %vm1490_vm1 = vcmask 1046528  }
  0x5a   : > { %9481 = vsyncadd (%p11466_p2), [#allocation6], 4294958080  ;;  %v9157_v1 = vld [vmem:[#allocation5] sm:$0xff]   ;;  %8225 = vmatprep.subr.bf16.mxu0 %v9156_v0  ;;  %v9159_v3 = vld [vmem:[#allocation5 + $0x8] sm:$0xff]   ;;  %s10396_s18 = scalar_lea.vmem [#allocation7], %s9091_s7  ;;  %vm3992_vm5 = vcmask 1043456  }
  0x5b   : > { %8273 = vmatprep.subr.bf16.mxu1 %v9157_v1  ;;  %8226 = vmatpush3.bf16.msra.mxu0 %v9156_v0  ;;  %v9161_v5 = vld [vmem:[#allocation5 + $0x10] sm:$0xff]   ;;  %v9162_v6 = vld [vmem:[#allocation5 + $0x58] sm:$0xff]   ;;  %v9164_v8 = vld [vmem:[#allocation5 + $0x60] sm:$0xff]   ;;  %vm3684_vm2 = vsmask.f32 256  ;;  %s9092_s4 = smul.u32 4864, %s9552_s16 }
  0x5c   : > { %8274 = vmatpush3.bf16.msra.mxu1 %v9157_v1  ;;  %8227 = vmatprep.subr.bf16.mxu0 %v9158_v2  ;;  %v9163_v7 = vld [vmem:[#allocation5 + $0x18] sm:$0xff]   ;;  %v9165_v9 = vld [vmem:[#allocation5 + $0x20] sm:$0xff]   ;;  %v9166_v10 = vld [vmem:[#allocation5 + $0x68] sm:$0xff]   ;;  %vm3685_vm3 = vsmask.f32 4368  ;;  %s7290_s5 = sshll.u32 %s10396_s18, 4  ;;  %s11378_s5 = int_to_ptr.vmem [resolvable:$true] %s7290_s5 }
  0x5d   : > { %8275 = vmatprep.subr.bf16.mxu1 %v9159_v3  ;;  %v9167_v11 = vld [vmem:[#allocation5 + $0x28] sm:$0xff]   ;;  %v9693_v12 = vld [vmem:[%s9682_s29] sm:$0xff]   ;;  %v9703_v17 = vld [vmem:[%s9682_s29 + $0x10] sm:$0xff]   ;;  %vm3993_vm6 = vsmask.f32 7938  ;;  %s11376_s22 = scalar_lea.hbm %s11432_s3, %s9092_s4  ;;  %s7277_s16 = scalar_lea.sflag [#allocation4], %s9676_s6 }
  0x5e   : > { %v9696_v13 = vld [vmem:[%s9682_s29 + $0x8] sm:$0xff]   ;;  %v892_v14 = vshrl.u32 %v9693_v12, 16  ;;  %v894_v15 = vshll.u32 %v9693_v12, 16  ;;  %8289 = vmatprep.mubr.bf16.mxu1 %v9693_v12  ;;  %v9168_v18 = vld [vmem:[#allocation5 + $0x70] sm:$0xff]   ;;  %v9706_v22 = vld [vmem:[%s9682_s29 + $0x18] sm:$0xff]   ;;  %v907_v26 = vshll.u32 %v9703_v17, 16 }
  0x5f   : > { %8228 = vmatpush3.bf16.msra.mxu0 %v9158_v2  ;;  %v899_v16 = vshll.u32 %v9696_v13, 16  ;;  %v9169_v19 = vld [vmem:[#allocation5 + $0x30] sm:$0xff]   ;;  %v9170_v23 = vld [vmem:[#allocation5 + $0x78] sm:$0xff]   ;;  %v903_v25 = vshrl.u32 %v9696_v13, 16  ;;  %v911_v29 = vshrl.u32 %v9703_v17, 16  ;;  %v915_v30 = vshll.u32 %v9706_v22, 16  ;;  %vm10649_vm4 = vmor %vm3684_vm2, %vm3685_vm3 }
  0x60   : > { %8276 = vmatpush3.bf16.msra.mxu1 %v9159_v3  ;;  %8229 = vmatprep.subr.bf16.mxu0 %v9160_v4  ;;  %v896_v20 = vrot.slane %v894_v15, 1  ;;  %v9171_v27 = vld [vmem:[#allocation5 + $0x38] sm:$0xff]   ;;  %v9714_v31 = vld [vmem:[%s9682_s29 + $0x20] sm:$0xff]   ;;  %v909_v33 = vrot.slane %v907_v26, 1  ;;  %v919_v41 = vshrl.u32 %v9706_v22, 16  ;;  %v1491_v42 = vrot.slane %v9693_v12, 1  ;;  %vm10891_vm7 = vmand %vm3992_vm5, %vm3993_vm6 }
  0x61   : > { %8277 = vmatprep.subr.bf16.mxu1 %v9161_v5  ;;  %v901_v21 = vrot.slane %v899_v16, 1  ;;  %v9175_v34 = vld [vmem:[#allocation5 + $0x80] sm:$0xff]   ;;  %v9717_v35 = vld [vmem:[%s9682_s29 + $0x28] sm:$0xff]   ;;  %v917_v38 = vrot.slane %v915_v30, 1  ;;  %v923_v39 = vshll.u32 %v9714_v31, 16  ;;  %v927_v44 = vshrl.u32 %v9714_v31, 16 }
  0x62   : > { %v897_v24 = vor.u32 %v896_v20, %v892_v14  ;;  %v9176_v36 = vld [vmem:[#allocation5 + $0xc0] sm:$0xff]   ;;  %v913_v37 = vor.u32 %v911_v29, %v909_v33  ;;  %v9179_v43 = vld [vmem:[#allocation5 + $0x88] sm:$0xff]   ;;  %v931_v45 = vshll.u32 %v9717_v35, 16  ;;  %v1492_v48 = vrot.slane %v9696_v13, 1  ;;  %v9183_v52 = vld [vmem:[#allocation5 + $0x90] sm:$0xff]   ;;  %s9430_s23 = scalar_lea.vmem %s11378_s5, 4864 }
  0x63   : > { %8230 = vmatpush3.bf16.msra.mxu0 %v9160_v4  ;;  %v905_v32 = vor.u32 %v903_v25, %v901_v21  ;;  %v9180_v47 = vld [vmem:[#allocation5 + $0xc8] sm:$0xff]   ;;  %v925_v49 = vrot.slane %v923_v39, 1  ;;  %v9730_v50 = vld [vmem:[%s9682_s29 + $0x30] sm:$0xff]   ;;  %v921_v51 = vor.u32 %v919_v41, %v917_v38  ;;  %v935_v60 = vshrl.u32 %v9717_v35, 16  ;;  %v9754_v0 = vld [vmem:[%s9682_s29 + $0x40] sm:$0xff]   ;;  %p9431_p4 = scmp.ne.s32.totalorder %s11378_s5, %s9430_s23  ;;  %s9508_s28 = smov [#allocation7]  }
  0x64   : > { %8278 = vmatpush3.bf16.msra.mxu1 %v9161_v5  ;;  %8231 = vmatprep.subr.bf16.mxu0 %v9162_v6  ;;  %v902_v28 = vsel %vm890_vm0, %v897_v24, %v901_v21  ;;  %v9726_v46 = vsel %vm890_vm0, %v913_v37, %v917_v38  ;;  %v9736_v53 = vsel %vm1490_vm1, %v1491_v42, %v1492_v48  ;;  %v933_v55 = vrot.slane %v931_v45, 1  ;;  %v9740_v56 = vld [vmem:[%s9682_s29 + $0x38] sm:$0xff]   ;;  %v9184_v57 = vld [vmem:[#allocation5 + $0xd0] sm:$0xff]   ;;  %v9206_v45 = vld [vmem:[#allocation5 + $0x100] sm:$0xff]   ;;  %s9434_s26 = sshll.u32 %s9508_s28, 4  ;;  %s9435_s26 = int_to_ptr.vmem [resolvable:$false] %s9434_s26 }
  0x65   : > { %8279 = vmatprep.subr.bf16.mxu1 %v9163_v7  ;;  %8241 = vmatprep.mubr.bf16.mxu0 %v902_v28  ;;  %v910_v40 = vsel %vm890_vm0, %v905_v32, %v909_v33  ;;  %v929_v54 = vor.u32 %v927_v44, %v925_v49  ;;  %v939_v58 = vshll.u32 %v9730_v50, 16  ;;  %v9745_v59 = vsel %vm890_vm0, %v921_v51, %v925_v49  ;;  %v9187_v1 = vld [vmem:[#allocation5 + $0x98] sm:$0xff]   ;;  %v9775_v20 = vld [vmem:[%s9682_s29 + $0x50] sm:$0xff]   ;;  %v9196_v21 = vld [vmem:[#allocation5 + $0xe8] sm:$0xff]   ;;  %p9432_p6 = pnand %p9431_p4, %p9625_p12  ;;  %s9436_s30 = scalar_lea.vmem %s9435_s26, 9728 }
  0x66   : > { %v943_v62 = vshrl.u32 %v9730_v50, 16  ;;  %v947_v63 = vshll.u32 %v9740_v56, 16  ;;  %v9188_v3 = vld [vmem:[#allocation5 + $0xd8] sm:$0xff]   ;;  %v937_v4 = vor.u32 %v935_v60, %v933_v55  ;;  %v951_v12 = vshrl.u32 %v9740_v56, 16  ;;  %v9200_v29 = vld [vmem:[#allocation5 + $0xf0] sm:$0xff]   ;;  %v9804_v49 = vld [vmem:[#allocation5 + $0x140] sm:$0xff]   ;;  %p9437_p10 = scmp.lt.s32.totalorder %s11378_s5, %s9435_s26  ;;  %p9438_p11 = scmp.lt.s32.totalorder %s9436_s30, %s9430_s23 }
  0x67   : > { %8232 = vmatpush3.bf16.msra.mxu0 %v9162_v6  ;;  %v9749_v61 = vsel %vm890_vm0, %v929_v54, %v933_v55  ;;  %v941_v2 = vrot.slane %v939_v58, 1  ;;  %v959_v15 = vshrl.u32 %v9754_v0, 16  ;;  %v9781_v26 = vld [vmem:[%s9682_s29 + $0x58] sm:$0xff]   ;;  %v971_v28 = vshll.u32 %v9775_v20, 16  ;;  %v9794_v37 = vld [vmem:[%s9682_s29 + $0x60] sm:$0xff]   ;;  %v9801_v44 = vld [vmem:[%s9682_s29 + $0x68] sm:$0xff]   ;;  %p9433_p8 = pneg %p9432_p6 }
  0x68   : > { %8280 = vmatpush3.bf16.msra.mxu1 %v9163_v7  ;;  %8233 = vmatprep.subr.bf16.mxu0 %v9164_v8  ;;  %v949_v6 = vrot.slane %v947_v63, 1  ;;  %v9761_v7 = vld [vmem:[%s9682_s29 + $0x48] sm:$0xff]   ;;  %v975_v33 = vshrl.u32 %v9775_v20, 16  ;;  %v991_v55 = vshrl.u32 %v9794_v37, 16  ;;  %v9817_v60 = vld [vmem:[%s9682_s29 + $0x70] sm:$0xff]   ;;  %p9439_p3 = por %p9438_p11, %p9437_p10 }
  0x69   : > { %8281 = vmatprep.subr.bf16.mxu1 %v9165_v9  ;;  %v945_v5 = vor.u32 %v943_v62, %v941_v2  ;;  %v963_v16 = vshll.u32 %v9761_v7, 16  ;;  %v967_v32 = vshrl.u32 %v9761_v7, 16  ;;  %v9204_v38 = vld [vmem:[#allocation5 + $0xb8] sm:$0xff]   ;;  %v973_v39 = vrot.slane %v971_v28, 1 }
  0x6a   : > { %p9440_p7 = pnand %p9439_p3, %p9433_p8 }
  0x6b   : > { %8234 = vmatpush3.bf16.msra.mxu0 %v9164_v8  ;;  %v9191_v8 = vld [vmem:[#allocation5 + $0xa0] sm:$0xff]   ;;  %v9769_v14 = vsel %vm890_vm0, %v945_v5, %v949_v6  ;;  %v965_v25 = vrot.slane %v963_v16, 1  ;;  %v977_v42 = vor.u32 %v975_v33, %v973_v39  ;;  %v1496_v33 = vrot.slane %v9706_v22, 1 }
  0x6c   : > { %8282 = vmatpush3.bf16.msra.mxu1 %v9165_v9  ;;  %8235 = vmatprep.subr.bf16.mxu0 %v9166_v10  ;;  %v955_v9 = vshll.u32 %v9754_v0, 16 }
  0x6d   : > { %8283 = vmatprep.subr.bf16.mxu1 %v9167_v11  ;;  %v969_v41 = vor.u32 %v967_v32, %v965_v25  ;;  %v1494_v32 = vrot.slane %v9703_v17, 1 }
  0x6f   : > { %8236 = vmatpush3.bf16.msra.mxu0 %v9166_v10  ;;  %v9192_v10 = vld [vmem:[#allocation5 + $0xe0] sm:$0xff]   ;;  %v9807_v51 = vsel %vm890_vm0, %v969_v41, %v973_v39  ;;  %v9209_v39 = vld [vmem:[#allocation5 + $0x148] sm:$0xff]   ;;  %v1500_v41 = vrot.slane %v9717_v35, 1 }
  0x70   : > { %8284 = vmatpush3.bf16.msra.mxu1 %v9167_v11  ;;  %8237 = vmatprep.subr.bf16.mxu0 %v9168_v18  ;;  %v9765_v11 = vsel %vm890_vm0, %v937_v4, %v941_v2  ;;  %v9824_v2 = vld [vmem:[%s9682_s29 + $0x78] sm:$0xff]   ;;  %v1003_v4 = vshll.u32 %v9817_v60, 16 }
  0x71   : > { %8285 = vmatprep.subr.bf16.mxu1 %v9169_v19 }
  0x73   : > { %8238 = vmatpush3.bf16.msra.mxu0 %v9168_v18  ;;  %v9195_v18 = vld [vmem:[#allocation5 + $0xa8] sm:$0xff]  }
  0x74   : > { %8286 = vmatpush3.bf16.msra.mxu1 %v9169_v19  ;;  %8239 = vmatprep.subr.bf16.mxu0 %v9170_v23  ;;  %v957_v19 = vrot.slane %v955_v9, 1  ;;  %v1007_v9 = vshrl.u32 %v9817_v60, 16 }
  0x75   : > { %8287 = vmatprep.subr.bf16.mxu1 %v9171_v27 }
  0x76   : > { %v961_v24 = vor.u32 %v959_v15, %v957_v19 }
  0x77   : > { %8240 = vmatpush3.bf16.msra.mxu0 %v9170_v23  ;;  %v953_v23 = vor.u32 %v951_v12, %v949_v6  ;;  %v9832_v6 = vld [vmem:[%s9682_s29 + $0x80] sm:$0xf]  ;;  %v1005_v12 = vrot.slane %v1003_v4, 1  ;;  %v9222_v4 = vld [vmem:[#allocation5 + $0x178] sm:$0xff]  }
  0x78   : > { %8288 = vmatpush3.bf16.msra.mxu1 %v9171_v27  ;;  %8321 = vmatprep.subr.bf16.mxu0 %v9175_v34  ;;  %v9199_v27 = vld [vmem:[#allocation5 + $0xb0] sm:$0xff]   ;;  %v9844_v16 = vcombine.low %v9832_v6, %v9832_v6 }
  0x79   : > { %8369 = vmatprep.subr.bf16.mxu1 %v9176_v36  ;;  %v9785_v30 = vsel %vm890_vm0, %v953_v23, %v957_v19  ;;  %v1015_v23 = vshrl.u32 %v9824_v2, 16 }
  0x7a   : > { %8242 = vmatmul.mubr.bf16.vlgmr.msra.gmra.mrb[0].mxu0 %v910_v40  ;;  %v9205_v40 = vld [vmem:[#allocation5 + $0xf8] sm:$0xff]  }
  0x7b   : > { %8290 = vmatmul.mubr.bf16.vlgmr.msra.gmra.mrb[0].mxu1 %v9696_v13  ;;  %8322 = vmatpush3.bf16.msra.mxu0 %v9175_v34  ;;  %v9790_v34 = vsel %vm890_vm0, %v961_v24, %v965_v25  ;;  %v1019_v24 = vshll.u32 %v9844_v16, 16 }
  0x7c   : > { %8370 = vmatpush3.bf16.msra.mxu1 %v9176_v36  ;;  %8245 = vmatprep.mubr.bf16.mxu0 %v9726_v46  ;;  %v979_v36 = vshll.u32 %v9781_v26, 16 }
  0x7d   : > { %8293 = vmatprep.mubr.bf16.mxu1 %v9703_v17  ;;  %8323 = vmatprep.subr.bf16.mxu0 %v9179_v43  ;;  %v1021_v28 = vrot.slane %v1019_v24, 1  ;;  %v766_v24 = vld [vmem:[%s9682_s29 + $0x84] sm:$0xf] }
  0x7e   : > { %8371 = vmatprep.subr.bf16.mxu1 %v9180_v47 }
  0x7f   : > { %8324 = vmatpush3.bf16.msra.mxu0 %v9179_v43  ;;  %v981_v43 = vrot.slane %v979_v36, 1  ;;  %v1495_v36 = vsel %vm1490_vm1, %v1492_v48, %v1494_v32  ;;  %v9213_v48 = vld [vmem:[#allocation5 + $0x158] sm:$0xff]  }
  0x80   : > { %8372 = vmatpush3.bf16.msra.mxu1 %v9180_v47  ;;  %8325 = vmatprep.subr.bf16.mxu0 %v9183_v52  ;;  %v987_v47 = vshll.u32 %v9794_v37, 16 }
  0x81   : > { %8373 = vmatprep.subr.bf16.mxu1 %v9184_v57  ;;  %v9811_v54 = vsel %vm890_vm0, %v977_v42, %v981_v43  ;;  %v9210_v42 = vld [vmem:[#allocation5 + $0x110] sm:$0xff]  }
  0x82   : > { %8246 = vmatmul.mubr.bf16.gmra.mrb[4].mxu0 %v9745_v59  ;;  %v989_v58 = vrot.slane %v987_v47, 1  ;;  %v9214_v47 = vld [vmem:[#allocation5 + $0x120] sm:$0xff]  }
  0x83   : > { %8294 = vmatmul.mubr.bf16.gmra.mrb[4].mxu1 %v9706_v22  ;;  %8249 = vmatprep.mubr.bf16.mxu0 %v9749_v61 }
  0x84   : > { %8297 = vmatprep.mubr.bf16.mxu1 %v9714_v31  ;;  %8326 = vmatpush3.bf16.msra.mxu0 %v9183_v52  ;;  %v983_v52 = vshrl.u32 %v9781_v26, 16  ;;  %v993_v63 = vor.u32 %v991_v55, %v989_v58  ;;  %v9216_v55 = vld [vmem:[#allocation5 + $0x128] sm:$0xff]  }
  0x85   : > { %8374 = vmatpush3.bf16.msra.mxu1 %v9184_v57  ;;  %8327 = vmatprep.subr.bf16.mxu0 %v9187_v1  ;;  %v995_v57 = vshll.u32 %v9801_v44, 16 }
  0x86   : > { %8375 = vmatprep.subr.bf16.mxu1 %v9188_v3  ;;  %v985_v62 = vor.u32 %v983_v52, %v981_v43  ;;  %v9211_v43 = vld [vmem:[#allocation5 + $0x150] sm:$0xff]  }
  0x88   : > { %8328 = vmatpush3.bf16.msra.mxu0 %v9187_v1  ;;  %v997_v1 = vrot.slane %v995_v57, 1  ;;  %v9829_v5 = vsel %vm890_vm0, %v985_v62, %v989_v58  ;;  %v9217_v57 = vld [vmem:[#allocation5 + $0x168] sm:$0xff]   ;;  %v1508_v58 = vrot.slane %v9761_v7, 1  ;;  %v9218_v62 = vld [vmem:[#allocation5 + $0x130] sm:$0xff]  }
  0x89   : > { %8376 = vmatpush3.bf16.msra.mxu1 %v9188_v3  ;;  %8329 = vmatprep.subr.bf16.mxu0 %v9191_v8  ;;  %v999_v3 = vshrl.u32 %v9801_v44, 16 }
  0x8a   : > { %8250 = vmatmul.mubr.bf16.gmra.mrb[8].mxu0 %v9765_v11  ;;  %8377 = vmatprep.subr.bf16.mxu1 %v9192_v10 }
  0x8b   : > { %8298 = vmatmul.mubr.bf16.gmra.mrb[8].mxu1 %v9717_v35  ;;  %8253 = vmatprep.mubr.bf16.mxu0 %v9769_v14  ;;  %v1001_v15 = vor.u32 %v999_v3, %v997_v1  ;;  %v9221_v3 = vld [vmem:[#allocation5 + $0x138] sm:$0xff]  }
  0x8c   : > { %8301 = vmatprep.mubr.bf16.mxu1 %v9730_v50  ;;  %8330 = vmatpush3.bf16.msra.mxu0 %v9191_v8  ;;  %v9835_v8 = vsel %vm890_vm0, %v993_v63, %v997_v1  ;;  %v9219_v63 = vld [vmem:[#allocation5 + $0x170] sm:$0xff]  }
  0x8d   : > { %8378 = vmatpush3.bf16.msra.mxu1 %v9192_v10  ;;  %8331 = vmatprep.subr.bf16.mxu0 %v9195_v18  ;;  %v1011_v10 = vshll.u32 %v9824_v2, 16 }
  0x8e   : > { %8379 = vmatprep.subr.bf16.mxu1 %v9196_v21 }
  0x8f   : > { %v1013_v19 = vrot.slane %v1011_v10, 1  ;;  %v9223_v10 = vld [vmem:[#allocation5 + $0x180] sm:$0xff]  }
  0x90   : > { %8332 = vmatpush3.bf16.msra.mxu0 %v9195_v18  ;;  %v1009_v18 = vor.u32 %v1007_v9, %v1005_v12  ;;  %v1512_v9 = vrot.slane %v9781_v26, 1 }
  0x91   : > { %8380 = vmatpush3.bf16.msra.mxu1 %v9196_v21  ;;  %8333 = vmatprep.subr.bf16.mxu0 %v9199_v27  ;;  %v9848_v21 = vsel %vm890_vm0, %v1001_v15, %v1005_v12  ;;  %v9224_v12 = vld [vmem:[#allocation5 + $0x1c0] sm:$0xff]  }
  0x92   : > { %8254 = vmatmul.mubr.bf16.gmra.mrb[12].mxu0 %v9785_v30  ;;  %8381 = vmatprep.subr.bf16.mxu1 %v9200_v29  ;;  %v9853_v25 = vsel %vm890_vm0, %v1009_v18, %v1013_v19  ;;  %v1516_v18 = vrot.slane %v9801_v44, 1 }
  0x93   : > { %8302 = vmatmul.mubr.bf16.gmra.mrb[12].mxu1 %v9740_v56  ;;  %8257 = vmatprep.mubr.bf16.mxu0 %v9790_v34 }
  0x94   : > { %8305 = vmatprep.mubr.bf16.mxu1 %v9754_v0  ;;  %8334 = vmatpush3.bf16.msra.mxu0 %v9199_v27  ;;  %v9858_v27 = vor.u32 %v1015_v23, %v1013_v19 }
  0x95   : > { %8382 = vmatpush3.bf16.msra.mxu1 %v9200_v29  ;;  %8335 = vmatprep.subr.bf16.mxu0 %v9204_v38 }
  0x96   : > { %8383 = vmatprep.subr.bf16.mxu1 %v9205_v40  ;;  %v1022_v29 = vsel %vm890_vm0, %v9858_v27, %v1021_v28  ;;  %v9940_v28 = vrot.slane %v9824_v2, 1 }
  0x98   : > { %8336 = vmatpush3.bf16.msra.mxu0 %v9204_v38  ;;  %v9208_v38 = vld [vmem:[#allocation5 + $0x108] sm:$0xff]  }
  0x99   : > { %8384 = vmatpush3.bf16.msra.mxu1 %v9205_v40  ;;  %8417 = vmatprep.subr.bf16.mxu0 %v9206_v45  ;;  %v9872_v40 = vsel %vm1490_vm1, %v1494_v32, %v1496_v33 }
  0x9a   : > { %8258 = vmatmul.mubr.bf16.gmra.mrb[16].mxu0 %v9807_v51  ;;  %8465 = vmatprep.subr.bf16.mxu1 %v9804_v49 }
  0x9b   : > { %8306 = vmatmul.mubr.bf16.gmra.mrb[16].mxu1 %v9761_v7  ;;  %8261 = vmatprep.mubr.bf16.mxu0 %v9811_v54 }
  0x9c   : > { %8309 = vmatprep.mubr.bf16.mxu1 %v9775_v20 }
  0xa2   : > { %8262 = vmatmul.mubr.bf16.gmra.mrb[20].mxu0 %v9829_v5 }
  0xa3   : > { %8310 = vmatmul.mubr.bf16.gmra.mrb[20].mxu1 %v9781_v26  ;;  %8265 = vmatprep.mubr.bf16.mxu0 %v9835_v8 }
  0xa4   : > { %8313 = vmatprep.mubr.bf16.mxu1 %v9794_v37 }
  0xaa   : > { %8266 = vmatmul.mubr.bf16.gmra.mrb[24].mxu0 %v9848_v21 }
  0xab   : > { %8314 = vmatmul.mubr.bf16.gmra.mrb[24].mxu1 %v9801_v44  ;;  %8269 = vmatprep.mubr.bf16.mxu0 %v9853_v25 }
  0xac   : > { %8317 = vmatprep.mubr.bf16.mxu1 %v9817_v60 }
  0xb2   : > { %8270 = vmatmul.mubr.bf16.gmra.mrb[28].mxu0 %v1022_v29  ;;  %v9947_v29 = vcombine.low %v9832_v6, %v766_v24 }
  0xb3   : > { %8318 = vmatmul.mubr.bf16.gmra.mrb[28].mxu1 %v9824_v2  ;;  %8337 = vmatprep.mubr.bf16.mxu0 %v9736_v53  ;;  %v1498_v53 = vrot.slane %v9714_v31, 1 }
  0xb4   : > { %8385 = vmatprep.mubr.bf16.mxu1 %v9703_v17  ;;  %v9212_v17 = vld [vmem:[#allocation5 + $0x118] sm:$0xff]  }
  0xb5   : > { %v9881_v13 = vsel %vm1490_vm1, %v1496_v33, %v1498_v53  ;;  %v9225_v33 = vld [vmem:[#allocation5 + $0x188] sm:$0xff]  }
  0xba   : > { %8338 = vmatmul.mubr.bf16.vlgmr.msra.gmra.mrb[32].mxu0 %v1495_v36  ;;  %v9228_v36 = vld [vmem:[#allocation5 + $0x1d0] sm:$0xff]  }
  0xbb   : > { %8386 = vmatmul.mubr.bf16.vlgmr.msra.gmra.mrb[32].mxu1 %v9706_v22  ;;  %8418 = vmatpush3.bf16.msra.mxu0 %v9206_v45  ;;  %v9884_v22 = vsel %vm1490_vm1, %v1498_v53, %v1500_v41  ;;  %v1504_v45 = vrot.slane %v9740_v56, 1  ;;  %v9234_v53 = vld [vmem:[#allocation5 + $0x1e8] sm:$0xff]  }
  0xbc   : > { %8466 = vmatpush3.bf16.msra.mxu1 %v9804_v49  ;;  %8341 = vmatprep.mubr.bf16.mxu0 %v9872_v40  ;;  %v9215_v49 = vld [vmem:[#allocation5 + $0x160] sm:$0xff]  }
  0xbd   : > { %8389 = vmatprep.mubr.bf16.mxu1 %v9714_v31  ;;  %8419 = vmatprep.subr.bf16.mxu0 %v9208_v38  ;;  %v1502_v31 = vrot.slane %v9730_v50, 1 }
  0xbe   : > { %8467 = vmatprep.subr.bf16.mxu1 %v9209_v39 }
  0xbf   : > { %8420 = vmatpush3.bf16.msra.mxu0 %v9208_v38  ;;  %v9893_v52 = vsel %vm1490_vm1, %v1500_v41, %v1502_v31  ;;  %v9231_v38 = vld [vmem:[#allocation5 + $0x1a0] sm:$0xff]   ;;  %v9235_v41 = vld [vmem:[#allocation5 + $0x1b0] sm:$0xff]  }
  0xc0   : > { %8468 = vmatpush3.bf16.msra.mxu1 %v9209_v39  ;;  %8421 = vmatprep.subr.bf16.mxu0 %v9210_v42  ;;  %v9232_v39 = vld [vmem:[#allocation5 + $0x1e0] sm:$0xff]  }
  0xc1   : > { %8469 = vmatprep.subr.bf16.mxu1 %v9211_v43 }
  0xc2   : > { %8342 = vmatmul.mubr.bf16.gmra.mrb[36].mxu0 %v9881_v13 }
  0xc3   : > { %8390 = vmatmul.mubr.bf16.gmra.mrb[36].mxu1 %v9717_v35  ;;  %8345 = vmatprep.mubr.bf16.mxu0 %v9884_v22  ;;  %v9896_v35 = vsel %vm1490_vm1, %v1502_v31, %v1504_v45  ;;  %v2070_v31 = vshll.u32 %v9947_v29, 16 }
  0xc4   : > { %8393 = vmatprep.mubr.bf16.mxu1 %v9730_v50  ;;  %8422 = vmatpush3.bf16.msra.mxu0 %v9210_v42  ;;  %v1506_v50 = vrot.slane %v9754_v0, 1  ;;  %v9236_v42 = vld [vmem:[#allocation5 + $0x1f0] sm:$0xff]  }
  0xc5   : > { %8470 = vmatpush3.bf16.msra.mxu1 %v9211_v43  ;;  %8423 = vmatprep.subr.bf16.mxu0 %v9212_v17  ;;  %v9239_v43 = vld [vmem:[#allocation5 + $0x1b8] sm:$0xff]  }
  0xc6   : > { %8471 = vmatprep.subr.bf16.mxu1 %v9213_v48  ;;  %v9905_v1 = vsel %vm1490_vm1, %v1504_v45, %v1506_v50  ;;  %v2074_v45 = vshrl.u32 %v9947_v29, 16 }
  0xc8   : > { %8424 = vmatpush3.bf16.msra.mxu0 %v9212_v17  ;;  %v9241_v17 = vld [vmem:[#allocation5 + $0x200] sm:$0xff]  }
  0xc9   : > { %8472 = vmatpush3.bf16.msra.mxu1 %v9213_v48  ;;  %8425 = vmatprep.subr.bf16.mxu0 %v9214_v47  ;;  %v9242_v48 = vld [vmem:[#allocation5 + $0x40] sm:$0xff]  }
  0xca   : > { %8346 = vmatmul.mubr.bf16.gmra.mrb[40].mxu0 %v9893_v52  ;;  %8473 = vmatprep.subr.bf16.mxu1 %v9215_v49 }
  0xcb   : > { %8394 = vmatmul.mubr.bf16.gmra.mrb[40].mxu1 %v9740_v56  ;;  %8349 = vmatprep.mubr.bf16.mxu0 %v9896_v35  ;;  %v9908_v56 = vsel %vm1490_vm1, %v1506_v50, %v1508_v58  ;;  %v2351_v50 = vrot.slane %v9947_v29, 1 }
  0xcc   : > { %8397 = vmatprep.mubr.bf16.mxu1 %v9754_v0  ;;  %8426 = vmatpush3.bf16.msra.mxu0 %v9214_v47  ;;  %v1510_v0 = vrot.slane %v9775_v20, 1 }
  0xcd   : > { %8474 = vmatpush3.bf16.msra.mxu1 %v9215_v49  ;;  %8427 = vmatprep.subr.bf16.mxu0 %v9216_v55  ;;  %v9990_v49 = vld [vmem:[%s9682_s29 + $0x90] sm:$0xf] }
  0xce   : > { %8475 = vmatprep.subr.bf16.mxu1 %v9217_v57  ;;  %v9917_v15 = vsel %vm1490_vm1, %v1508_v58, %v1510_v0 }
  0xd0   : > { %8428 = vmatpush3.bf16.msra.mxu0 %v9216_v55  ;;  %v2072_v55 = vrot.slane %v2070_v31, 1 }
  0xd1   : > { %8476 = vmatpush3.bf16.msra.mxu1 %v9217_v57  ;;  %8429 = vmatprep.subr.bf16.mxu0 %v9218_v62  ;;  %v7432_v57 = vcombine.low %v9990_v49, %v9990_v49 }
  0xd2   : > { %8350 = vmatmul.mubr.bf16.gmra.mrb[44].mxu0 %v9905_v1  ;;  %8477 = vmatprep.subr.bf16.mxu1 %v9219_v63  ;;  %v2076_v58 = vor.u32 %v2074_v45, %v2072_v55 }
  0xd3   : > { %8398 = vmatmul.mubr.bf16.gmra.mrb[44].mxu1 %v9761_v7  ;;  %8353 = vmatprep.mubr.bf16.mxu0 %v9908_v56  ;;  %v9920_v7 = vsel %vm1490_vm1, %v1510_v0, %v1512_v9  ;;  %v2086_v0 = vshll.u32 %v7432_v57, 16 }
  0xd4   : > { %8401 = vmatprep.mubr.bf16.mxu1 %v9775_v20  ;;  %8430 = vmatpush3.bf16.msra.mxu0 %v9218_v62  ;;  %v1514_v20 = vrot.slane %v9794_v37, 1 }
  0xd5   : > { %8478 = vmatpush3.bf16.msra.mxu1 %v9219_v63  ;;  %8431 = vmatprep.subr.bf16.mxu0 %v9221_v3 }
  0xd6   : > { %8479 = vmatprep.subr.bf16.mxu1 %v9222_v4  ;;  %v9929_v19 = vsel %vm1490_vm1, %v1512_v9, %v1514_v20  ;;  %v9932_v23 = vsel %vm1490_vm1, %v1514_v20, %v1516_v18  ;;  %v10009_v9 = vsel %vm1490_vm1, %v9940_v28, %v2351_v50  ;;  %v2088_v20 = vrot.slane %v2086_v0, 1 }
  0xd8   : > { %8432 = vmatpush3.bf16.msra.mxu0 %v9221_v3  ;;  %v10004_v3 = vsel %vm890_vm0, %v9858_v27, %v2072_v55  ;;  %v9353_v55 = vld [vmem:[%s9682_s29 + $0x58] sm:$0xff]  }
  0xd9   : > { %8480 = vmatpush3.bf16.msra.mxu1 %v9222_v4  ;;  %8513 = vmatprep.subr.bf16.mxu0 %v9223_v10 }
  0xda   : > { %8354 = vmatmul.mubr.bf16.gmra.mrb[48].mxu0 %v9917_v15  ;;  %8561 = vmatprep.subr.bf16.mxu1 %v9224_v12 }
  0xdb   : > { %8402 = vmatmul.mubr.bf16.gmra.mrb[48].mxu1 %v9781_v26  ;;  %8357 = vmatprep.mubr.bf16.mxu0 %v9920_v7  ;;  %v1518_v26 = vrot.slane %v9817_v60, 1 }
  0xdc   : > { %8405 = vmatprep.mubr.bf16.mxu1 %v9794_v37 }
  0xdd   : > { %v9944_v37 = vsel %vm1490_vm1, %v1516_v18, %v1518_v26  ;;  %v9951_v32 = vsel %vm1490_vm1, %v1518_v26, %v9940_v28  ;;  %v2355_v18 = vrot.slane %v7432_v57, 1  ;;  %v9258_v57 = vld [vmem:[#allocation5 + $0x78] sm:$0xff]  }
  0xe2   : > { %8358 = vmatmul.mubr.bf16.gmra.mrb[52].mxu0 %v9929_v19 }
  0xe3   : > { %8406 = vmatmul.mubr.bf16.gmra.mrb[52].mxu1 %v9801_v44  ;;  %8361 = vmatprep.mubr.bf16.mxu0 %v9932_v23  ;;  %v1522_v44 = vrot.slane %v9844_v16, 1  ;;  %v9227_v16 = vld [vmem:[#allocation5 + $0x190] sm:$0xff]  }
  0xe4   : > { %8409 = vmatprep.mubr.bf16.mxu1 %v9817_v60  ;;  %v9959_v60 = vld [vmem:[%s9682_s29 + $0x88] sm:$0xff]  }
  0xe5   : > { %v1523_v6 = vsel %vm1490_vm1, %v9940_v28, %v1522_v44  ;;  %v2078_v47 = vshll.u32 %v9959_v60, 16  ;;  %v10000_v63 = vrot.slane %v9959_v60, 1  ;;  %v2082_v4 = vshrl.u32 %v9959_v60, 16  ;;  %v9346_v28 = vld [vmem:[%s9682_s29 + $0x20] sm:$0xff]   ;;  %v9243_v44 = vld [vmem:[#allocation5 + $0x208] sm:$0xff]  }
  0xe7   : > { %v2080_v62 = vrot.slane %v2078_v47, 1  ;;  %v2356_v26 = vsel %vm1490_vm1, %v10000_v63, %v2355_v18  ;;  %v10052_v18 = vld [vmem:[#allocation5 + $0x80] sm:$0xff]  }
  0xe9   : > { %v10021_v27 = vor.u32 %v2082_v4, %v2080_v62  ;;  %v10050_v4 = vld [vmem:[#allocation5] sm:$0xff]  }
  0xea   : > { %8362 = vmatmul.mubr.bf16.gmra.mrb[56].mxu0 %v9944_v37 }
  0xeb   : > { %8410 = vmatmul.mubr.bf16.gmra.mrb[56].mxu1 %v9824_v2  ;;  %8365 = vmatprep.mubr.bf16.mxu0 %v9951_v32  ;;  %v9226_v2 = vld [vmem:[#allocation5 + $0x1c8] sm:$0xff]   ;;  %v2089_v24 = vsel %vm890_vm0, %v10021_v27, %v2088_v20 }
  0xec   : > { %8413 = vmatprep.mubr.bf16.mxu1 %v9947_v29 }
  0xf2   : > { %8366 = vmatmul.mubr.bf16.gmra.mrb[60].mxu0 %v1523_v6  ;;  %v9347_v6 = vld [vmem:[%s9682_s29 + $0x28] sm:$0xff]  }
  0xf3   : > { %8414 = vmatmul.mubr.bf16.gmra.mrb[60].mxu1 %v9959_v60  ;;  %8433 = vmatprep.mubr.bf16.mxu0 %v9726_v46  ;;  %v9229_v46 = vld [vmem:[#allocation5 + $0x198] sm:$0xff]  }
  0xf4   : > { %8481 = vmatprep.mubr.bf16.mxu1 %v9872_v40  ;;  %v9233_v40 = vld [vmem:[#allocation5 + $0x1a8] sm:$0xff]  }
  0xfa   : > { %8434 = vmatmul.mubr.bf16.vlgmr.msra.gmra.mrb[64].mxu0 %v9745_v59  ;;  %v9230_v59 = vld [vmem:[#allocation5 + $0x1d8] sm:$0xff]  }
  0xfb   : > { %8482 = vmatmul.mubr.bf16.vlgmr.msra.gmra.mrb[64].mxu1 %v9881_v13  ;;  %8514 = vmatpush3.bf16.msra.mxu0 %v9223_v10  ;;  %v9240_v13 = vld [vmem:[#allocation5 + $0x1f8] sm:$0xff]   ;;  %v10012_v10 = vsel %vm890_vm0, %v2076_v58, %v2080_v62  ;;  %v9354_v58 = vld [vmem:[%s9682_s29 + $0x60] sm:$0xff]  }
  0xfc   : > { %8562 = vmatpush3.bf16.msra.mxu1 %v9224_v12  ;;  %8437 = vmatprep.mubr.bf16.mxu0 %v9749_v61  ;;  %v10016_v12 = vsel %vm1490_vm1, %v2351_v50, %v10000_v63 }
  0xfd   : > { %8485 = vmatprep.mubr.bf16.mxu1 %v9884_v22  ;;  %8515 = vmatprep.subr.bf16.mxu0 %v9225_v33 }
  0xfe   : > { %8563 = vmatprep.subr.bf16.mxu1 %v9226_v2 }
  0xff   : > { %8516 = vmatpush3.bf16.msra.mxu0 %v9225_v33  ;;  %v9244_v33 = vld [vmem:[#allocation5 + $0x48] sm:$0xff]  }
 0x100   : > { %8564 = vmatpush3.bf16.msra.mxu1 %v9226_v2  ;;  %8517 = vmatprep.subr.bf16.mxu0 %v9227_v16  ;;  %v9348_v2 = vld [vmem:[%s9682_s29 + $0x30] sm:$0xff]  }
 0x101   : > { %8565 = vmatprep.subr.bf16.mxu1 %v9228_v36 }
 0x102   : > { %8438 = vmatmul.mubr.bf16.gmra.mrb[68].mxu0 %v9765_v11 }
 0x103   : > { %8486 = vmatmul.mubr.bf16.gmra.mrb[68].mxu1 %v9893_v52  ;;  %8441 = vmatprep.mubr.bf16.mxu0 %v9769_v14 }
 0x104   : > { %8489 = vmatprep.mubr.bf16.mxu1 %v9896_v35  ;;  %8518 = vmatpush3.bf16.msra.mxu0 %v9227_v16  ;;  %v9245_v16 = vld [vmem:[#allocation5 + $0x210] sm:$0xff]  }
 0x105   : > { %8566 = vmatpush3.bf16.msra.mxu1 %v9228_v36  ;;  %8519 = vmatprep.subr.bf16.mxu0 %v9229_v46  ;;  %v9246_v36 = vld [vmem:[#allocation5 + $0x50] sm:$0xff]  }
 0x106   : > { %8567 = vmatprep.subr.bf16.mxu1 %v9230_v59 }
 0x108   : > { %8520 = vmatpush3.bf16.msra.mxu0 %v9229_v46  ;;  %v9349_v46 = vld [vmem:[%s9682_s29 + $0x38] sm:$0xff]  }
 0x109   : > { %8568 = vmatpush3.bf16.msra.mxu1 %v9230_v59  ;;  %8521 = vmatprep.subr.bf16.mxu0 %v9231_v38  ;;  %v9350_v59 = vld [vmem:[%s9682_s29 + $0x40] sm:$0xff]  }
 0x10a   : > { %8442 = vmatmul.mubr.bf16.gmra.mrb[72].mxu0 %v9785_v30  ;;  %8569 = vmatprep.subr.bf16.mxu1 %v9232_v39 }
 0x10b   : > { %8490 = vmatmul.mubr.bf16.gmra.mrb[72].mxu1 %v9905_v1  ;;  %8445 = vmatprep.mubr.bf16.mxu0 %v9790_v34 }
 0x10c   : > { %8493 = vmatprep.mubr.bf16.mxu1 %v9908_v56  ;;  %8522 = vmatpush3.bf16.msra.mxu0 %v9231_v38  ;;  %v9250_v38 = vld [vmem:[#allocation5 + $0x60] sm:$0xff]  }
 0x10d   : > { %8570 = vmatpush3.bf16.msra.mxu1 %v9232_v39  ;;  %8523 = vmatprep.subr.bf16.mxu0 %v9233_v40  ;;  %v9251_v39 = vld [vmem:[#allocation5 + $0x228] sm:$0xff]  }
 0x10e   : > { %8571 = vmatprep.subr.bf16.mxu1 %v9234_v53 }
 0x110   : > { %8524 = vmatpush3.bf16.msra.mxu0 %v9233_v40  ;;  %v9351_v40 = vld [vmem:[%s9682_s29 + $0x48] sm:$0xff]  }
 0x111   : > { %8572 = vmatpush3.bf16.msra.mxu1 %v9234_v53  ;;  %8525 = vmatprep.subr.bf16.mxu0 %v9235_v41  ;;  %v9252_v53 = vld [vmem:[#allocation5 + $0x68] sm:$0xff]  }
 0x112   : > { %8446 = vmatmul.mubr.bf16.gmra.mrb[76].mxu0 %v9807_v51  ;;  %8573 = vmatprep.subr.bf16.mxu1 %v9236_v42 }
 0x113   : > { %8494 = vmatmul.mubr.bf16.gmra.mrb[76].mxu1 %v9917_v15  ;;  %8449 = vmatprep.mubr.bf16.mxu0 %v9811_v54 }
 0x114   : > { %8497 = vmatprep.mubr.bf16.mxu1 %v9920_v7  ;;  %8526 = vmatpush3.bf16.msra.mxu0 %v9235_v41  ;;  %v9253_v41 = vld [vmem:[#allocation5 + $0x230] sm:$0xff]  }
 0x115   : > { %8574 = vmatpush3.bf16.msra.mxu1 %v9236_v42  ;;  %8527 = vmatprep.subr.bf16.mxu0 %v9239_v43 }
 0x116   : > { %8575 = vmatprep.subr.bf16.mxu1 %v9240_v13 }
 0x118   : > { %8528 = vmatpush3.bf16.msra.mxu0 %v9239_v43 }
 0x119   : > { %8576 = vmatpush3.bf16.msra.mxu1 %v9240_v13  ;;  %8609 = vmatprep.subr.bf16.mxu0 %v9241_v17  ;;  %v9254_v13 = vld [vmem:[#allocation5 + $0x70] sm:$0xff]  }
 0x11a   : > { %8450 = vmatmul.mubr.bf16.gmra.mrb[80].mxu0 %v9829_v5  ;;  %8657 = vmatprep.subr.bf16.mxu1 %v9242_v48 }
 0x11b   : > { %8498 = vmatmul.mubr.bf16.gmra.mrb[80].mxu1 %v9929_v19  ;;  %8453 = vmatprep.mubr.bf16.mxu0 %v9835_v8 }
 0x11c   : > { %8501 = vmatprep.mubr.bf16.mxu1 %v9932_v23 }
 0x122   : > { %8454 = vmatmul.mubr.bf16.gmra.mrb[84].mxu0 %v9848_v21 }
 0x123   : > { %8502 = vmatmul.mubr.bf16.gmra.mrb[84].mxu1 %v9944_v37  ;;  %8457 = vmatprep.mubr.bf16.mxu0 %v9853_v25 }
 0x124   : > { %8505 = vmatprep.mubr.bf16.mxu1 %v9951_v32 }
 0x12a   : > { %8458 = vmatmul.mubr.bf16.gmra.mrb[88].mxu0 %v10004_v3 }
 0x12b   : > { %8506 = vmatmul.mubr.bf16.gmra.mrb[88].mxu1 %v10009_v9  ;;  %8461 = vmatprep.mubr.bf16.mxu0 %v10012_v10 }
 0x12c   : > { %8509 = vmatprep.mubr.bf16.mxu1 %v10016_v12 }
 0x132   : > { %8462 = vmatmul.mubr.bf16.gmra.mrb[92].mxu0 %v2089_v24 }
 0x133   : > { %8510 = vmatmul.mubr.bf16.gmra.mrb[92].mxu1 %v2356_v26  ;;  %8529 = vmatprep.mubr.bf16.mxu0 %v9346_v28 }
 0x134   : > { %8577 = vmatprep.mubr.bf16.mxu1 %v9749_v61  ;;  %v9247_v61 = vld [vmem:[#allocation5 + $0x218] sm:$0xff]  }
 0x13a   : > { %8530 = vmatmul.mubr.bf16.vlgmr.msra.gmra.mrb[96].mxu0 %v9347_v6 }
 0x13b   : > { %8578 = vmatmul.mubr.bf16.vlgmr.msra.gmra.mrb[96].mxu1 %v9765_v11  ;;  %8610 = vmatpush3.bf16.msra.mxu0 %v9241_v17  ;;  %v9248_v11 = vld [vmem:[#allocation5 + $0x58] sm:$0xff]  }
 0x13c   : > { %8658 = vmatpush3.bf16.msra.mxu1 %v9242_v48  ;;  %8533 = vmatprep.mubr.bf16.mxu0 %v9348_v2 }
 0x13d   : > { %8581 = vmatprep.mubr.bf16.mxu1 %v9769_v14  ;;  %8611 = vmatprep.subr.bf16.mxu0 %v9243_v44  ;;  %v9249_v14 = vld [vmem:[#allocation5 + $0x220] sm:$0xff]  }
 0x13e   : > { %8659 = vmatprep.subr.bf16.mxu1 %v9244_v33 }
 0x13f   : > { %8612 = vmatpush3.bf16.msra.mxu0 %v9243_v44 }
 0x140   : > { %8660 = vmatpush3.bf16.msra.mxu1 %v9244_v33  ;;  %8613 = vmatprep.subr.bf16.mxu0 %v9245_v16  ;;  %v9355_v33 = vld [vmem:[%s9682_s29 + $0x68] sm:$0xff]  }
 0x141   : > { %8661 = vmatprep.subr.bf16.mxu1 %v9246_v36 }
 0x142   : > { %8534 = vmatmul.mubr.bf16.gmra.mrb[100].mxu0 %v9349_v46  ;;  %v10069_v46 = vld [vmem:[%s9682_s29 + $0x98] sm:$0xff]  }
 0x143   : > { %8582 = vmatmul.mubr.bf16.gmra.mrb[100].mxu1 %v9785_v30  ;;  %8537 = vmatprep.mubr.bf16.mxu0 %v9350_v59  ;;  %v9352_v30 = vld [vmem:[%s9682_s29 + $0x50] sm:$0xff]  }
 0x144   : > { %8585 = vmatprep.mubr.bf16.mxu1 %v9790_v34  ;;  %8614 = vmatpush3.bf16.msra.mxu0 %v9245_v16 }
 0x145   : > { %8662 = vmatpush3.bf16.msra.mxu1 %v9246_v36  ;;  %8615 = vmatprep.subr.bf16.mxu0 %v9247_v61  ;;  %v9356_v36 = vld [vmem:[%s9682_s29 + $0x70] sm:$0xff]  }
 0x146   : > { %8663 = vmatprep.subr.bf16.mxu1 %v9248_v11 }
 0x148   : > { %8616 = vmatpush3.bf16.msra.mxu0 %v9247_v61 }
 0x149   : > { %8664 = vmatpush3.bf16.msra.mxu1 %v9248_v11  ;;  %8617 = vmatprep.subr.bf16.mxu0 %v9249_v14 }
 0x14a   : > { %8538 = vmatmul.mubr.bf16.gmra.mrb[104].mxu0 %v9351_v40  ;;  %8665 = vmatprep.subr.bf16.mxu1 %v9250_v38 }
 0x14b   : > { %8586 = vmatmul.mubr.bf16.gmra.mrb[104].mxu1 %v9807_v51  ;;  %8541 = vmatprep.mubr.bf16.mxu0 %v9352_v30 }
 0x14c   : > { %8589 = vmatprep.mubr.bf16.mxu1 %v9811_v54  ;;  %8618 = vmatpush3.bf16.msra.mxu0 %v9249_v14  ;;  %v9257_v54 = vld [vmem:[#allocation5 + $0x238] sm:$0xff]  }
 0x14d   : > { %v8243_v34 = vpop.f32.mrb[0].mxu0  ;;  %8666 = vmatpush3.bf16.msra.mxu1 %v9250_v38  ;;  %8619 = vmatprep.subr.bf16.mxu0 %v9251_v39 }
 0x14e   : > { %v8291_v42 = vpop.f32.mrb[0].mxu1  ;;  %v1121_v43 = vpop.f32.mrb[1].mxu0  ;;  %8667 = vmatprep.subr.bf16.mxu1 %v9252_v53  ;;  %v10077_v34 = vld [vmem:[%s9682_s29 + $0x80] sm:$0xff]  }
 0x14f   : > { %v1346_v17 = vpop.f32.mrb[1].mxu1  ;;  %v8244_v48 = vpop.f32.mrb[2].mxu0 }
 0x150   : > { %v8292_v31 = vpop.f32.mrb[2].mxu1  ;;  %v1124_v45 = vpop.f32.mrb[3].mxu0  ;;  %8620 = vmatpush3.bf16.msra.mxu0 %v9251_v39  ;;  %v10042_v51 = vadd.f32 %v1346_v17, %v1121_v43 }
 0x151   : > { %v1349_v47 = vpop.f32.mrb[3].mxu1  ;;  %8668 = vmatpush3.bf16.msra.mxu1 %v9252_v53  ;;  %8621 = vmatprep.subr.bf16.mxu0 %v9253_v41 }
 0x152   : > { %8542 = vmatmul.mubr.bf16.gmra.mrb[108].mxu0 %v9353_v55  ;;  %8669 = vmatprep.subr.bf16.mxu1 %v9254_v13  ;;  %v10045_v50 = vadd.f32 %v1349_v47, %v1124_v45  ;;  %v10089_v45 = vld [vmem:[%s9682_s29 + $0x88] sm:$0xff]   ;;  %v4205_v47 = vshll.u32 %v10077_v34, 16 }
 0x153   : > { %8590 = vmatmul.mubr.bf16.gmra.mrb[108].mxu1 %v9829_v5  ;;  %8545 = vmatprep.mubr.bf16.mxu0 %v9354_v58  ;;  %v770_v5 = vld [vmem:[%s9682_s29 + $0x94] sm:$0xf] }
 0x154   : > { %8593 = vmatprep.mubr.bf16.mxu1 %v9835_v8  ;;  %8622 = vmatpush3.bf16.msra.mxu0 %v9253_v41  ;;  %v10063_v16 = vcombine.low %v9990_v49, %v770_v5  ;;  %v9357_v41 = vld [vmem:[%s9682_s29 + $0x78] sm:$0xff]   ;;  %v4203_v5 = vshrl.u32 %v10077_v34, 16 }
 0x155   : > { %v8247_v62 = vpop.f32.mrb[4].mxu0  ;;  %8670 = vmatpush3.bf16.msra.mxu1 %v9254_v13  ;;  %8623 = vmatprep.subr.bf16.mxu0 %v9257_v54  ;;  %v10086_v13 = vld [vmem:[%s9682_s29 + $0xa0] ss:$0 sps:$4 sm:$0xff]  }
 0x156   : > { %v8295_v0 = vpop.f32.mrb[4].mxu1  ;;  %v1137_v20 = vpop.f32.mrb[5].mxu0  ;;  %8671 = vmatprep.subr.bf16.mxu1 %v9258_v57  ;;  %v2890_v39 = vshll.u32 %v10063_v16, 16  ;;  %v2894_v30 = vshrl.u32 %v10063_v16, 16 }
 0x157   : > { %v1362_v24 = vpop.f32.mrb[5].mxu1  ;;  %v8248_v26 = vpop.f32.mrb[6].mxu0  ;;  %v2906_v0 = vshll.u32 %v10086_v13, 16 }
 0x158   : > { %v8296_v28 = vpop.f32.mrb[6].mxu1  ;;  %v1140_v44 = vpop.f32.mrb[7].mxu0  ;;  %8624 = vmatpush3.bf16.msra.mxu0 %v9257_v54  ;;  %v10055_v8 = vadd.f32 %v1362_v24, %v1137_v20  ;;  %v2892_v43 = vrot.slane %v2890_v39, 1  ;;  %v10109_v39 = vld [vmem:[%s9682_s29 + $0x98] sm:$0xff]  }
 0x159   : > { %v1365_v6 = vpop.f32.mrb[7].mxu1  ;;  %8672 = vmatpush3.bf16.msra.mxu1 %v9258_v57  ;;  %8705 = vmatprep.subr.bf16.mxu0 %v10050_v4  ;;  %v4207_v28 = vrot.slane %v4205_v47, 1  ;;  %v4226_v47 = vshll.u32 %v10109_v39, 16 }
 0x15a   : > { %8546 = vmatmul.mubr.bf16.gmra.mrb[112].mxu0 %v9355_v33  ;;  %8753 = vmatprep.subr.bf16.mxu1 %v10052_v18  ;;  %v10060_v2 = vadd.f32 %v1365_v6, %v1140_v44  ;;  %v2896_v48 = vor.u32 %v2894_v30, %v2892_v43  ;;  %v4210_v44 = vshll.u32 %v10089_v45, 16  ;;  %v2908_v33 = vrot.slane %v2906_v0, 1 }
 0x15b   : > { %8594 = vmatmul.mubr.bf16.gmra.mrb[112].mxu1 %v9848_v21  ;;  %8549 = vmatprep.mubr.bf16.mxu0 %v9356_v36  ;;  %v10106_v36 = vld [vmem:[%s9682_s29 + $0x90] sm:$0xff]  }
 0x15c   : > { %8597 = vmatprep.mubr.bf16.mxu1 %v9853_v25  ;;  %v2898_v25 = vshll.u32 %v10069_v46, 16 }
 0x15d   : > { %v8251_v61 = vpop.f32.mrb[8].mxu0 }
 0x15e   : > { %v8299_v11 = vpop.f32.mrb[8].mxu1  ;;  %v1153_v59 = vpop.f32.mrb[9].mxu0  ;;  %v2900_v31 = vrot.slane %v2898_v25, 1  ;;  %v4214_v25 = vshrl.u32 %v10089_v45, 16 }
 0x15f   : > { %v1378_v14 = vpop.f32.mrb[9].mxu1  ;;  %v8252_v38 = vpop.f32.mrb[10].mxu0  ;;  %v4208_v11 = vor.u32 %v4207_v28, %v4203_v5 }
 0x160   : > { %v8300_v49 = vpop.f32.mrb[10].mxu1  ;;  %v1156_v40 = vpop.f32.mrb[11].mxu0  ;;  %v10072_v53 = vadd.f32 %v1378_v14, %v1153_v59  ;;  %v2901_v26 = vsel %vm890_vm0, %v2896_v48, %v2900_v31  ;;  %v4212_v59 = vrot.slane %v4210_v44, 1 }
 0x161   : > { %v1381_v21 = vpop.f32.mrb[11].mxu1 }
 0x162   : > { %8550 = vmatmul.mubr.bf16.gmra.mrb[116].mxu0 %v9357_v41  ;;  %v10080_v42 = vadd.f32 %v1381_v21, %v1156_v40  ;;  %v4218_v41 = vshll.u32 %v10106_v36, 16  ;;  %v4213_v48 = vsel %vm890_vm0, %v4208_v11, %v4212_v59 }
 0x163   : > { %8598 = vmatmul.mubr.bf16.gmra.mrb[116].mxu1 %v10004_v3  ;;  %8553 = vmatprep.mubr.bf16.mxu0 %v9947_v29  ;;  %v2893_v29 = vsel %vm890_vm0, %v10021_v27, %v2892_v43 }
 0x164   : > { %8601 = vmatprep.mubr.bf16.mxu1 %v10012_v10  ;;  %v2902_v10 = vshrl.u32 %v10069_v46, 16 }
 0x165   : > { %v8255_v17 = vpop.f32.mrb[12].mxu0 }
 0x166   : > { %v8303_v54 = vpop.f32.mrb[12].mxu1  ;;  %v1169_v55 = vpop.f32.mrb[13].mxu0  ;;  %v2904_v27 = vor.u32 %v2902_v10, %v2900_v31  ;;  %v4222_v31 = vshrl.u32 %v10106_v36, 16 }
 0x167   : > { %v1394_v57 = vpop.f32.mrb[13].mxu1  ;;  %v8256_v58 = vpop.f32.mrb[14].mxu0 }
 0x168   : > { %v8304_v62 = vpop.f32.mrb[14].mxu1  ;;  %v1172_v3 = vpop.f32.mrb[15].mxu0  ;;  %v10096_v20 = vadd.f32 %v1394_v57, %v1169_v55  ;;  %v2909_v30 = vsel %vm890_vm0, %v2904_v27, %v2908_v33  ;;  %v10124_v55 = vld [vmem:[%s9682_s29 + $0xa0] sm:$0xff]   ;;  %v4216_v57 = vor.u32 %v4214_v25, %v4212_v59  ;;  %v4220_v58 = vrot.slane %v4218_v41, 1  ;;  %v9266_v59 = vld [vmem:[#allocation5 + $0x8] sm:$0xff]  }
 0x169   : > { %v1397_v24 = vpop.f32.mrb[15].mxu1  ;;  %v4234_v28 = vshll.u32 %v10124_v55, 16  ;;  %v4230_v33 = vshrl.u32 %v10109_v39, 16  ;;  %v9270_v41 = vld [vmem:[#allocation5 + $0x10] sm:$0xff]  }
 0x16a   : > { %8554 = vmatmul.mubr.bf16.gmra.mrb[120].mxu0 %v9959_v60  ;;  %v10102_v6 = vadd.f32 %v1397_v24, %v1172_v3  ;;  %v10127_v3 = vld [vmem:[%s9682_s29 + $0xa8] sm:$0xff]   ;;  %v4224_v0 = vor.u32 %v4222_v31, %v4220_v58  ;;  %v4228_v24 = vrot.slane %v4226_v47, 1  ;;  %v9271_v31 = vld [vmem:[#allocation5 + $0x90] sm:$0xff]   ;;  %v10150_v47 = vld [vmem:[%s9682_s29 + $0xb8] sm:$0xff]  }
 0x16b   : > { %8602 = vmatmul.mubr.bf16.gmra.mrb[120].mxu1 %v2893_v29  ;;  %8557 = vmatprep.mubr.bf16.mxu0 %v10063_v16 }
 0x16c   : > { %8605 = vmatprep.mubr.bf16.mxu1 %v2901_v26  ;;  %v4232_v25 = vor.u32 %v4230_v33, %v4228_v24  ;;  %v9275_v33 = vld [vmem:[#allocation5 + $0x98] sm:$0xff]  }
 0x16d   : > { %v8259_v61 = vpop.f32.mrb[16].mxu0 }
 0x16e   : > { %v8307_v14 = vpop.f32.mrb[16].mxu1  ;;  %v1185_v38 = vpop.f32.mrb[17].mxu0 }
 0x16f   : > { %v1410_v49 = vpop.f32.mrb[17].mxu1  ;;  %v8260_v60 = vpop.f32.mrb[18].mxu0  ;;  %v4238_v14 = vshrl.u32 %v10124_v55, 16 }
 0x170   : > { %v8308_v40 = vpop.f32.mrb[18].mxu1  ;;  %v1188_v21 = vpop.f32.mrb[19].mxu0  ;;  %v10114_v43 = vadd.f32 %v1410_v49, %v1185_v38  ;;  %v4242_v38 = vshll.u32 %v10127_v3, 16  ;;  %v10138_v49 = vsel %vm890_vm0, %v4224_v0, %v4228_v24  ;;  %v9267_v60 = vld [vmem:[#allocation5 + $0x88] sm:$0xff]  }
 0x171   : > { %v1413_v17 = vpop.f32.mrb[19].mxu1 }
 0x172   : > { %8558 = vmatmul.mubr.bf16.gmra.mrb[124].mxu0 %v10069_v46  ;;  %v10120_v54 = vadd.f32 %v1413_v17, %v1188_v21  ;;  %v4236_v21 = vrot.slane %v4234_v28, 1 }
 0x173   : > { %8606 = vmatmul.mubr.bf16.gmra.mrb[124].mxu1 %v2909_v30  ;;  %8625 = vmatprep.mubr.bf16.mxu0 %v9884_v22  ;;  %v4221_v22 = vsel %vm890_vm0, %v4216_v57, %v4220_v58  ;;  %v10144_v30 = vld [vmem:[%s9682_s29 + $0xb0] sm:$0xff]  }
 0x174   : > { %8673 = vmatprep.mubr.bf16.mxu1 %v4213_v48  ;;  %v4240_v17 = vor.u32 %v4238_v14, %v4236_v21  ;;  %v4244_v48 = vrot.slane %v4242_v38, 1  ;;  %v10155_v0 = vsel %vm890_vm0, %v4232_v25, %v4236_v21  ;;  %v4254_v28 = vshrl.u32 %v10144_v30, 16  ;;  %v10174_v38 = vld [vmem:[%s9682_s29 + $0xc8] sm:$0xff]   ;;  %v9278_v25 = vld [vmem:[#allocation5 + $0x20] sm:$0xff]  }
 0x175   : > { %v8263_v62 = vpop.f32.mrb[20].mxu0 }
 0x176   : > { %v8311_v29 = vpop.f32.mrb[20].mxu1  ;;  %v1201_v10 = vpop.f32.mrb[21].mxu0 }
 0x177   : > { %v1426_v26 = vpop.f32.mrb[21].mxu1  ;;  %v8264_v5 = vpop.f32.mrb[22].mxu0 }
 0x178   : > { %v8312_v44 = vpop.f32.mrb[22].mxu1  ;;  %v1204_v27 = vpop.f32.mrb[23].mxu0  ;;  %v10132_v61 = vadd.f32 %v1426_v26, %v1201_v10  ;;  %v10160_v5 = vsel %vm890_vm0, %v4240_v17, %v4244_v48 }
 0x179   : > { %v1429_v11 = vpop.f32.mrb[23].mxu1  ;;  %11467 = vst [vmem:[#allocation11_spill] sm:$0xff] %v10160_v5  ;;  %v4258_v44 = vshll.u32 %v10150_v47, 16 }
 0x17a   : > { %8626 = vmatmul.mubr.bf16.vlgmr.msra.gmra.mrb[128].mxu0 %v9893_v52  ;;  %v10140_v40 = vadd.f32 %v1429_v11, %v1204_v27  ;;  %v9274_v27 = vld [vmem:[#allocation5 + $0x18] sm:$0xff]  }
 0x17b   : > { %8674 = vmatmul.mubr.bf16.vlgmr.msra.gmra.mrb[128].mxu1 %v4221_v22  ;;  %8706 = vmatpush3.bf16.msra.mxu0 %v10050_v4  ;;  %v10166_v22 = vld [vmem:[%s9682_s29 + $0xc0] sm:$0xff]  }
 0x17c   : > { %8754 = vmatpush3.bf16.msra.mxu1 %v10052_v18  ;;  %8629 = vmatprep.mubr.bf16.mxu0 %v9896_v35  ;;  %v4246_v35 = vshrl.u32 %v10127_v3, 16  ;;  %v4250_v18 = vshll.u32 %v10144_v30, 16 }
 0x17d   : > { %v8267_v52 = vpop.f32.mrb[24].mxu0  ;;  %8677 = vmatprep.mubr.bf16.mxu1 %v10138_v49  ;;  %8707 = vmatprep.subr.bf16.mxu0 %v9266_v59 }
 0x17e   : > { %v8315_v57 = vpop.f32.mrb[24].mxu1  ;;  %v1217_v4 = vpop.f32.mrb[25].mxu0  ;;  %8755 = vmatprep.subr.bf16.mxu1 %v9267_v60  ;;  %v4252_v14 = vrot.slane %v4250_v18, 1  ;;  %v4274_v18 = vshll.u32 %v10174_v38, 16 }
 0x17f   : > { %v1442_v58 = vpop.f32.mrb[25].mxu1  ;;  %v8268_v62 = vpop.f32.mrb[26].mxu0  ;;  %8708 = vmatpush3.bf16.msra.mxu0 %v9266_v59  ;;  %v4248_v59 = vor.u32 %v4246_v35, %v4244_v48  ;;  %v4266_v57 = vshll.u32 %v10166_v22, 16  ;;  %v4262_v35 = vshrl.u32 %v10150_v47, 16 }
 0x180   : > { %v8316_v29 = vpop.f32.mrb[26].mxu1  ;;  %v1220_v10 = vpop.f32.mrb[27].mxu0  ;;  %8756 = vmatpush3.bf16.msra.mxu1 %v9267_v60  ;;  %8709 = vmatprep.subr.bf16.mxu0 %v9270_v41  ;;  %v10157_v24 = vadd.f32 %v1442_v58, %v1217_v4  ;;  %v4256_v21 = vor.u32 %v4254_v28, %v4252_v14  ;;  %v9279_v4 = vld [vmem:[#allocation5 + $0xa0] sm:$0xff]   ;;  %v9282_v28 = vld [vmem:[#allocation5 + $0x28] sm:$0xff]  }
 0x181   : > { %v1445_v26 = vpop.f32.mrb[27].mxu1  ;;  %8757 = vmatprep.subr.bf16.mxu1 %v9271_v31  ;;  %v10178_v58 = vsel %vm890_vm0, %v4248_v59, %v4252_v14  ;;  %v10194_v14 = vld [vmem:[%s9682_s29 + $0xd0] sm:$0xff]  }
 0x182   : > { %8630 = vmatmul.mubr.bf16.gmra.mrb[132].mxu0 %v9905_v1  ;;  %v10168_v11 = vadd.f32 %v1445_v26, %v1220_v10  ;;  %v4260_v1 = vrot.slane %v4258_v44, 1  ;;  %11468 = vst [vmem:[#allocation12_spill] sm:$0xff] %v10178_v58  ;;  %v4268_v44 = vrot.slane %v4266_v57, 1 }
 0x183   : > { %8678 = vmatmul.mubr.bf16.gmra.mrb[132].mxu1 %v10155_v0  ;;  %8633 = vmatprep.mubr.bf16.mxu0 %v9908_v56 }
 0x184   : > { %8681 = vmatprep.mubr.bf16.mxu1 %v10160_v5  ;;  %8710 = vmatpush3.bf16.msra.mxu0 %v9270_v41  ;;  %v10186_v26 = vsel %vm890_vm0, %v4256_v21, %v4260_v1  ;;  %v4276_v21 = vrot.slane %v4274_v18, 1 }
 0x185   : > { %v8271_v60 = vpop.f32.mrb[28].mxu0  ;;  %8758 = vmatpush3.bf16.msra.mxu1 %v9271_v31  ;;  %8711 = vmatprep.subr.bf16.mxu0 %v9274_v27  ;;  %v4270_v31 = vshrl.u32 %v10166_v22, 16  ;;  %11469 = vst [vmem:[#allocation13_spill] sm:$0xff] %v10186_v26 }
 0x186   : > { %v8319_v52 = vpop.f32.mrb[28].mxu1  ;;  %v1233_v17 = vpop.f32.mrb[29].mxu0  ;;  %8759 = vmatprep.subr.bf16.mxu1 %v9275_v33  ;;  %v4264_v60 = vor.u32 %v4262_v35, %v4260_v1 }
 0x187   : > { %v1458_v56 = vpop.f32.mrb[29].mxu1  ;;  %v8272_v48 = vpop.f32.mrb[30].mxu0 }
 0x188   : > { %v8320_v41 = vpop.f32.mrb[30].mxu1  ;;  %v1236_v62 = vpop.f32.mrb[31].mxu0  ;;  %8712 = vmatpush3.bf16.msra.mxu0 %v9274_v27  ;;  %v10183_v29 = vadd.f32 %v1458_v56, %v1233_v17  ;;  %v9283_v27 = vld [vmem:[#allocation5 + $0xa8] sm:$0xff]   ;;  %v9286_v17 = vld [vmem:[#allocation5 + $0x30] sm:$0xff]  }
 0x189   : > { %v1461_v10 = vpop.f32.mrb[31].mxu1  ;;  %8760 = vmatpush3.bf16.msra.mxu1 %v9275_v33  ;;  %8713 = vmatprep.subr.bf16.mxu0 %v9278_v25  ;;  %v4272_v33 = vor.u32 %v4270_v31, %v4268_v44  ;;  %v9287_v48 = vld [vmem:[#allocation5 + $0xb0] sm:$0xff]   ;;  %v4278_v31 = vshrl.u32 %v10174_v38, 16 }
 0x18a   : > { %8634 = vmatmul.mubr.bf16.gmra.mrb[136].mxu0 %v9917_v15  ;;  %8761 = vmatprep.subr.bf16.mxu1 %v9279_v4  ;;  %v10189_v59 = vadd.f32 %v1461_v10, %v1236_v62  ;;  %v10198_v15 = vld [vmem:[%s9682_s29 + $0xd8] sm:$0xff]   ;;  %v4282_v10 = vshll.u32 %v10194_v14, 16 }
 0x18b   : > { %8682 = vmatmul.mubr.bf16.gmra.mrb[136].mxu1 %v10178_v58  ;;  %8637 = vmatprep.mubr.bf16.mxu0 %v9920_v7 }
 0x18c   : > { %8685 = vmatprep.mubr.bf16.mxu1 %v10186_v26  ;;  %8714 = vmatpush3.bf16.msra.mxu0 %v9278_v25  ;;  %v10203_v25 = vsel %vm890_vm0, %v4264_v60, %v4268_v44  ;;  %v9291_v44 = vld [vmem:[#allocation5 + $0x38] sm:$0xff]   ;;  %v10216_v60 = vld [vmem:[%s9682_s29 + $0xe0] sm:$0xff]  }
 0x18d   : > { %v8339_v52 = vpop.f32.mrb[32].mxu0  ;;  %8762 = vmatpush3.bf16.msra.mxu1 %v9279_v4  ;;  %8715 = vmatprep.subr.bf16.mxu0 %v9282_v28  ;;  %11470 = vst [vmem:[#allocation14_spill] sm:$0xff] %v10203_v25  ;;  %v10206_v4 = vsel %vm890_vm0, %v4272_v33, %v4276_v21  ;;  %v9292_v33 = vld [vmem:[#allocation5 + $0xb8] sm:$0xff]  }
 0x18e   : > { %v8387_v57 = vpop.f32.mrb[32].mxu1  ;;  %v1622_v56 = vpop.f32.mrb[33].mxu0  ;;  %8763 = vmatprep.subr.bf16.mxu1 %v9283_v27  ;;  %11471 = vst [vmem:[#allocation15_spill] sm:$0xff] %v10206_v4 }
 0x18f   : > { %v1749_v7 = vadd.f32 %v1622_v56, %v10042_v51  ;;  %v1890_v41 = vpop.f32.mrb[33].mxu1  ;;  %v8340_v62 = vpop.f32.mrb[34].mxu0  ;;  %v4286_v57 = vshrl.u32 %v10194_v14, 16  ;;  %v4290_v56 = vshll.u32 %v10198_v15, 16 }
 0x190   : > { %v8388_v1 = vpop.f32.mrb[34].mxu1  ;;  %v1625_v35 = vpop.f32.mrb[35].mxu0  ;;  %8716 = vmatpush3.bf16.msra.mxu0 %v9282_v28 }
 0x191   : > { %v10209_v18 = vadd.f32 %v1890_v41, %v1749_v7  ;;  %v1750_v51 = vadd.f32 %v1625_v35, %v10045_v50  ;;  %v1893_v52 = vpop.f32.mrb[35].mxu1  ;;  %8764 = vmatpush3.bf16.msra.mxu1 %v9283_v27  ;;  %8717 = vmatprep.subr.bf16.mxu0 %v9286_v17  ;;  %v4284_v50 = vrot.slane %v4282_v10, 1  ;;  %v4280_v7 = vor.u32 %v4278_v31, %v4276_v21  ;;  %v10224_v41 = vld [vmem:[%s9682_s29 + $0xe8] sm:$0xff]   ;;  %v10226_v1 = vld [vmem:[#allocation5 + $0xc0] sm:$0xff]  }
 0x192   : > { %8638 = vmatmul.mubr.bf16.gmra.mrb[140].mxu0 %v9929_v19  ;;  %8765 = vmatprep.subr.bf16.mxu1 %v9287_v48  ;;  %v4292_v19 = vrot.slane %v4290_v56, 1  ;;  %v4302_v56 = vshrl.u32 %v10216_v60, 16 }
 0x193   : > { %v10218_v28 = vadd.f32 %v1893_v52, %v1750_v51  ;;  %8686 = vmatmul.mubr.bf16.gmra.mrb[140].mxu1 %v10203_v25  ;;  %8641 = vmatprep.mubr.bf16.mxu0 %v9932_v23  ;;  %v4288_v62 = vor.u32 %v4286_v57, %v4284_v50  ;;  %v4298_v52 = vshll.u32 %v10216_v60, 16  ;;  %v10229_v23 = vld [vmem:[#allocation5 + $0x100] sm:$0xff]   ;;  %v10233_v57 = vsel %vm890_vm0, %v4280_v7, %v4284_v50 }
 0x194   : > { %8689 = vmatprep.mubr.bf16.mxu1 %v10206_v4  ;;  %8718 = vmatpush3.bf16.msra.mxu0 %v9286_v17  ;;  %11472 = vst [vmem:[#allocation16_spill] sm:$0xff] %v10233_v57 }
 0x195   : > { %v8343_v27 = vpop.f32.mrb[36].mxu0  ;;  %8766 = vmatpush3.bf16.msra.mxu1 %v9287_v48  ;;  %8719 = vmatprep.subr.bf16.mxu0 %v9291_v44  ;;  %v4294_v48 = vshrl.u32 %v10198_v15, 16  ;;  %v4300_v50 = vrot.slane %v4298_v52, 1 }
 0x196   : > { %v8391_v35 = vpop.f32.mrb[36].mxu1  ;;  %v1638_v51 = vpop.f32.mrb[37].mxu0  ;;  %8767 = vmatprep.subr.bf16.mxu1 %v9292_v33  ;;  %v4306_v27 = vshll.u32 %v10224_v41, 16 }
 0x197   : > { %v1753_v10 = vadd.f32 %v1638_v51, %v10055_v8  ;;  %v1906_v21 = vpop.f32.mrb[37].mxu1  ;;  %v8344_v31 = vpop.f32.mrb[38].mxu0 }
 0x198   : > { %v8392_v4 = vpop.f32.mrb[38].mxu1  ;;  %v1641_v17 = vpop.f32.mrb[39].mxu0  ;;  %8720 = vmatpush3.bf16.msra.mxu0 %v9291_v44  ;;  %v4296_v44 = vor.u32 %v4294_v48, %v4292_v19  ;;  %v4310_v48 = vshrl.u32 %v10224_v41, 16 }
 0x199   : > { %v10238_v35 = vadd.f32 %v1906_v21, %v1753_v10  ;;  %v1754_v25 = vadd.f32 %v1641_v17, %v10060_v2  ;;  %v1909_v8 = vpop.f32.mrb[39].mxu1  ;;  %v10242_v4 = vsel %vm890_vm0, %v4288_v62, %v4292_v19  ;;  %8768 = vmatpush3.bf16.msra.mxu1 %v9292_v33  ;;  %8801 = vmatprep.subr.bf16.mxu0 %v10226_v1  ;;  %v10252_v2 = vld [vmem:[%s9682_s29 + $0xf0] sm:$0xff]   ;;  %v4308_v33 = vrot.slane %v4306_v27, 1  ;;  %v10256_v10 = vld [vmem:[%s9682_s29 + $0xf8] sm:$0xff]  }
 0x19a   : > { %11473 = vst [vmem:[#allocation17_spill] sm:$0xff] %v10242_v4  ;;  %8642 = vmatmul.mubr.bf16.gmra.mrb[144].mxu0 %v9944_v37  ;;  %8849 = vmatprep.subr.bf16.mxu1 %v10229_v23  ;;  %v4304_v62 = vor.u32 %v4302_v56, %v4300_v50  ;;  %v4314_v17 = vshll.u32 %v10252_v2, 16 }
 0x19b   : > { %v10247_v7 = vadd.f32 %v1909_v8, %v1754_v25  ;;  %8690 = vmatmul.mubr.bf16.gmra.mrb[144].mxu1 %v10233_v57  ;;  %8645 = vmatprep.mubr.bf16.mxu0 %v9951_v32  ;;  %v10261_v57 = vsel %vm890_vm0, %v4296_v44, %v4300_v50  ;;  %v3171_v44 = vrot.slane %v10063_v16, 1 }
 0x19c   : > { %8693 = vmatprep.mubr.bf16.mxu1 %v10242_v4  ;;  %11474 = vst [vmem:[#allocation18_spill] sm:$0xff] %v10261_v57  ;;  %v10264_v19 = vsel %vm890_vm0, %v4304_v62, %v4308_v33  ;;  %v4316_v62 = vrot.slane %v4314_v17, 1 }
 0x19d   : > { %v8347_v51 = vpop.f32.mrb[40].mxu0  ;;  %11475 = vst [vmem:[#allocation19_spill] sm:$0xff] %v10264_v19  ;;  %v3172_v16 = vsel %vm1490_vm1, %v10000_v63, %v3171_v44 }
 0x19e   : > { %v8395_v37 = vpop.f32.mrb[40].mxu1  ;;  %v1654_v52 = vpop.f32.mrb[41].mxu0 }
 0x19f   : > { %v1757_v25 = vadd.f32 %v1654_v52, %v10072_v53  ;;  %v1922_v21 = vpop.f32.mrb[41].mxu1  ;;  %v8348_v31 = vpop.f32.mrb[42].mxu0  ;;  %v4318_v53 = vshrl.u32 %v10252_v2, 16  ;;  %v4322_v37 = vshll.u32 %v10256_v10, 16  ;;  %v10273_v52 = vld [vmem:[%s9682_s29 + $0x100] sm:$0xf] }
 0x1a0   : > { %v8396_v32 = vpop.f32.mrb[42].mxu1  ;;  %v1657_v8 = vpop.f32.mrb[43].mxu0 }
 0x1a1   : > { %v10267_v56 = vadd.f32 %v1922_v21, %v1757_v25  ;;  %v1758_v27 = vadd.f32 %v1657_v8, %v10080_v42  ;;  %v1925_v51 = vpop.f32.mrb[43].mxu1  ;;  %v4312_v42 = vor.u32 %v4310_v48, %v4308_v33  ;;  %v3173_v25 = vrot.slane %v10069_v46, 1 }
 0x1a2   : > { %8646 = vmatmul.mubr.bf16.gmra.mrb[148].mxu0 %v10009_v9  ;;  %v10285_v21 = vcombine.low %v10273_v52, %v10273_v52  ;;  %v4320_v9 = vor.u32 %v4318_v53, %v4316_v62  ;;  %v4324_v32 = vrot.slane %v4322_v37, 1 }
 0x1a3   : > { %v10276_v50 = vadd.f32 %v1925_v51, %v1758_v27  ;;  %8694 = vmatmul.mubr.bf16.gmra.mrb[148].mxu1 %v10261_v57  ;;  %8649 = vmatprep.mubr.bf16.mxu0 %v10016_v12  ;;  %v10291_v46 = vsel %vm890_vm0, %v4312_v42, %v4316_v62  ;;  %v3174_v48 = vsel %vm1490_vm1, %v3171_v44, %v3173_v25  ;;  %v3175_v44 = vrot.slane %v10086_v13, 1 }
 0x1a4   : > { %8697 = vmatprep.mubr.bf16.mxu1 %v10264_v19  ;;  %11476 = vst [vmem:[#allocation20_spill] sm:$0xff] %v10291_v46  ;;  %v4330_v53 = vshll.u32 %v10285_v21, 16 }
 0x1a5   : > { %v8351_v31 = vpop.f32.mrb[44].mxu0 }
 0x1a6   : > { %v8399_v8 = vpop.f32.mrb[44].mxu1  ;;  %v1670_v27 = vpop.f32.mrb[45].mxu0  ;;  %v4326_v31 = vshrl.u32 %v10256_v10, 16  ;;  %v4332_v42 = vrot.slane %v4330_v53, 1 }
 0x1a7   : > { %v1761_v51 = vadd.f32 %v1670_v27, %v10096_v20  ;;  %v1938_v12 = vpop.f32.mrb[45].mxu1  ;;  %v8352_v57 = vpop.f32.mrb[46].mxu0 }
 0x1a8   : > { %v8400_v17 = vpop.f32.mrb[46].mxu1  ;;  %v1673_v33 = vpop.f32.mrb[47].mxu0  ;;  %v10300_v57 = vsel %vm890_vm0, %v4320_v9, %v4324_v32  ;;  %v10307_v62 = vor.u32 %v4326_v31, %v4324_v32 }
 0x1a9   : > { %v10296_v37 = vadd.f32 %v1938_v12, %v1761_v51  ;;  %v1762_v20 = vadd.f32 %v1673_v33, %v10102_v6  ;;  %v1941_v8 = vpop.f32.mrb[47].mxu1  ;;  %11477 = vst [vmem:[#allocation21_spill] sm:$0xff] %v10300_v57  ;;  %v4800_v6 = vrot.slane %v10077_v34, 1  ;;  %v4801_v51 = vrot.slane %v10089_v45, 1 }
 0x1aa   : > { %8650 = vmatmul.mubr.bf16.gmra.mrb[152].mxu0 %v3172_v16  ;;  %v4333_v32 = vsel %vm890_vm0, %v10307_v62, %v4332_v42  ;;  %v4805_v42 = vrot.slane %v10109_v39, 1 }
 0x1ab   : > { %v10302_v63 = vadd.f32 %v1941_v8, %v1762_v20  ;;  %8698 = vmatmul.mubr.bf16.gmra.mrb[152].mxu1 %v10291_v46  ;;  %8653 = vmatprep.mubr.bf16.mxu0 %v3174_v48  ;;  %v3176_v48 = vsel %vm1490_vm1, %v3173_v25, %v3175_v44 }
 0x1ac   : > { %8701 = vmatprep.mubr.bf16.mxu1 %v10300_v57 }
 0x1ad   : > { %v8355_v27 = vpop.f32.mrb[48].mxu0 }
 0x1ae   : > { %v8403_v9 = vpop.f32.mrb[48].mxu1  ;;  %v1686_v12 = vpop.f32.mrb[49].mxu0  ;;  %v4802_v27 = vsel %vm1490_vm1, %v4800_v6, %v4801_v51 }
 0x1af   : > { %v1765_v16 = vadd.f32 %v1686_v12, %v10114_v43  ;;  %v1954_v17 = vpop.f32.mrb[49].mxu1  ;;  %v8356_v33 = vpop.f32.mrb[50].mxu0  ;;  %v4803_v43 = vrot.slane %v10106_v36, 1 }
 0x1b0   : > { %v8404_v20 = vpop.f32.mrb[50].mxu1  ;;  %v1689_v13 = vpop.f32.mrb[51].mxu0 }
 0x1b1   : > { %v10315_v31 = vadd.f32 %v1954_v17, %v1765_v16  ;;  %v1766_v53 = vadd.f32 %v1689_v13, %v10120_v54  ;;  %v1957_v8 = vpop.f32.mrb[51].mxu1 }
 0x1b2   : > { %8654 = vmatmul.mubr.bf16.gmra.mrb[156].mxu0 %v3176_v48  ;;  %v4804_v48 = vsel %vm1490_vm1, %v4801_v51, %v4803_v43 }
 0x1b3   : > { %v10319_v9 = vadd.f32 %v1957_v8, %v1766_v53  ;;  %8702 = vmatmul.mubr.bf16.gmra.mrb[156].mxu1 %v4333_v32  ;;  %8721 = vmatprep.mubr.bf16.mxu0 %v10077_v34  ;;  %v9295_v32 = vld [vmem:[#allocation5 + $0xc8] sm:$0xff]   ;;  %v10331_v53 = vsel %vm1490_vm1, %v4803_v43, %v4805_v42  ;;  %v9298_v43 = vld [vmem:[#allocation5 + $0x110] sm:$0xff]  }
 0x1b4   : > { %8769 = vmatprep.mubr.bf16.mxu1 %v4802_v27  ;;  %v9296_v8 = vld [vmem:[#allocation5 + $0x108] sm:$0xff]  }
 0x1b5   : > { %v8359_v25 = vpop.f32.mrb[52].mxu0 }
 0x1b6   : > { %v8407_v44 = vpop.f32.mrb[52].mxu1  ;;  %v1702_v12 = vpop.f32.mrb[53].mxu0 }
 0x1b7   : > { %v1769_v16 = vadd.f32 %v1702_v12, %v10132_v61  ;;  %v1970_v54 = vpop.f32.mrb[53].mxu1  ;;  %v8360_v17 = vpop.f32.mrb[54].mxu0  ;;  %v4807_v61 = vrot.slane %v10124_v55, 1 }
 0x1b8   : > { %v8408_v33 = vpop.f32.mrb[54].mxu1  ;;  %v1705_v6 = vpop.f32.mrb[55].mxu0 }
 0x1b9   : > { %v10326_v20 = vadd.f32 %v1970_v54, %v1769_v16  ;;  %v1770_v34 = vadd.f32 %v1705_v6, %v10140_v40  ;;  %v1973_v13 = vpop.f32.mrb[55].mxu1  ;;  %v9297_v40 = vld [vmem:[#allocation5 + $0xd0] sm:$0xff]   ;;  %v10343_v54 = vsel %vm1490_vm1, %v4805_v42, %v4807_v61  ;;  %v4811_v42 = vrot.slane %v10144_v30, 1 }
 0x1ba   : > { %8722 = vmatmul.mubr.bf16.vlgmr.msra.gmra.mrb[160].mxu0 %v10089_v45  ;;  %v4809_v45 = vrot.slane %v10127_v3, 1 }
 0x1bb   : > { %v10333_v27 = vadd.f32 %v1973_v13, %v1770_v34  ;;  %8770 = vmatmul.mubr.bf16.vlgmr.msra.gmra.mrb[160].mxu1 %v4804_v48  ;;  %8802 = vmatpush3.bf16.msra.mxu0 %v10226_v1  ;;  %v9300_v34 = vld [vmem:[#allocation5 + $0x118] sm:$0xff]  }
 0x1bc   : > { %8850 = vmatpush3.bf16.msra.mxu1 %v10229_v23  ;;  %8725 = vmatprep.mubr.bf16.mxu0 %v10106_v36  ;;  %v10349_v48 = vsel %vm1490_vm1, %v4807_v61, %v4809_v45 }
 0x1bd   : > { %v8363_v51 = vpop.f32.mrb[56].mxu0  ;;  %8773 = vmatprep.mubr.bf16.mxu1 %v10331_v53  ;;  %8803 = vmatprep.subr.bf16.mxu0 %v9295_v32 }
 0x1be   : > { %v8411_v25 = vpop.f32.mrb[56].mxu1  ;;  %v1718_v44 = vpop.f32.mrb[57].mxu0  ;;  %8851 = vmatprep.subr.bf16.mxu1 %v9296_v8  ;;  %v9302_v51 = vld [vmem:[#allocation5 + $0x120] sm:$0xff]  }
 0x1bf   : > { %v1773_v12 = vadd.f32 %v1718_v44, %v10157_v24  ;;  %v1986_v1 = vpop.f32.mrb[57].mxu1  ;;  %v8364_v16 = vpop.f32.mrb[58].mxu0  ;;  %8804 = vmatpush3.bf16.msra.mxu0 %v9295_v32  ;;  %v9299_v24 = vld [vmem:[#allocation5 + $0xd8] sm:$0xff]   ;;  %v4813_v32 = vrot.slane %v10150_v47, 1 }
 0x1c0   : > { %v8412_v23 = vpop.f32.mrb[58].mxu1  ;;  %v1721_v36 = vpop.f32.mrb[59].mxu0  ;;  %8852 = vmatpush3.bf16.msra.mxu1 %v9296_v8  ;;  %8805 = vmatprep.subr.bf16.mxu0 %v9297_v40  ;;  %v9301_v8 = vld [vmem:[#allocation5 + $0xe0] sm:$0xff]   ;;  %v10361_v16 = vsel %vm1490_vm1, %v4809_v45, %v4811_v42  ;;  %v10374_v45 = vld [vmem:[#allocation5 + $0x128] sm:$0xff]  }
 0x1c1   : > { %v10345_v17 = vadd.f32 %v1986_v1, %v1773_v12  ;;  %v1774_v33 = vadd.f32 %v1721_v36, %v10168_v11  ;;  %v1989_v6 = vpop.f32.mrb[59].mxu1  ;;  %8853 = vmatprep.subr.bf16.mxu1 %v9298_v43  ;;  %v10369_v36 = vsel %vm1490_vm1, %v4811_v42, %v4813_v32 }
 0x1c2   : > { %8726 = vmatmul.mubr.bf16.gmra.mrb[164].mxu0 %v10109_v39 }
 0x1c3   : > { %v10352_v13 = vadd.f32 %v1989_v6, %v1774_v33  ;;  %8774 = vmatmul.mubr.bf16.gmra.mrb[164].mxu1 %v10343_v54  ;;  %8729 = vmatprep.mubr.bf16.mxu0 %v10124_v55 }
 0x1c4   : > { %8777 = vmatprep.mubr.bf16.mxu1 %v10349_v48  ;;  %8806 = vmatpush3.bf16.msra.mxu0 %v9297_v40 }
 0x1c5   : > { %v8367_v11 = vpop.f32.mrb[60].mxu0  ;;  %8854 = vmatpush3.bf16.msra.mxu1 %v9298_v43  ;;  %8807 = vmatprep.subr.bf16.mxu0 %v9299_v24 }
 0x1c6   : > { %v8415_v61 = vpop.f32.mrb[60].mxu1  ;;  %v1734_v39 = vpop.f32.mrb[61].mxu0  ;;  %8855 = vmatprep.subr.bf16.mxu1 %v9300_v34  ;;  %v10387_v11 = vld [vmem:[#allocation5 + $0x130] sm:$0xff]  }
 0x1c7   : > { %v1777_v25 = vadd.f32 %v1734_v39, %v10183_v29  ;;  %v2002_v44 = vpop.f32.mrb[61].mxu1  ;;  %v8368_v12 = vpop.f32.mrb[62].mxu0  ;;  %v10371_v29 = vld [vmem:[#allocation5 + $0xe8] sm:$0xff]  }
 0x1c8   : > { %v8416_v55 = vpop.f32.mrb[62].mxu1  ;;  %v1737_v1 = vpop.f32.mrb[63].mxu0  ;;  %8808 = vmatpush3.bf16.msra.mxu0 %v9299_v24  ;;  %v4817_v24 = vrot.slane %v10174_v38, 1 }
 0x1c9   : > { %v10363_v40 = vadd.f32 %v2002_v44, %v1777_v25  ;;  %v1778_v43 = vadd.f32 %v1737_v1, %v10189_v59  ;;  %v2005_v23 = vpop.f32.mrb[63].mxu1  ;;  %8856 = vmatpush3.bf16.msra.mxu1 %v9300_v34  ;;  %8809 = vmatprep.subr.bf16.mxu0 %v9301_v8  ;;  %v4815_v59 = vrot.slane %v10166_v22, 1 }
 0x1ca   : > { %8730 = vmatmul.mubr.bf16.gmra.mrb[168].mxu0 %v10127_v3  ;;  %8857 = vmatprep.subr.bf16.mxu1 %v9302_v51  ;;  %v10384_v3 = vld [vmem:[#allocation5 + $0xf0] sm:$0xff]  }
 0x1cb   : > { %v10376_v33 = vadd.f32 %v2005_v23, %v1778_v43  ;;  %8778 = vmatmul.mubr.bf16.gmra.mrb[168].mxu1 %v10361_v16  ;;  %8733 = vmatprep.mubr.bf16.mxu0 %v10144_v30  ;;  %v10555_v25 = vsel %vm1490_vm1, %v4813_v32, %v4815_v59  ;;  %v10568_v1 = vsel %vm1490_vm1, %v4815_v59, %v4817_v24  ;;  %v9307_v32 = vld [vmem:[#allocation5 + $0xf8] sm:$0xff]  }
 0x1cc   : > { %8781 = vmatprep.mubr.bf16.mxu1 %v10369_v36  ;;  %8810 = vmatpush3.bf16.msra.mxu0 %v9301_v8  ;;  %v9308_v43 = vld [vmem:[#allocation5 + $0x138] sm:$0xff]  }
 0x1cd   : > { %v8435_v6 = vpop.f32.mrb[64].mxu0  ;;  %8858 = vmatpush3.bf16.msra.mxu1 %v9302_v51  ;;  %8811 = vmatprep.subr.bf16.mxu0 %v10371_v29 }
 0x1ce   : > { %v8483_v34 = vpop.f32.mrb[64].mxu1  ;;  %v2175_v42 = vpop.f32.mrb[65].mxu0  ;;  %8859 = vmatprep.subr.bf16.mxu1 %v10374_v45 }
 0x1cf   : > { %v10390_v30 = vadd.f32 %v2175_v42, %v10209_v18  ;;  %v10392_v61 = vpop.f32.mrb[65].mxu1  ;;  %v8436_v8 = vpop.f32.mrb[66].mxu0  ;;  %v9506_v18 = vmov 0   ;;  %v10585_v34 = vld [vmem:[#allocation5 + $0x180] sm:$0xff]  }
 0x1d0   : > { %209 = vst [vmem:[%s10396_s18 + $0x10] sm:$0xf] %v9506_v18  ;;  %205 = vst [vmem:[%s10396_s18] sm:$0xf] %v9506_v18  ;;  %v8484_v39 = vpop.f32.mrb[66].mxu1  ;;  %v2178_v51 = vpop.f32.mrb[67].mxu0  ;;  %8812 = vmatpush3.bf16.msra.mxu0 %v10371_v29 }
 0x1d1   : > { %206 = vst [vmem:[%s10396_s18 + $0x4] sm:$0xf] %v9506_v18  ;;  %207 = vst [vmem:[%s10396_s18 + $0x8] sm:$0xf] %v9506_v18  ;;  %v10560_v44 = vadd.f32 %v10392_v61, %v10390_v30  ;;  %v2303_v12 = vadd.f32 %v2178_v51, %v10218_v28  ;;  %v2445_v55 = vpop.f32.mrb[67].mxu1  ;;  %8860 = vmatpush3.bf16.msra.mxu1 %v10374_v45  ;;  %8813 = vmatprep.subr.bf16.mxu0 %v10384_v3  ;;  %v4819_v28 = vrot.slane %v10194_v14, 1 }
 0x1d2   : > { %208 = vst [vmem:[%s10396_s18 + $0xc] sm:$0xf] %v9506_v18  ;;  %210 = vst [vmem:[%s10396_s18 + $0x14] sm:$0xf] %v9506_v18  ;;  %8734 = vmatmul.mubr.bf16.gmra.mrb[172].mxu0 %v10150_v47  ;;  %8861 = vmatprep.subr.bf16.mxu1 %v10387_v11  ;;  %v4821_v45 = vrot.slane %v10198_v15, 1  ;;  %v10583_v47 = vld [vmem:[#allocation5 + $0x140] sm:$0xff]  }
 0x1d3   : > { %211 = vst [vmem:[%s10396_s18 + $0x18] sm:$0xf] %v9506_v18  ;;  %212 = vst [vmem:[%s10396_s18 + $0x1c] sm:$0xf] %v9506_v18  ;;  %v10574_v23 = vadd.f32 %v2445_v55, %v2303_v12  ;;  %8782 = vmatmul.mubr.bf16.gmra.mrb[172].mxu1 %v10555_v25  ;;  %8737 = vmatprep.mubr.bf16.mxu0 %v10166_v22 }
 0x1d4   : > { %213 = vst [vmem:[%s10396_s18 + $0x20] sm:$0xf] %v9506_v18  ;;  %214 = vst [vmem:[%s10396_s18 + $0x24] sm:$0xf] %v9506_v18  ;;  %8785 = vmatprep.mubr.bf16.mxu1 %v10568_v1  ;;  %8814 = vmatpush3.bf16.msra.mxu0 %v10384_v3  ;;  %v10591_v3 = vsel %vm1490_vm1, %v4817_v24, %v4819_v28  ;;  %v10597_v55 = vsel %vm1490_vm1, %v4819_v28, %v4821_v45 }
 0x1d5   : > { %215 = vst [vmem:[%s10396_s18 + $0x28] sm:$0xf] %v9506_v18  ;;  %216 = vst [vmem:[%s10396_s18 + $0x2c] sm:$0xf] %v9506_v18  ;;  %v8439_v29 = vpop.f32.mrb[68].mxu0  ;;  %8862 = vmatpush3.bf16.msra.mxu1 %v10387_v11  ;;  %8815 = vmatprep.subr.bf16.mxu0 %v9307_v32  ;;  %v9507_v11 = vmov 0.0|0.0  }
 0x1d6   : > { %217 = vst [vmem:[%s10396_s18 + $0x30] sm:$0xf] %v9506_v18  ;;  %218 = vst [vmem:[%s10396_s18 + $0x34] sm:$0xf] %v9506_v18  ;;  %v8487_v59 = vpop.f32.mrb[68].mxu1  ;;  %v2191_v6 = vpop.f32.mrb[69].mxu0  ;;  %8863 = vmatprep.subr.bf16.mxu1 %v9308_v43 }
 0x1d7   : > { %219 = vst [vmem:[%s10396_s18 + $0x38] sm:$0xf] %v9506_v18  ;;  %220 = vst [vmem:[%s10396_s18 + $0x3c] sm:$0xf] %v9506_v18  ;;  %v2306_v22 = vadd.f32 %v2191_v6, %v10238_v35  ;;  %v2458_v42 = vpop.f32.mrb[69].mxu1  ;;  %v8440_v30 = vpop.f32.mrb[70].mxu0 }
 0x1d8   : > { %221 = vst [vmem:[%s10396_s18 + $0x40] sm:$0xf] %v9506_v18  ;;  %222 = vst [vmem:[%s10396_s18 + $0x44] sm:$0xf] %v9506_v18  ;;  %v8488_v61 = vpop.f32.mrb[70].mxu1  ;;  %v2194_v8 = vpop.f32.mrb[71].mxu0  ;;  %8816 = vmatpush3.bf16.msra.mxu0 %v9307_v32 }
 0x1d9   : > { %223 = vst [vmem:[%s10396_s18 + $0x48] sm:$0xf] %v9506_v18  ;;  %224 = vst [vmem:[%s10396_s18 + $0x4c] sm:$0xf] %v9506_v18  ;;  %v10593_v39 = vadd.f32 %v2458_v42, %v2306_v22  ;;  %v2307_v51 = vadd.f32 %v2194_v8, %v10247_v7  ;;  %v2461_v12 = vpop.f32.mrb[71].mxu1  ;;  %8864 = vmatpush3.bf16.msra.mxu1 %v9308_v43  ;;  %8897 = vmatprep.subr.bf16.mxu0 %v10583_v47  ;;  %v4823_v7 = vrot.slane %v10216_v60, 1 }
 0x1da   : > { %225 = vst [vmem:[%s10396_s18 + $0x50] sm:$0xf] %v9506_v18  ;;  %226 = vst [vmem:[%s10396_s18 + $0x54] sm:$0xf] %v9506_v18  ;;  %8738 = vmatmul.mubr.bf16.gmra.mrb[176].mxu0 %v10174_v38  ;;  %8945 = vmatprep.subr.bf16.mxu1 %v10585_v34  ;;  %v4825_v29 = vrot.slane %v10224_v41, 1 }
 0x1db   : > { %227 = vst [vmem:[%s10396_s18 + $0x58] sm:$0xf] %v9506_v18  ;;  %228 = vst [vmem:[%s10396_s18 + $0x5c] sm:$0xf] %v9506_v18  ;;  %v10602_v24 = vadd.f32 %v2461_v12, %v2307_v51  ;;  %8786 = vmatmul.mubr.bf16.gmra.mrb[176].mxu1 %v10591_v3  ;;  %8741 = vmatprep.mubr.bf16.mxu0 %v10194_v14  ;;  %v10613_v14 = vsel %vm1490_vm1, %v4821_v45, %v4823_v7 }
 0x1dc   : > { %229 = vst [vmem:[%s10396_s18 + $0x60] sm:$0xf] %v9506_v18  ;;  %230 = vst [vmem:[%s10396_s18 + $0x64] sm:$0xf] %v9506_v18  ;;  %8789 = vmatprep.mubr.bf16.mxu1 %v10597_v55 }
 0x1dd   : > { %231 = vst [vmem:[%s10396_s18 + $0x68] sm:$0xf] %v9506_v18  ;;  %232 = vst [vmem:[%s10396_s18 + $0x6c] sm:$0xf] %v9506_v18  ;;  %v8443_v43 = vpop.f32.mrb[72].mxu0 }
 0x1de   : > { %233 = vst [vmem:[%s10396_s18 + $0x70] sm:$0xf] %v9506_v18  ;;  %234 = vst [vmem:[%s10396_s18 + $0x74] sm:$0xf] %v9506_v18  ;;  %v8491_v59 = vpop.f32.mrb[72].mxu1  ;;  %v2207_v38 = vpop.f32.mrb[73].mxu0 }
 0x1df   : > { %235 = vst [vmem:[%s10396_s18 + $0x78] sm:$0xf] %v9506_v18  ;;  %236 = vst [vmem:[%s10396_s18 + $0x7c] sm:$0xf] %v9506_v18  ;;  %v2310_v22 = vadd.f32 %v2207_v38, %v10267_v56  ;;  %v2474_v42 = vpop.f32.mrb[73].mxu1  ;;  %v8444_v30 = vpop.f32.mrb[74].mxu0 }
 0x1e0   : > { %237 = vst [vmem:[%s10396_s18 + $0x80] sm:$0xf] %v9506_v18  ;;  %238 = vst [vmem:[%s10396_s18 + $0x84] sm:$0xf] %v9506_v18  ;;  %v8492_v61 = vpop.f32.mrb[74].mxu1  ;;  %v2210_v8 = vpop.f32.mrb[75].mxu0 }
 0x1e1   : > { %239 = vst [vmem:[%s10396_s18 + $0x88] sm:$0xf] %v9506_v18  ;;  %240 = vst [vmem:[%s10396_s18 + $0x8c] sm:$0xf] %v9506_v18  ;;  %v10615_v51 = vadd.f32 %v2474_v42, %v2310_v22  ;;  %v2477_v12 = vpop.f32.mrb[75].mxu1  ;;  %v4827_v56 = vrot.slane %v10252_v2, 1 }
 0x1e2   : > { %241 = vst [vmem:[%s10396_s18 + $0x90] sm:$0xf] %v9506_v18  ;;  %242 = vst [vmem:[%s10396_s18 + $0x94] sm:$0xf] %v9506_v18  ;;  %8742 = vmatmul.mubr.bf16.gmra.mrb[180].mxu0 %v10198_v15  ;;  %v10629_v43 = vrot.slane %v10256_v10, 1 }
 0x1e3   : > { %243 = vst [vmem:[%s10396_s18 + $0x98] sm:$0xf] %v9506_v18  ;;  %244 = vst [vmem:[%s10396_s18 + $0x9c] sm:$0xf] %v9506_v18  ;;  %8790 = vmatmul.mubr.bf16.gmra.mrb[180].mxu1 %v10613_v14  ;;  %8745 = vmatprep.mubr.bf16.mxu0 %v10216_v60  ;;  %v10633_v61 = vsel %vm1490_vm1, %v4825_v29, %v4827_v56 }
 0x1e4   : > { %245 = vst [vmem:[%s10396_s18 + $0xa0] sm:$0xf] %v9506_v18  ;;  %246 = vst [vmem:[%s10396_s18 + $0xa4] sm:$0xf] %v9506_v18 }
 0x1e5   : > { %247 = vst [vmem:[%s10396_s18 + $0xa8] sm:$0xf] %v9506_v18  ;;  %248 = vst [vmem:[%s10396_s18 + $0xac] sm:$0xf] %v9506_v18  ;;  %v8447_v45 = vpop.f32.mrb[76].mxu0 }
 0x1e6   : > { %249 = vst [vmem:[%s10396_s18 + $0xb0] sm:$0xf] %v9506_v18  ;;  %250 = vst [vmem:[%s10396_s18 + $0xb4] sm:$0xf] %v9506_v18  ;;  %v2223_v59 = vpop.f32.mrb[77].mxu0 }
 0x1e7   : > { %251 = vst [vmem:[%s10396_s18 + $0xb8] sm:$0xf] %v9506_v18  ;;  %252 = vst [vmem:[%s10396_s18 + $0xbc] sm:$0xf] %v9506_v18  ;;  %v2314_v38 = vadd.f32 %v2223_v59, %v10296_v37  ;;  %v8448_v22 = vpop.f32.mrb[78].mxu0 }
 0x1e8   : > { %253 = vst [vmem:[%s10396_s18 + $0xc0] sm:$0xf] %v9506_v18  ;;  %254 = vst [vmem:[%s10396_s18 + $0xc4] sm:$0xf] %v9506_v18  ;;  %v2226_v30 = vpop.f32.mrb[79].mxu0 }
 0x1e9   : > { %255 = vst [vmem:[%s10396_s18 + $0xc8] sm:$0xf] %v9506_v18  ;;  %256 = vst [vmem:[%s10396_s18 + $0xcc] sm:$0xf] %v9506_v18 }
 0x1ea   : > { %257 = vst [vmem:[%s10396_s18 + $0xd0] sm:$0xf] %v9506_v18  ;;  %258 = vst [vmem:[%s10396_s18 + $0xd4] sm:$0xf] %v9506_v18  ;;  %8746 = vmatmul.mubr.bf16.gmra.mrb[184].mxu0 %v10224_v41  ;;  %v4831_v41 = vrot.slane %v10285_v21, 1 }
 0x1eb   : > { %259 = vst [vmem:[%s10396_s18 + $0xd8] sm:$0xf] %v9506_v18  ;;  %260 = vst [vmem:[%s10396_s18 + $0xdc] sm:$0xf] %v9506_v18  ;;  %8749 = vmatprep.mubr.bf16.mxu0 %v10252_v2 }
 0x1ec   : > { %261 = vst [vmem:[%s10396_s18 + $0xe0] sm:$0xf] %v9506_v18  ;;  %262 = vst [vmem:[%s10396_s18 + $0xe4] sm:$0xf] %v9506_v18 }
 0x1ed   : > { %263 = vst [vmem:[%s10396_s18 + $0xe8] sm:$0xf] %v9506_v18  ;;  %264 = vst [vmem:[%s10396_s18 + $0xec] sm:$0xf] %v9506_v18 }
 0x1ee   : > { %265 = vst [vmem:[%s10396_s18 + $0xf0] sm:$0xf] %v9506_v18  ;;  %266 = vst [vmem:[%s10396_s18 + $0xf4] sm:$0xf] %v9506_v18 }
 0x1ef   : > { %267 = vst [vmem:[%s10396_s18 + $0xf8] sm:$0xf] %v9506_v18  ;;  %268 = vst [vmem:[%s10396_s18 + $0xfc] sm:$0xf] %v9506_v18 }
 0x1f0   : > { %269 = vst [vmem:[%s10396_s18 + $0x100] sm:$0xf] %v9506_v18  ;;  %270 = vst [vmem:[%s10396_s18 + $0x104] sm:$0xf] %v9506_v18 }
 0x1f1   : > { %271 = vst [vmem:[%s10396_s18 + $0x108] sm:$0xf] %v9506_v18  ;;  %272 = vst [vmem:[%s10396_s18 + $0x10c] sm:$0xf] %v9506_v18 }
 0x1f2   : > { %273 = vst [vmem:[%s10396_s18 + $0x110] sm:$0xf] %v9506_v18  ;;  %274 = vst [vmem:[%s10396_s18 + $0x114] sm:$0xf] %v9506_v18  ;;  %8750 = vmatmul.mubr.bf16.gmra.mrb[188].mxu0 %v10256_v10 }
 0x1f3   : > { %275 = vst [vmem:[%s10396_s18 + $0x118] sm:$0xf] %v9506_v18  ;;  %276 = vst [vmem:[%s10396_s18 + $0x11c] sm:$0xf] %v9506_v18 }
 0x1f4   : > { %277 = vst [vmem:[%s10396_s18 + $0x120] sm:$0xf] %v9506_v18  ;;  %278 = vst [vmem:[%s10396_s18 + $0x124] sm:$0xf] %v9506_v18 }
 0x1f5   : > { %279 = vst [vmem:[%s10396_s18 + $0x128] sm:$0xf] %v9506_v18  ;;  %280 = vst [vmem:[%s10396_s18 + $0x12c] sm:$0xf] %v9506_v18  ;;  %v7479_v18 = vcombine.low %v9507_v11, %v9507_v11 }
 0x1f6   : > { %11478 = vst [vmem:[#allocation22_spill] sm:$0xff] %v10629_v43 }
 0x1f7   : > { %v3705_v35 = vshrl.u32 %v7479_v18, 16  ;;  %v3708_v28 = vshll.u32 %v7479_v18, 16  ;;  %v2311_v18 = vadd.f32 %v2210_v8, %v10276_v50  ;;  %v8495_v50 = vpop.f32.mrb[76].mxu1 }
 0x1f8   : > { %v2490_v15 = vpop.f32.mrb[77].mxu1  ;;  %v10640_v50 = vsel %vm1490_vm1, %v4827_v56, %v10629_v43 }
 0x1f9   : > { %v3707_v32 = vrot.slane %v3705_v35, 7  ;;  %v10619_v35 = vsel %vm1490_vm1, %v4823_v7, %v4825_v29  ;;  %v7480_v7 = vcombine.high %v9507_v11, %v9507_v11  ;;  %v8496_v42 = vpop.f32.mrb[78].mxu1 }
 0x1fa   : > { %8793 = vmatprep.mubr.bf16.mxu1 %v10619_v35  ;;  %v2493_v45 = vpop.f32.mrb[79].mxu1  ;;  %v4832_v42 = vsel %vm1490_vm1, %v10629_v43, %v4831_v41 }
 0x1fb   : > { %v10609_v6 = vor.u32 %v3708_v28, %v3707_v32  ;;  %v10622_v28 = vadd.f32 %v2477_v12, %v2311_v18  ;;  %v3714_v60 = vshrl.u32 %v7480_v7, 16  ;;  %v3717_v8 = vshll.u32 %v7480_v7, 16  ;;  %8794 = vmatmul.mubr.bf16.gmra.mrb[184].mxu1 %v10633_v61  ;;  %v8499_v59 = vpop.f32.mrb[80].mxu1 }
 0x1fc   : > { %v10635_v18 = vadd.f32 %v2490_v15, %v2314_v38  ;;  %v2315_v12 = vadd.f32 %v2226_v30, %v10302_v63  ;;  %v3712_v37 = vrot.slane %v3707_v32, 4  ;;  %8797 = vmatprep.mubr.bf16.mxu1 %v10640_v50  ;;  %v8451_v32 = vpop.f32.mrb[80].mxu0  ;;  %v2506_v38 = vpop.f32.mrb[81].mxu1 }
 0x1fd   : > { %v3716_v11 = vrot.slane %v3714_v60, 7  ;;  %v2239_v7 = vpop.f32.mrb[81].mxu0 }
 0x1fe   : > { %v10643_v29 = vadd.f32 %v2493_v45, %v2315_v12  ;;  %v2318_v21 = vadd.f32 %v2239_v7, %v10315_v31  ;;  %v8452_v15 = vpop.f32.mrb[82].mxu0  ;;  %v8500_v31 = vpop.f32.mrb[82].mxu1  ;;  %v9358_v45 = vld [vmem:[%s9682_s29 + $0x90] sm:$0xff]  }
 0x1ff   : > { %v3719_v63 = vor.u32 %v3717_v8, %v3716_v11  ;;  %v2242_v22 = vpop.f32.mrb[83].mxu0  ;;  %v2509_v8 = vpop.f32.mrb[83].mxu1  ;;  %8817 = vmatprep.mubr.bf16.mxu0 %v9358_v45  ;;  %v9359_v15 = vld [vmem:[%s9682_s29 + $0x98] sm:$0xff]  }
 0x200   : > { %v10674_v30 = vadd.f32 %v2506_v38, %v2318_v21  ;;  %v2319_v60 = vadd.f32 %v2242_v22, %v10319_v9  ;;  %v8503_v11 = vpop.f32.mrb[84].mxu1  ;;  %v9311_v38 = vld [vmem:[#allocation5 + $0x148] sm:$0xff]   ;;  %8818 = vmatmul.mubr.bf16.vlgmr.msra.gmra.mrb[192].mxu0 %v9359_v15  ;;  %v9313_v22 = vld [vmem:[#allocation5 + $0x150] sm:$0xff]   ;;  %v9318_v15 = vld [vmem:[#allocation5 + $0x1a0] sm:$0xff]  }
 0x201   : > { %v3720_v2 = vsel %vm10649_vm4, %v3712_v37, %v3719_v63  ;;  %v8455_v37 = vpop.f32.mrb[84].mxu0  ;;  %v2522_v32 = vpop.f32.mrb[85].mxu1  ;;  %v9312_v31 = vld [vmem:[#allocation5 + $0x188] sm:$0xff]   ;;  %8898 = vmatpush3.bf16.msra.mxu0 %v10583_v47 }
 0x202   : > { %7513 = vst [vmem:[%s10396_s18 + $0x1c] sm:$0xf] %v3720_v2  ;;  %7518 = vst [vmem:[%s10396_s18 + $0x2c] sm:$0xf] %v3720_v2  ;;  %v10678_v12 = vadd.f32 %v2509_v8, %v2319_v60  ;;  %v2255_v63 = vpop.f32.mrb[85].mxu0  ;;  %v8504_v9 = vpop.f32.mrb[86].mxu1  ;;  %8899 = vmatprep.subr.bf16.mxu0 %v9311_v38 }
 0x203   : > { %7523 = vst [vmem:[%s10396_s18 + $0x3c] sm:$0xf] %v3720_v2  ;;  %7528 = vst [vmem:[%s10396_s18 + $0x4c] sm:$0xf] %v3720_v2  ;;  %8798 = vmatmul.mubr.bf16.gmra.mrb[188].mxu1 %v4832_v42  ;;  %v2322_v41 = vadd.f32 %v2255_v63, %v10326_v20  ;;  %v8456_v59 = vpop.f32.mrb[86].mxu0  ;;  %v2525_v21 = vpop.f32.mrb[87].mxu1 }
 0x204   : > { %7533 = vst [vmem:[%s10396_s18 + $0x5c] sm:$0xf] %v3720_v2  ;;  %7538 = vst [vmem:[%s10396_s18 + $0x6c] sm:$0xf] %v3720_v2  ;;  %8865 = vmatprep.mubr.bf16.mxu1 %v10138_v49  ;;  %v2258_v7 = vpop.f32.mrb[87].mxu0  ;;  %v10693_v20 = vld [vmem:[%s9682_s29 + $0xa0] sm:$0xff]  }
 0x205   : > { %7543 = vst [vmem:[%s10396_s18 + $0x7c] sm:$0xf] %v3720_v2  ;;  %7548 = vst [vmem:[%s10396_s18 + $0x8c] sm:$0xf] %v3720_v2  ;;  %v2323_v10 = vadd.f32 %v2258_v7, %v10333_v27  ;;  %8821 = vmatprep.mubr.bf16.mxu0 %v10693_v20  ;;  %v8459_v42 = vpop.f32.mrb[88].mxu0  ;;  %v9314_v27 = vld [vmem:[#allocation5 + $0x190] sm:$0xff]   ;;  %8900 = vmatpush3.bf16.msra.mxu0 %v9311_v38 }
 0x206   : > { %7722 = vst [vmem:[%s10396_s18 + $0x9c] sm:$0xf] %v3720_v2  ;;  %7727 = vst [vmem:[%s10396_s18 + $0xac] sm:$0xf] %v3720_v2  ;;  %v8507_v60 = vpop.f32.mrb[88].mxu1  ;;  %v2271_v8 = vpop.f32.mrb[89].mxu0  ;;  %8901 = vmatprep.subr.bf16.mxu0 %v9313_v22 }
 0x207   : > { %7732 = vst [vmem:[%s10396_s18 + $0xbc] sm:$0xf] %v3720_v2  ;;  %7737 = vst [vmem:[%s10396_s18 + $0xcc] sm:$0xf] %v3720_v2  ;;  %v10687_v49 = vadd.f32 %v2525_v21, %v2323_v10  ;;  %v2538_v45 = vpop.f32.mrb[89].mxu1  ;;  %v8460_v47 = vpop.f32.mrb[90].mxu0 }
 0x208   : > { %7742 = vst [vmem:[%s10396_s18 + $0xdc] sm:$0xf] %v3720_v2  ;;  %7747 = vst [vmem:[%s10396_s18 + $0xec] sm:$0xf] %v3720_v2  ;;  %v2274_v37 = vpop.f32.mrb[91].mxu0  ;;  %v10702_v59 = vld [vmem:[%s9682_s29 + $0xa8] sm:$0xff]  }
 0x209   : > { %7752 = vst [vmem:[%s10396_s18 + $0xfc] sm:$0xf] %v3720_v2  ;;  %7757 = vst [vmem:[%s10396_s18 + $0x10c] sm:$0xf] %v3720_v2  ;;  %v10683_v2 = vadd.f32 %v2522_v32, %v2322_v41  ;;  %v2327_v63 = vadd.f32 %v2274_v37, %v10352_v13  ;;  %v9315_v32 = vld [vmem:[#allocation5 + $0x158] sm:$0xff]   ;;  %8822 = vmatmul.mubr.bf16.gmra.mrb[196].mxu0 %v10702_v59  ;;  %v10709_v7 = vld [vmem:[%s9682_s29 + $0xb0] sm:$0xff]  }
 0x20a   : > { %8825 = vmatprep.mubr.bf16.mxu0 %v10709_v7  ;;  %8902 = vmatpush3.bf16.msra.mxu0 %v9313_v22  ;;  %v8463_v13 = vpop.f32.mrb[92].mxu0  ;;  %v9317_v10 = vld [vmem:[#allocation5 + $0x160] sm:$0xff]   ;;  %v9319_v47 = vld [vmem:[#allocation5 + $0x168] sm:$0xff]  }
 0x20b   : > { %8866 = vmatmul.mubr.bf16.vlgmr.msra.gmra.mrb[192].mxu1 %v10155_v0  ;;  %v2326_v0 = vadd.f32 %v2271_v8, %v10345_v17  ;;  %v9316_v17 = vld [vmem:[#allocation5 + $0x198] sm:$0xff]   ;;  %8903 = vmatprep.subr.bf16.mxu0 %v9315_v32  ;;  %v2287_v38 = vpop.f32.mrb[93].mxu0 }
 0x20c   : > { %8946 = vmatpush3.bf16.msra.mxu1 %v10585_v34  ;;  %8869 = vmatprep.mubr.bf16.mxu1 %v10160_v5  ;;  %v8508_v34 = vpop.f32.mrb[90].mxu1  ;;  %v8464_v60 = vpop.f32.mrb[94].mxu0 }
 0x20d   : > { %8947 = vmatprep.subr.bf16.mxu1 %v9312_v31  ;;  %v10698_v11 = vadd.f32 %v2538_v45, %v2326_v0  ;;  %v2541_v41 = vpop.f32.mrb[91].mxu1  ;;  %v2290_v0 = vpop.f32.mrb[95].mxu0  ;;  %v10718_v34 = vld [vmem:[%s9682_s29 + $0xb8] sm:$0xff]  }
 0x20e   : > { %v10705_v9 = vadd.f32 %v2541_v41, %v2327_v63  ;;  %v8511_v21 = vpop.f32.mrb[92].mxu1  ;;  %8904 = vmatpush3.bf16.msra.mxu0 %v9315_v32  ;;  %v2331_v22 = vadd.f32 %v2290_v0, %v10376_v33  ;;  %v11481_v63 = vld [vmem:[#allocation14_spill] sm:$0xff]  ;;  %v10725_v41 = vld [vmem:[%s9682_s29 + $0xc0] sm:$0xff]   ;;  %v8531_v33 = vpop.f32.mrb[96].mxu0 }
 0x20f   : > { %v2554_v42 = vpop.f32.mrb[93].mxu1  ;;  %8905 = vmatprep.subr.bf16.mxu0 %v9317_v10  ;;  %v11482_v32 = vld [vmem:[#allocation15_spill] sm:$0xff]  ;;  %v2710_v21 = vpop.f32.mrb[97].mxu0  ;;  %v10734_v33 = vld [vmem:[%s9682_s29 + $0xc8] sm:$0xff]  }
 0x210   : > { %8948 = vmatpush3.bf16.msra.mxu1 %v9312_v31  ;;  %v2330_v31 = vadd.f32 %v2287_v38, %v10363_v40  ;;  %v8512_v8 = vpop.f32.mrb[94].mxu1  ;;  %v9320_v40 = vld [vmem:[#allocation5 + $0x1a8] sm:$0xff]   ;;  %v9322_v38 = vld [vmem:[#allocation5 + $0x1b0] sm:$0xff]   ;;  %v8532_v60 = vpop.f32.mrb[98].mxu0 }
 0x211   : > { %8949 = vmatprep.subr.bf16.mxu1 %v9314_v27  ;;  %8826 = vmatmul.mubr.bf16.gmra.mrb[200].mxu0 %v10718_v34  ;;  %v2713_v0 = vpop.f32.mrb[99].mxu0  ;;  %v10747_v60 = vld [vmem:[#allocation5 + $0x200] sm:$0xff]  }
 0x212   : > { %v10714_v45 = vadd.f32 %v2554_v42, %v2330_v31  ;;  %8829 = vmatprep.mubr.bf16.mxu0 %v10725_v41  ;;  %8906 = vmatpush3.bf16.msra.mxu0 %v9317_v10  ;;  %v2837_v31 = vadd.f32 %v2710_v21, %v10560_v44  ;;  %v2838_v10 = vadd.f32 %v2713_v0, %v10574_v23  ;;  %v9326_v44 = vld [vmem:[#allocation5 + $0x1b8] sm:$0xff]   ;;  %v11483_v21 = vld [vmem:[#allocation16_spill] sm:$0xff] }
 0x213   : > { %8870 = vmatmul.mubr.bf16.gmra.mrb[196].mxu1 %v10178_v58  ;;  %8907 = vmatprep.subr.bf16.mxu0 %v9319_v47 }
 0x214   : > { %8873 = vmatprep.mubr.bf16.mxu1 %v10186_v26  ;;  %8950 = vmatpush3.bf16.msra.mxu1 %v9314_v27  ;;  %v2557_v27 = vpop.f32.mrb[95].mxu1  ;;  %v10785_v26 = vld [vmem:[%s9682_s29 + $0xe8] sm:$0xff]  }
 0x215   : > { %8951 = vmatprep.subr.bf16.mxu1 %v9316_v17  ;;  %v10721_v37 = vadd.f32 %v2557_v27, %v2331_v22  ;;  %v8579_v13 = vpop.f32.mrb[96].mxu1  ;;  %v9325_v27 = vld [vmem:[#allocation5 + $0x178] sm:$0xff]   ;;  %v8535_v23 = vpop.f32.mrb[100].mxu0 }
 0x216   : > { %v2995_v42 = vpop.f32.mrb[97].mxu1  ;;  %8908 = vmatpush3.bf16.msra.mxu0 %v9319_v47  ;;  %v10741_v47 = vld [vmem:[%s9682_s29 + $0xd0] sm:$0xff]  }
 0x217   : > { %v8580_v8 = vpop.f32.mrb[98].mxu1  ;;  %v10730_v22 = vadd.f32 %v2995_v42, %v2837_v31  ;;  %v2726_v42 = vpop.f32.mrb[101].mxu0 }
 0x218   : > { %8952 = vmatpush3.bf16.msra.mxu1 %v9316_v17  ;;  %v9321_v17 = vld [vmem:[#allocation5 + $0x170] sm:$0xff]   ;;  %v2841_v8 = vadd.f32 %v2726_v42, %v10593_v39 }
 0x219   : > { %8953 = vmatprep.subr.bf16.mxu1 %v9318_v15  ;;  %8909 = vmatprep.subr.bf16.mxu0 %v9321_v17  ;;  %v10767_v42 = vld [vmem:[%s9682_s29 + $0xe0] sm:$0xff]  }
 0x21a   : > { %8830 = vmatmul.mubr.bf16.gmra.mrb[204].mxu0 %v10734_v33 }
 0x21b   : > { %8874 = vmatmul.mubr.bf16.gmra.mrb[200].mxu1 %v11481_v63  ;;  %8833 = vmatprep.mubr.bf16.mxu0 %v10741_v47 }
 0x21c   : > { %8877 = vmatprep.mubr.bf16.mxu1 %v11482_v32  ;;  %8954 = vmatpush3.bf16.msra.mxu1 %v9318_v15  ;;  %v2998_v15 = vpop.f32.mrb[99].mxu1 }
 0x21d   : > { %8955 = vmatprep.subr.bf16.mxu1 %v9320_v40  ;;  %v10737_v13 = vadd.f32 %v2998_v15, %v2838_v10  ;;  %8910 = vmatpush3.bf16.msra.mxu0 %v9321_v17  ;;  %v8583_v31 = vpop.f32.mrb[100].mxu1  ;;  %v8536_v10 = vpop.f32.mrb[102].mxu0  ;;  %v7582_v15 = vld [vmem:[%s9682_s29 + $0x104] sm:$0xf] }
 0x21e   : > { %8911 = vmatprep.subr.bf16.mxu0 %v9325_v27  ;;  %v3011_v0 = vpop.f32.mrb[101].mxu1  ;;  %v10756_v31 = vld [vmem:[%s9682_s29 + $0xd8] sm:$0xff]   ;;  %v10761_v39 = vcombine.low %v10273_v52, %v7582_v15 }
 0x21f   : > { %v10751_v17 = vadd.f32 %v3011_v0, %v2841_v8 }
 0x220   : > { %8956 = vmatpush3.bf16.msra.mxu1 %v9320_v40  ;;  %v10745_v40 = vld [vmem:[#allocation5 + $0x1c0] sm:$0xff]   ;;  %v5377_v15 = vshll.u32 %v10761_v39, 16 }
 0x221   : > { %8957 = vmatprep.subr.bf16.mxu1 %v9322_v38  ;;  %8912 = vmatpush3.bf16.msra.mxu0 %v9325_v27  ;;  %v11484_v27 = vld [vmem:[#allocation18_spill] sm:$0xff] }
 0x222   : > { %8993 = vmatprep.subr.bf16.mxu0 %v10745_v40  ;;  %8834 = vmatmul.mubr.bf16.gmra.mrb[208].mxu0 %v10756_v31 }
 0x223   : > { %8878 = vmatmul.mubr.bf16.gmra.mrb[204].mxu1 %v11483_v21  ;;  %v8584_v21 = vpop.f32.mrb[102].mxu1  ;;  %8837 = vmatprep.mubr.bf16.mxu0 %v10767_v42 }
 0x224   : > { %8881 = vmatprep.mubr.bf16.mxu1 %v10242_v4  ;;  %8958 = vmatpush3.bf16.msra.mxu1 %v9322_v38  ;;  %v2729_v4 = vpop.f32.mrb[103].mxu0  ;;  %v3014_v23 = vpop.f32.mrb[103].mxu1 }
 0x225   : > { %8959 = vmatprep.subr.bf16.mxu1 %v9326_v44  ;;  %v2842_v38 = vadd.f32 %v2729_v4, %v10602_v24  ;;  %v8539_v4 = vpop.f32.mrb[104].mxu0  ;;  %v10772_v24 = vld [vmem:[%s9682_s29 + $0x108] sm:$0xff]  }
 0x226   : > { %v2742_v8 = vpop.f32.mrb[105].mxu0  ;;  %v5381_v4 = vshrl.u32 %v10761_v39, 16  ;;  %v5385_v63 = vshll.u32 %v10772_v24, 16 }
 0x227   : > { %v10763_v21 = vadd.f32 %v3014_v23, %v2842_v38  ;;  %v2845_v52 = vadd.f32 %v2742_v8, %v10615_v51  ;;  %v8540_v10 = vpop.f32.mrb[106].mxu0  ;;  %v10792_v8 = vld [vmem:[%s9682_s29 + $0xf0] sm:$0xff]  }
 0x228   : > { %8960 = vmatpush3.bf16.msra.mxu1 %v9326_v44  ;;  %v8587_v44 = vpop.f32.mrb[104].mxu1  ;;  %v2745_v23 = vpop.f32.mrb[107].mxu0 }
 0x229   : > { %9041 = vmatprep.subr.bf16.mxu1 %v10747_v60  ;;  %v3027_v0 = vpop.f32.mrb[105].mxu1  ;;  %v10782_v44 = vld [vmem:[%s9682_s29 + $0x110] sm:$0xf] }
 0x22a   : > { %v8588_v38 = vpop.f32.mrb[106].mxu1  ;;  %11485 = vst [vmem:[#allocation23_spill] sm:$0xff] %v10782_v44  ;;  %8838 = vmatmul.mubr.bf16.gmra.mrb[212].mxu0 %v10785_v26 }
 0x22b   : > { %8882 = vmatmul.mubr.bf16.gmra.mrb[208].mxu1 %v11484_v27  ;;  %v10776_v27 = vadd.f32 %v3027_v0, %v2845_v52  ;;  %v3030_v32 = vpop.f32.mrb[107].mxu1  ;;  %8841 = vmatprep.mubr.bf16.mxu0 %v10792_v8  ;;  %v10798_v52 = vcombine.low %v10782_v44, %v10782_v44  ;;  %v8543_v0 = vpop.f32.mrb[108].mxu0  ;;  %v5387_v38 = vrot.slane %v5385_v63, 1 }
 0x22c   : > { %8885 = vmatprep.mubr.bf16.mxu1 %v10264_v19  ;;  %v2846_v19 = vadd.f32 %v2745_v23, %v10622_v28  ;;  %v5379_v28 = vrot.slane %v5377_v15, 1  ;;  %v8591_v23 = vpop.f32.mrb[108].mxu1 }
 0x22d   : > { %11486 = vst [vmem:[#allocation24_spill] sm:$0xff] %v10798_v52  ;;  %v5393_v44 = vshll.u32 %v10798_v52, 16 }
 0x22e   : > { %v10788_v51 = vadd.f32 %v3030_v32, %v2846_v19  ;;  %v5383_v10 = vor.u32 %v5381_v4, %v5379_v28  ;;  %v2758_v19 = vpop.f32.mrb[109].mxu0  ;;  %v10803_v15 = vsel %vm890_vm0, %v10307_v62, %v5379_v28 }
 0x22f   : > { %v2849_v32 = vadd.f32 %v2758_v19, %v10635_v18  ;;  %v8544_v58 = vpop.f32.mrb[110].mxu0  ;;  %11487 = vst [vmem:[#allocation25_spill] sm:$0xff] %v10803_v15  ;;  %v10814_v18 = vld [vmem:[%s9682_s29 + $0xf8] sm:$0xff]  }
 0x230   : > { %v2761_v43 = vpop.f32.mrb[111].mxu0  ;;  %v10811_v23 = vsel %vm890_vm0, %v5383_v10, %v5387_v38 }
 0x231   : > { %v2850_v63 = vadd.f32 %v2761_v43, %v10643_v29  ;;  %11488 = vst [vmem:[#allocation26_spill] sm:$0xff] %v10811_v23  ;;  %v8547_v62 = vpop.f32.mrb[112].mxu0 }
 0x232   : > { %8842 = vmatmul.mubr.bf16.gmra.mrb[216].mxu0 %v10814_v18  ;;  %v2774_v29 = vpop.f32.mrb[113].mxu0 }
 0x233   : > { %8886 = vmatmul.mubr.bf16.gmra.mrb[212].mxu1 %v10291_v46  ;;  %v3043_v46 = vpop.f32.mrb[109].mxu1  ;;  %8845 = vmatprep.mubr.bf16.mxu0 %v10761_v39  ;;  %v2853_v28 = vadd.f32 %v2774_v29, %v10674_v30  ;;  %v8548_v19 = vpop.f32.mrb[114].mxu0 }
 0x234   : > { %8889 = vmatprep.mubr.bf16.mxu1 %v10300_v57  ;;  %v8592_v5 = vpop.f32.mrb[110].mxu1  ;;  %v5389_v57 = vshrl.u32 %v10772_v24, 16  ;;  %v10807_v0 = vadd.f32 %v3043_v46, %v2849_v32  ;;  %v5395_v46 = vrot.slane %v5393_v44, 1  ;;  %v2777_v52 = vpop.f32.mrb[115].mxu0 }
 0x235   : > { %v3046_v4 = vpop.f32.mrb[111].mxu1  ;;  %v8551_v30 = vpop.f32.mrb[116].mxu0 }
 0x236   : > { %v10817_v5 = vadd.f32 %v3046_v4, %v2850_v63  ;;  %v10822_v58 = vor.u32 %v5389_v57, %v5387_v38  ;;  %v8595_v43 = vpop.f32.mrb[112].mxu1  ;;  %v2790_v38 = vpop.f32.mrb[117].mxu0 }
 0x237   : > { %v3059_v10 = vpop.f32.mrb[113].mxu1  ;;  %v2857_v62 = vadd.f32 %v2790_v38, %v10683_v2  ;;  %v8552_v43 = vpop.f32.mrb[118].mxu0  ;;  %v9331_v2 = vld [vmem:[#allocation5 + $0x1d0] sm:$0xff]  }
 0x238   : > { %v8596_v32 = vpop.f32.mrb[114].mxu1  ;;  %v5396_v63 = vsel %vm890_vm0, %v10822_v58, %v5395_v46  ;;  %v10827_v4 = vadd.f32 %v3059_v10, %v2853_v28  ;;  %v2793_v28 = vpop.f32.mrb[119].mxu0  ;;  %v9335_v43 = vld [vmem:[#allocation5 + $0x1e0] sm:$0xff]  }
 0x23a   : > { %8846 = vmatmul.mubr.bf16.gmra.mrb[220].mxu0 %v10772_v24 }
 0x23b   : > { %8890 = vmatmul.mubr.bf16.gmra.mrb[216].mxu1 %v10803_v15  ;;  %v2854_v15 = vadd.f32 %v2777_v52, %v10678_v12  ;;  %8913 = vmatprep.mubr.bf16.mxu0 %v10331_v53  ;;  %v2858_v52 = vadd.f32 %v2793_v28, %v10687_v49  ;;  %v9330_v53 = vld [vmem:[#allocation5 + $0x208] sm:$0xff]   ;;  %v9332_v49 = vld [vmem:[#allocation5 + $0x210] sm:$0xff]   ;;  %v9336_v28 = vld [vmem:[#allocation5 + $0x220] sm:$0xff]  }
 0x23c   : > { %8893 = vmatprep.mubr.bf16.mxu1 %v10811_v23  ;;  %v3062_v23 = vpop.f32.mrb[115].mxu1 }
 0x23d   : > { %v10831_v57 = vadd.f32 %v3062_v23, %v2854_v15  ;;  %v8599_v44 = vpop.f32.mrb[116].mxu1  ;;  %v9329_v23 = vld [vmem:[#allocation5 + $0x1c8] sm:$0xff]  }
 0x23e   : > { %v3075_v46 = vpop.f32.mrb[117].mxu1 }
 0x23f   : > { %v8600_v29 = vpop.f32.mrb[118].mxu1  ;;  %v10836_v12 = vadd.f32 %v3075_v46, %v2857_v62  ;;  %v9334_v62 = vld [vmem:[#allocation5 + $0x218] sm:$0xff]  }
 0x240   : > { %v3078_v15 = vpop.f32.mrb[119].mxu1 }
 0x241   : > { %v10840_v10 = vadd.f32 %v3078_v15, %v2858_v52  ;;  %v8603_v19 = vpop.f32.mrb[120].mxu1 }
 0x242   : > { %8914 = vmatmul.mubr.bf16.vlgmr.msra.gmra.mrb[224].mxu0 %v10343_v54  ;;  %v9338_v19 = vld [vmem:[#allocation5 + $0x228] sm:$0xff]  }
 0x243   : > { %8894 = vmatmul.mubr.bf16.gmra.mrb[220].mxu1 %v5396_v63  ;;  %8994 = vmatpush3.bf16.msra.mxu0 %v10745_v40  ;;  %v3091_v63 = vpop.f32.mrb[121].mxu1 }
 0x244   : > { %8961 = vmatprep.mubr.bf16.mxu1 %v10693_v20  ;;  %8917 = vmatprep.mubr.bf16.mxu0 %v10349_v48  ;;  %v8555_v20 = vpop.f32.mrb[120].mxu0 }
 0x245   : > { %8995 = vmatprep.subr.bf16.mxu0 %v9329_v23  ;;  %v2806_v32 = vpop.f32.mrb[121].mxu0 }
 0x246   : > { %v2861_v54 = vadd.f32 %v2806_v32, %v10698_v11  ;;  %v8556_v30 = vpop.f32.mrb[122].mxu0 }
 0x247   : > { %8996 = vmatpush3.bf16.msra.mxu0 %v9329_v23  ;;  %v2809_v40 = vpop.f32.mrb[123].mxu0  ;;  %v10870_v30 = vld [vmem:[%s11431_s2] ss:$0 sm:$0xff] }
 0x248   : > { %8997 = vmatprep.subr.bf16.mxu0 %v9331_v2  ;;  %v2862_v44 = vadd.f32 %v2809_v40, %v10705_v9  ;;  %v8559_v11 = vpop.f32.mrb[124].mxu0 }
 0x249   : > { %v2822_v29 = vpop.f32.mrb[125].mxu0 }
 0x24a   : > { %8918 = vmatmul.mubr.bf16.gmra.mrb[228].mxu0 %v10361_v16  ;;  %v2865_v52 = vadd.f32 %v2822_v29, %v10714_v45  ;;  %v8560_v23 = vpop.f32.mrb[126].mxu0 }
 0x24b   : > { %8962 = vmatmul.mubr.bf16.vlgmr.msra.gmra.mrb[224].mxu1 %v10702_v59  ;;  %v8604_v59 = vpop.f32.mrb[122].mxu1  ;;  %8921 = vmatprep.mubr.bf16.mxu0 %v10369_v36  ;;  %v2825_v20 = vpop.f32.mrb[127].mxu0 }
 0x24c   : > { %9042 = vmatpush3.bf16.msra.mxu1 %v10747_v60  ;;  %8965 = vmatprep.mubr.bf16.mxu1 %v10709_v7  ;;  %v10848_v60 = vadd.f32 %v3091_v63, %v2861_v54  ;;  %v3094_v38 = vpop.f32.mrb[123].mxu1  ;;  %v9333_v7 = vld [vmem:[#allocation5 + $0x1d8] sm:$0xff]   ;;  %v9340_v59 = vld [vmem:[#allocation5 + $0x230] sm:$0xff]  }
 0x24d   : > { %9043 = vmatprep.subr.bf16.mxu1 %v9330_v53  ;;  %v10852_v46 = vadd.f32 %v3094_v38, %v2862_v44  ;;  %8998 = vmatpush3.bf16.msra.mxu0 %v9331_v2  ;;  %v8607_v9 = vpop.f32.mrb[124].mxu1  ;;  %v8627_v45 = vpop.f32.mrb[128].mxu0 }
 0x24e   : > { %8999 = vmatprep.subr.bf16.mxu0 %v9333_v7  ;;  %v3107_v15 = vpop.f32.mrb[125].mxu1  ;;  %v3262_v63 = vpop.f32.mrb[129].mxu0  ;;  %v9344_v9 = vld [vmem:[#allocation5 + $0x238] sm:$0xff]  }
 0x24f   : > { %v8628_v44 = vpop.f32.mrb[130].mxu0 }
 0x250   : > { %9044 = vmatpush3.bf16.msra.mxu1 %v9330_v53  ;;  %v8608_v53 = vpop.f32.mrb[126].mxu1  ;;  %v3265_v38 = vpop.f32.mrb[131].mxu0 }
 0x251   : > { %9045 = vmatprep.subr.bf16.mxu1 %v9332_v49  ;;  %9000 = vmatpush3.bf16.msra.mxu0 %v9333_v7  ;;  %v3110_v2 = vpop.f32.mrb[127].mxu1 }
 0x252   : > { %9001 = vmatprep.subr.bf16.mxu0 %v9335_v43  ;;  %8922 = vmatmul.mubr.bf16.gmra.mrb[232].mxu0 %v10555_v25  ;;  %v8675_v54 = vpop.f32.mrb[128].mxu1 }
 0x253   : > { %8966 = vmatmul.mubr.bf16.gmra.mrb[228].mxu1 %v10718_v34  ;;  %v10858_v34 = vadd.f32 %v3107_v15, %v2865_v52  ;;  %8925 = vmatprep.mubr.bf16.mxu0 %v10568_v1  ;;  %v10873_v40 = vpop.f32.mrb[129].mxu1 }
 0x254   : > { %8969 = vmatprep.mubr.bf16.mxu1 %v10725_v41  ;;  %9046 = vmatpush3.bf16.msra.mxu1 %v9332_v49  ;;  %v2866_v41 = vadd.f32 %v2825_v20, %v10721_v37  ;;  %v9337_v49 = vld [vmem:[#allocation5 + $0x1e8] sm:$0xff]   ;;  %v9339_v37 = vld [vmem:[#allocation5 + $0x1f0] sm:$0xff]  }
 0x255   : > { %9047 = vmatprep.subr.bf16.mxu1 %v9334_v62  ;;  %9002 = vmatpush3.bf16.msra.mxu0 %v9335_v43  ;;  %v9343_v43 = vld [vmem:[#allocation5 + $0x1f8] sm:$0xff]   ;;  %v8631_v52 = vpop.f32.mrb[132].mxu0 }
 0x256   : > { %v10862_v32 = vadd.f32 %v3110_v2, %v2866_v41  ;;  %9003 = vmatprep.subr.bf16.mxu0 %v9337_v49  ;;  %v3278_v23 = vpop.f32.mrb[133].mxu0 }
 0x257   : > { %v8632_v2 = vpop.f32.mrb[134].mxu0 }
 0x258   : > { %9048 = vmatpush3.bf16.msra.mxu1 %v9334_v62  ;;  %v3390_v62 = vadd.f32 %v3265_v38, %v10737_v13 }
 0x259   : > { %9049 = vmatprep.subr.bf16.mxu1 %v9336_v28  ;;  %9004 = vmatpush3.bf16.msra.mxu0 %v9337_v49  ;;  %v3281_v49 = vpop.f32.mrb[135].mxu0 }
 0x25a   : > { %9005 = vmatprep.subr.bf16.mxu0 %v9339_v37  ;;  %8926 = vmatmul.mubr.bf16.gmra.mrb[236].mxu0 %v10591_v3  ;;  %v3429_v29 = vadd.f32 %v10870_v30, %v3390_v62 }
 0x25b   : > { %8970 = vmatmul.mubr.bf16.gmra.mrb[232].mxu1 %v10734_v33  ;;  %v3389_v33 = vadd.f32 %v3262_v63, %v10730_v22  ;;  %8929 = vmatprep.mubr.bf16.mxu0 %v10597_v55 }
 0x25c   : > { %8973 = vmatprep.mubr.bf16.mxu1 %v10741_v47  ;;  %9050 = vmatpush3.bf16.msra.mxu1 %v9336_v28  ;;  %v8676_v47 = vpop.f32.mrb[130].mxu1  ;;  %v3461_v28 = vmax.f32 %v3429_v29, 0.0 }
 0x25d   : > { %9051 = vmatprep.subr.bf16.mxu1 %v9338_v19  ;;  %v3428_v7 = vadd.f32 %v10870_v30, %v3389_v33  ;;  %v10877_v11 = vpop.f32.mrb[131].mxu1  ;;  %9006 = vmatpush3.bf16.msra.mxu0 %v9339_v37  ;;  %v3394_v33 = vadd.f32 %v3281_v49, %v10763_v21 }
 0x25e   : > { %9007 = vmatprep.subr.bf16.mxu0 %v9343_v43  ;;  %v8679_v15 = vpop.f32.mrb[132].mxu1  ;;  %v7762_v20 = vpack.c.bf16 %v3461_v28, %v3461_v28 }
 0x25f   : > { %v3460_v22 = vmax.f32 %v3428_v7, 0.0  ;;  %v10885_v41 = vpop.f32.mrb[133].mxu1 }
 0x260   : > { %9052 = vmatpush3.bf16.msra.mxu1 %v9338_v19  ;;  %v3696_v37 = vshrl.u32 %v7762_v20, 16  ;;  %v3699_v38 = vshll.u32 %v7762_v20, 16 }
 0x261   : > { %9053 = vmatprep.subr.bf16.mxu1 %v9340_v59  ;;  %v7761_v13 = vpack.c.bf16 %v3460_v22, %v3460_v22  ;;  %9008 = vmatpush3.bf16.msra.mxu0 %v9343_v43  ;;  %v3433_v43 = vadd.f32 %v10870_v30, %v3394_v33 }
 0x262   : > { %8930 = vmatmul.mubr.bf16.gmra.mrb[240].mxu0 %v10613_v14  ;;  %v3698_v47 = vrot.slane %v3696_v37, 7 }
 0x263   : > { %8974 = vmatmul.mubr.bf16.gmra.mrb[236].mxu1 %v10756_v31  ;;  %v3688_v53 = vshrl.u32 %v7761_v13, 16  ;;  %v3393_v31 = vadd.f32 %v3278_v23, %v10751_v17  ;;  %v3691_v45 = vshll.u32 %v7761_v13, 16  ;;  %v7509_v17 = vld [vmem:[%s10396_s18 + $0x10] sm:$0xf]  ;;  %8933 = vmatprep.mubr.bf16.mxu0 %v10619_v35  ;;  %v8635_v13 = vpop.f32.mrb[136].mxu0  ;;  %v3465_v28 = vmax.f32 %v3433_v43, 0.0 }
 0x264   : > { %8977 = vmatprep.mubr.bf16.mxu1 %v10767_v42  ;;  %9054 = vmatpush3.bf16.msra.mxu1 %v9340_v59  ;;  %v8680_v42 = vpop.f32.mrb[134].mxu1  ;;  %v3703_v22 = vrot.slane %v3698_v47, 4  ;;  %v10927_v43 = vrot.slane %v10772_v24, 1 }
 0x265   : > { %9055 = vmatprep.subr.bf16.mxu1 %v9344_v9  ;;  %v3690_v19 = vrot.slane %v3688_v53, 7  ;;  %v3432_v54 = vadd.f32 %v10870_v30, %v3393_v31  ;;  %v10888_v63 = vpop.f32.mrb[135].mxu1  ;;  %v7764_v31 = vpack.c.bf16 %v3465_v28, %v3465_v28 }
 0x266   : > { %v8683_v52 = vpop.f32.mrb[136].mxu1 }
 0x267   : > { %v3693_v44 = vor.u32 %v3691_v45, %v3690_v19  ;;  %v3464_v7 = vmax.f32 %v3432_v54, 0.0  ;;  %v3694_v62 = vrot.slane %v3690_v19, 4  ;;  %v10910_v53 = vpop.f32.mrb[137].mxu1  ;;  %v3730_v33 = vshrl.u32 %v7764_v31, 16 }
 0x268   : > { %9056 = vmatpush3.bf16.msra.mxu1 %v9344_v9  ;;  %v3701_v9 = vor.u32 %v3699_v38, %v3698_v47  ;;  %v8684_v42 = vpop.f32.mrb[138].mxu1 }
 0x269   : > { %v3996_v21 = vsel %vm10891_vm7, %v3693_v44, %v7509_v17  ;;  %v7763_v29 = vpack.c.bf16 %v3464_v7, %v3464_v7  ;;  %v10916_v54 = vpop.f32.mrb[139].mxu1  ;;  %v7514_v17 = vld [vmem:[%s10396_s18 + $0x20] sm:$0xf]  ;;  %v3733_v7 = vshll.u32 %v7764_v31, 16  ;;  %v11491_v31 = vld [vmem:[#allocation22_spill] sm:$0xff] }
 0x26a   : > { %7510 = vst [vmem:[%s10396_s18 + $0x10] sm:$0xf] %v3996_v21  ;;  %v3702_v15 = vsel %vm10649_vm4, %v3694_v62, %v3701_v9  ;;  %8934 = vmatmul.mubr.bf16.gmra.mrb[244].mxu0 %v10633_v61  ;;  %v7586_v21 = vld [vmem:[%s9682_s29 + $0x114] sm:$0xf] }
 0x26b   : > { %8978 = vmatmul.mubr.bf16.gmra.mrb[240].mxu1 %v10785_v26  ;;  %v3294_v26 = vpop.f32.mrb[137].mxu0  ;;  %v3722_v23 = vshrl.u32 %v7763_v29, 16  ;;  %7511 = vst [vmem:[%s10396_s18 + $0x14] sm:$0xf] %v3702_v15  ;;  %v3725_v45 = vshll.u32 %v7763_v29, 16  ;;  %8937 = vmatprep.mubr.bf16.mxu0 %v10640_v50  ;;  %v11492_v42 = vld [vmem:[#allocation23_spill] sm:$0xff] }
 0x26c   : > { %8981 = vmatprep.mubr.bf16.mxu1 %v10792_v8  ;;  %v3711_v8 = vsel %vm10649_vm4, %v3703_v22, %v10609_v6  ;;  %v8636_v20 = vpop.f32.mrb[138].mxu0  ;;  %v3397_v2 = vadd.f32 %v3294_v26, %v10776_v27  ;;  %v5657_v27 = vrot.slane %v10761_v39, 1  ;;  %v8687_v26 = vpop.f32.mrb[140].mxu1 }
 0x26d   : > { %7512 = vst [vmem:[%s10396_s18 + $0x18] sm:$0xf] %v3711_v8  ;;  %v3297_v49 = vpop.f32.mrb[139].mxu0  ;;  %v3724_v19 = vrot.slane %v3722_v23, 7  ;;  %v10934_v23 = vpop.f32.mrb[141].mxu1 }
 0x26e   : > { %v3398_v37 = vadd.f32 %v3297_v49, %v10788_v51  ;;  %v3436_v44 = vadd.f32 %v10870_v30, %v3397_v2  ;;  %v3732_v51 = vrot.slane %v3730_v33, 7  ;;  %v8639_v29 = vpop.f32.mrb[140].mxu0  ;;  %v10938_v2 = vsel %vm1490_vm1, %v11491_v31, %v5657_v27 }
 0x26f   : > { %v3727_v47 = vor.u32 %v3725_v45, %v3724_v19  ;;  %v3728_v13 = vrot.slane %v3724_v19, 4  ;;  %v3310_v15 = vpop.f32.mrb[141].mxu0  ;;  %v10941_v49 = vcombine.low %v11492_v42, %v7586_v21  ;;  %v10950_v33 = vsel %vm1490_vm1, %v5657_v27, %v10927_v43  ;;  %v11493_v21 = vld [vmem:[#allocation24_spill] sm:$0xff] }
 0x270   : > { %v3437_v38 = vadd.f32 %v10870_v30, %v3398_v37  ;;  %v3468_v62 = vmax.f32 %v3436_v44, 0.0  ;;  %v3737_v28 = vrot.slane %v3732_v51, 4  ;;  %v8640_v20 = vpop.f32.mrb[142].mxu0 }
 0x271   : > { %v4002_v9 = vsel %vm10891_vm7, %v3727_v47, %v7514_v17  ;;  %v3313_v17 = vpop.f32.mrb[143].mxu0 }
 0x272   : > { %v3469_v22 = vmax.f32 %v3437_v38, 0.0  ;;  %7515 = vst [vmem:[%s10396_s18 + $0x20] sm:$0xf] %v4002_v9  ;;  %v7765_v52 = vpack.c.bf16 %v3468_v62, %v3468_v62  ;;  %v3745_v45 = vsel %vm10649_vm4, %v3737_v28, %v10609_v6  ;;  %v3402_v38 = vadd.f32 %v3313_v17, %v10817_v5  ;;  %8938 = vmatmul.mubr.bf16.gmra.mrb[248].mxu0 %v10938_v2 }
 0x273   : > { %8982 = vmatmul.mubr.bf16.gmra.mrb[244].mxu1 %v10814_v18  ;;  %v3735_v18 = vor.u32 %v3733_v7, %v3732_v51  ;;  %7517 = vst [vmem:[%s10396_s18 + $0x28] sm:$0xf] %v3745_v45  ;;  %v5661_v9 = vrot.slane %v11493_v21, 1  ;;  %8941 = vmatprep.mubr.bf16.mxu0 %v10950_v33 }
 0x274   : > { %8985 = vmatprep.mubr.bf16.mxu1 %v10761_v39  ;;  %v7766_v8 = vpack.c.bf16 %v3469_v22, %v3469_v22  ;;  %v3401_v39 = vadd.f32 %v3310_v15, %v10807_v0  ;;  %v3756_v37 = vshrl.u32 %v7765_v52, 16  ;;  %v8688_v0 = vpop.f32.mrb[142].mxu1  ;;  %v3759_v62 = vshll.u32 %v7765_v52, 16  ;;  %v7519_v22 = vld [vmem:[%s10396_s18 + $0x30] sm:$0xf] }
 0x275   : > { %v3736_v19 = vsel %vm10649_vm4, %v3728_v13, %v3735_v18  ;;  %v10956_v51 = vpop.f32.mrb[143].mxu1  ;;  %v3441_v18 = vadd.f32 %v10870_v30, %v3402_v38  ;;  %v5662_v17 = vsel %vm1490_vm1, %v10927_v43, %v5661_v9 }
 0x276   : > { %7516 = vst [vmem:[%s10396_s18 + $0x24] sm:$0xf] %v3736_v19  ;;  %v3764_v44 = vshrl.u32 %v7766_v8, 16  ;;  %v3440_v47 = vadd.f32 %v10870_v30, %v3401_v39  ;;  %v3758_v7 = vrot.slane %v3756_v37, 7  ;;  %v3767_v13 = vshll.u32 %v7766_v8, 16  ;;  %v8643_v8 = vpop.f32.mrb[144].mxu0 }
 0x277   : > { %v3473_v39 = vmax.f32 %v3441_v18, 0.0  ;;  %v8691_v31 = vpop.f32.mrb[144].mxu1  ;;  %v3326_v42 = vpop.f32.mrb[145].mxu0 }
 0x278   : > { %v3766_v29 = vrot.slane %v3764_v44, 7  ;;  %v3472_v27 = vmax.f32 %v3440_v47, 0.0  ;;  %v3761_v5 = vor.u32 %v3759_v62, %v3758_v7  ;;  %v3762_v28 = vrot.slane %v3758_v7, 4  ;;  %v10973_v37 = vpop.f32.mrb[145].mxu1  ;;  %v8644_v0 = vpop.f32.mrb[146].mxu0  ;;  %v10978_v44 = vld [vmem:[%s9682_s29 + $0x118] sm:$0xff]  }
 0x279   : > { %v7768_v47 = vpack.c.bf16 %v3473_v39, %v3473_v39  ;;  %v3405_v38 = vadd.f32 %v3326_v42, %v10827_v4  ;;  %v8692_v7 = vpop.f32.mrb[146].mxu1  ;;  %v3329_v62 = vpop.f32.mrb[147].mxu0  ;;  %v11494_v4 = vld [vmem:[#allocation11_spill] sm:$0xff] }
 0x27a   : > { %v3769_v52 = vor.u32 %v3767_v13, %v3766_v29  ;;  %v3771_v26 = vrot.slane %v3766_v29, 4  ;;  %v7767_v15 = vpack.c.bf16 %v3472_v27, %v3472_v27  ;;  %v4008_v20 = vsel %vm10891_vm7, %v3761_v5, %v7519_v22  ;;  %v10984_v13 = vpop.f32.mrb[147].mxu1  ;;  %v7524_v27 = vld [vmem:[%s10396_s18 + $0x40] sm:$0xf]  ;;  %8942 = vmatmul.mubr.bf16.gmra.mrb[252].mxu0 %v5662_v17  ;;  %v8647_v8 = vpop.f32.mrb[148].mxu0 }
 0x27b   : > { %8986 = vmatmul.mubr.bf16.gmra.mrb[248].mxu1 %v10772_v24  ;;  %7520 = vst [vmem:[%s10396_s18 + $0x30] sm:$0xf] %v4008_v20  ;;  %v3406_v29 = vadd.f32 %v3329_v62, %v10831_v57  ;;  %v3798_v18 = vshrl.u32 %v7768_v47, 16  ;;  %v3444_v9 = vadd.f32 %v10870_v30, %v3405_v38  ;;  %9009 = vmatprep.mubr.bf16.mxu0 %v11494_v4  ;;  %v7529_v4 = vld [vmem:[%s10396_s18 + $0x50] sm:$0xf] }
 0x27c   : > { %8989 = vmatprep.mubr.bf16.mxu1 %v10941_v49  ;;  %v3770_v24 = vsel %vm10649_vm4, %v3762_v28, %v3769_v52  ;;  %v3779_v19 = vsel %vm10649_vm4, %v3771_v26, %v10609_v6  ;;  %v3790_v45 = vshrl.u32 %v7767_v15, 16  ;;  %v3793_v22 = vshll.u32 %v7767_v15, 16 }
 0x27d   : > { %7521 = vst [vmem:[%s10396_s18 + $0x34] sm:$0xf] %v3770_v24  ;;  %7522 = vst [vmem:[%s10396_s18 + $0x38] sm:$0xf] %v3779_v19  ;;  %v3445_v28 = vadd.f32 %v10870_v30, %v3406_v29  ;;  %v3800_v52 = vrot.slane %v3798_v18, 7  ;;  %v3801_v26 = vshll.u32 %v7768_v47, 16 }
 0x27e   : > { %v3792_v21 = vrot.slane %v3790_v45, 7  ;;  %v3476_v15 = vmax.f32 %v3444_v9, 0.0  ;;  %v8695_v19 = vpop.f32.mrb[148].mxu1  ;;  %v3342_v45 = vpop.f32.mrb[149].mxu0 }
 0x27f   : > { %v3477_v39 = vmax.f32 %v3445_v28, 0.0  ;;  %v3803_v31 = vor.u32 %v3801_v26, %v3800_v52  ;;  %v3805_v42 = vrot.slane %v3800_v52, 4  ;;  %v3409_v17 = vadd.f32 %v3342_v45, %v10836_v12  ;;  %v10996_v47 = vpop.f32.mrb[149].mxu1  ;;  %v11495_v28 = vld [vmem:[#allocation12_spill] sm:$0xff] }
 0x280   : > { %v3795_v5 = vor.u32 %v3793_v22, %v3792_v21  ;;  %v3796_v20 = vrot.slane %v3792_v21, 4  ;;  %v7769_v24 = vpack.c.bf16 %v3476_v15, %v3476_v15  ;;  %v8696_v21 = vpop.f32.mrb[150].mxu1 }
 0x281   : > { %v7770_v0 = vpack.c.bf16 %v3477_v39, %v3477_v39  ;;  %v3813_v7 = vsel %vm10649_vm4, %v3805_v42, %v10609_v6  ;;  %v11007_v18 = vpop.f32.mrb[151].mxu1  ;;  %v11496_v39 = vld [vmem:[#allocation13_spill] sm:$0xff] }
 0x282   : > { %v4014_v57 = vsel %vm10891_vm7, %v3795_v5, %v7524_v27  ;;  %v3804_v38 = vsel %vm10649_vm4, %v3796_v20, %v3803_v31  ;;  %v3824_v62 = vshrl.u32 %v7769_v24, 16  ;;  %7527 = vst [vmem:[%s10396_s18 + $0x48] sm:$0xf] %v3813_v7  ;;  %v3448_v27 = vadd.f32 %v10870_v30, %v3409_v17  ;;  %9010 = vmatmul.mubr.bf16.vlgmr.msra.gmra.mrb[0].mxu0 %v11495_v28  ;;  %v7534_v28 = vld [vmem:[%s10396_s18 + $0x60] sm:$0xf] }
 0x283   : > { %8990 = vmatmul.mubr.bf16.gmra.mrb[252].mxu1 %v10978_v44  ;;  %7525 = vst [vmem:[%s10396_s18 + $0x40] sm:$0xf] %v4014_v57  ;;  %7526 = vst [vmem:[%s10396_s18 + $0x44] sm:$0xf] %v3804_v38  ;;  %v3832_v29 = vshrl.u32 %v7770_v0, 16  ;;  %v3827_v5 = vshll.u32 %v7769_v24, 16  ;;  %9013 = vmatprep.mubr.bf16.mxu0 %v11496_v39 }
 0x284   : > { %9057 = vmatprep.mubr.bf16.mxu1 %v10349_v48  ;;  %v8648_v48 = vpop.f32.mrb[150].mxu0  ;;  %v3826_v9 = vrot.slane %v3824_v62, 7  ;;  %v3835_v26 = vshll.u32 %v7770_v0, 16  ;;  %v3480_v15 = vmax.f32 %v3448_v27, 0.0  ;;  %v8699_v0 = vpop.f32.mrb[152].mxu1 }
 0x285   : > { %v3345_v22 = vpop.f32.mrb[151].mxu0  ;;  %v3834_v52 = vrot.slane %v3832_v29, 7  ;;  %v11023_v38 = vpop.f32.mrb[153].mxu1 }
 0x286   : > { %v3410_v12 = vadd.f32 %v3345_v22, %v10840_v10  ;;  %v3829_v8 = vor.u32 %v3827_v5, %v3826_v9  ;;  %v3830_v20 = vrot.slane %v3826_v9, 4  ;;  %v7771_v42 = vpack.c.bf16 %v3480_v15, %v3480_v15  ;;  %v8651_v19 = vpop.f32.mrb[152].mxu0  ;;  %v8700_v22 = vpop.f32.mrb[154].mxu1 }
 0x287   : > { %v3837_v10 = vor.u32 %v3835_v26, %v3834_v52  ;;  %v3839_v31 = vrot.slane %v3834_v52, 4  ;;  %v3358_v17 = vpop.f32.mrb[153].mxu0  ;;  %v11029_v5 = vpop.f32.mrb[155].mxu1  ;;  %v11497_v26 = vld [vmem:[#allocation14_spill] sm:$0xff] }
 0x288   : > { %v3449_v57 = vadd.f32 %v10870_v30, %v3410_v12  ;;  %v4020_v45 = vsel %vm10891_vm7, %v3829_v8, %v7529_v4  ;;  %v3858_v48 = vshrl.u32 %v7771_v42, 16  ;;  %v8652_v7 = vpop.f32.mrb[154].mxu0  ;;  %v3413_v21 = vadd.f32 %v3358_v17, %v10848_v60  ;;  %v11498_v60 = vld [vmem:[#allocation15_spill] sm:$0xff] }
 0x289   : > { %7530 = vst [vmem:[%s10396_s18 + $0x50] sm:$0xf] %v4020_v45  ;;  %v3361_v29 = vpop.f32.mrb[155].mxu0  ;;  %v3861_v12 = vshll.u32 %v7771_v42, 16 }
 0x28a   : > { %v3481_v24 = vmax.f32 %v3449_v57, 0.0  ;;  %v3860_v27 = vrot.slane %v3858_v48, 7  ;;  %v3414_v9 = vadd.f32 %v3361_v29, %v10852_v46  ;;  %v3452_v52 = vadd.f32 %v10870_v30, %v3413_v21  ;;  %9014 = vmatmul.mubr.bf16.gmra.mrb[4].mxu0 %v11497_v26 }
 0x28b   : > { %9058 = vmatmul.mubr.bf16.vlgmr.msra.gmra.mrb[0].mxu1 %v10361_v16  ;;  %v3838_v16 = vsel %vm10649_vm4, %v3830_v20, %v3837_v10  ;;  %9017 = vmatprep.mubr.bf16.mxu0 %v11498_v60 }
 0x28c   : > { %9061 = vmatprep.mubr.bf16.mxu1 %v10369_v36  ;;  %v3847_v36 = vsel %vm10649_vm4, %v3839_v31, %v10609_v6  ;;  %7531 = vst [vmem:[%s10396_s18 + $0x54] sm:$0xf] %v3838_v16  ;;  %v7772_v62 = vpack.c.bf16 %v3481_v24, %v3481_v24  ;;  %v3863_v15 = vor.u32 %v3861_v12, %v3860_v27  ;;  %v3484_v20 = vmax.f32 %v3452_v52, 0.0  ;;  %v8655_v31 = vpop.f32.mrb[156].mxu0  ;;  %v7539_v52 = vld [vmem:[%s10396_s18 + $0x70] sm:$0xf] }
 0x28d   : > { %7532 = vst [vmem:[%s10396_s18 + $0x58] sm:$0xf] %v3847_v36  ;;  %v3453_v57 = vadd.f32 %v10870_v30, %v3414_v9  ;;  %v3864_v42 = vrot.slane %v3860_v27, 4  ;;  %v3374_v0 = vpop.f32.mrb[157].mxu0 }
 0x28e   : > { %v3866_v4 = vshrl.u32 %v7772_v62, 16  ;;  %v3869_v8 = vshll.u32 %v7772_v62, 16  ;;  %v4026_v46 = vsel %vm10891_vm7, %v3863_v15, %v7534_v28  ;;  %v7773_v45 = vpack.c.bf16 %v3484_v20, %v3484_v20 }
 0x28f   : > { %v3485_v10 = vmax.f32 %v3453_v57, 0.0  ;;  %7535 = vst [vmem:[%s10396_s18 + $0x60] sm:$0xf] %v4026_v46  ;;  %v3417_v16 = vadd.f32 %v3374_v0, %v10858_v34 }
 0x290   : > { %v3868_v39 = vrot.slane %v3866_v4, 7  ;;  %v3892_v62 = vshrl.u32 %v7773_v45, 16  ;;  %v3895_v28 = vshll.u32 %v7773_v45, 16  ;;  %v11499_v4 = vld [vmem:[#allocation16_spill] sm:$0xff] }
 0x291   : > { %v7774_v17 = vpack.c.bf16 %v3485_v10, %v3485_v10  ;;  %v3456_v27 = vadd.f32 %v10870_v30, %v3417_v16 }
 0x292   : > { %v3871_v24 = vor.u32 %v3869_v8, %v3868_v39  ;;  %v3873_v19 = vrot.slane %v3868_v39, 4  ;;  %v3894_v9 = vrot.slane %v3892_v62, 7  ;;  %9018 = vmatmul.mubr.bf16.gmra.mrb[8].mxu0 %v11499_v4  ;;  %v11500_v39 = vld [vmem:[#allocation17_spill] sm:$0xff] }
 0x293   : > { %9062 = vmatmul.mubr.bf16.gmra.mrb[4].mxu1 %v10555_v25  ;;  %v8703_v25 = vpop.f32.mrb[156].mxu1  ;;  %v3900_v29 = vshrl.u32 %v7774_v17, 16  ;;  %v3903_v15 = vshll.u32 %v7774_v17, 16  ;;  %v3488_v57 = vmax.f32 %v3456_v27, 0.0  ;;  %9021 = vmatprep.mubr.bf16.mxu0 %v11500_v39 }
 0x294   : > { %9065 = vmatprep.mubr.bf16.mxu1 %v10568_v1  ;;  %v11042_v36 = vpop.f32.mrb[157].mxu1  ;;  %v8656_v1 = vpop.f32.mrb[158].mxu0  ;;  %v3872_v48 = vsel %vm10649_vm4, %v3864_v42, %v3871_v24  ;;  %v3881_v7 = vsel %vm10649_vm4, %v3873_v19, %v10609_v6  ;;  %v3897_v8 = vor.u32 %v3895_v28, %v3894_v9  ;;  %v3898_v20 = vrot.slane %v3894_v9, 4  ;;  %v11501_v9 = vld [vmem:[#allocation18_spill] sm:$0xff] }
 0x295   : > { %v8704_v21 = vpop.f32.mrb[158].mxu1  ;;  %v3377_v22 = vpop.f32.mrb[159].mxu0  ;;  %7536 = vst [vmem:[%s10396_s18 + $0x64] sm:$0xf] %v3872_v48  ;;  %7537 = vst [vmem:[%s10396_s18 + $0x68] sm:$0xf] %v3881_v7  ;;  %v7775_v10 = vpack.c.bf16 %v3488_v57, %v3488_v57 }
 0x296   : > { %v3418_v34 = vadd.f32 %v3377_v22, %v10862_v32  ;;  %v11053_v12 = vpop.f32.mrb[159].mxu1  ;;  %v3902_v26 = vrot.slane %v3900_v29, 7  ;;  %v8723_v42 = vpop.f32.mrb[160].mxu0  ;;  %v4032_v24 = vsel %vm10891_vm7, %v3897_v8, %v7539_v52  ;;  %v7544_v29 = vld [vmem:[%s10396_s18 + $0x80] sm:$0xf] }
 0x297   : > { %v8771_v19 = vpop.f32.mrb[160].mxu1  ;;  %7540 = vst [vmem:[%s10396_s18 + $0x70] sm:$0xf] %v4032_v24  ;;  %v3926_v45 = vshrl.u32 %v7775_v10, 16  ;;  %v3929_v62 = vshll.u32 %v7775_v10, 16 }
 0x298   : > { %v3457_v60 = vadd.f32 %v10870_v30, %v3418_v34  ;;  %v3905_v32 = vor.u32 %v3903_v15, %v3902_v26  ;;  %v3907_v46 = vrot.slane %v3902_v26, 4  ;;  %v4657_v30 = vpop.f32.mrb[161].mxu0  ;;  %v4931_v25 = vpop.f32.mrb[161].mxu1 }
 0x299   : > { %v8724_v0 = vpop.f32.mrb[162].mxu0  ;;  %v4658_v16 = vadd.f32 %v4657_v30, %v10873_v40  ;;  %v8772_v1 = vpop.f32.mrb[162].mxu1  ;;  %v3928_v7 = vrot.slane %v3926_v45, 7  ;;  %v11502_v40 = vld [vmem:[#allocation19_spill] sm:$0xff] }
 0x29a   : > { %v3489_v31 = vmax.f32 %v3457_v60, 0.0  ;;  %v4660_v48 = vpop.f32.mrb[163].mxu0  ;;  %v4934_v22 = vpop.f32.mrb[163].mxu1  ;;  %9022 = vmatmul.mubr.bf16.gmra.mrb[12].mxu0 %v11501_v9 }
 0x29b   : > { %9066 = vmatmul.mubr.bf16.gmra.mrb[8].mxu1 %v10591_v3  ;;  %v3906_v3 = vsel %vm10649_vm4, %v3898_v20, %v3905_v32  ;;  %v4661_v21 = vadd.f32 %v4660_v48, %v10877_v11  ;;  %v11074_v34 = vadd.f32 %v4931_v25, %v4658_v16  ;;  %v3931_v28 = vor.u32 %v3929_v62, %v3928_v7  ;;  %v8727_v15 = vpop.f32.mrb[164].mxu0  ;;  %v8775_v8 = vpop.f32.mrb[164].mxu1 }
 0x29c   : > { %9069 = vmatprep.mubr.bf16.mxu1 %v10597_v55  ;;  %v3915_v55 = vsel %vm10649_vm4, %v3907_v46, %v10609_v6  ;;  %7541 = vst [vmem:[%s10396_s18 + $0x74] sm:$0xf] %v3906_v3  ;;  %v7776_v17 = vpack.c.bf16 %v3489_v31, %v3489_v31  ;;  %9025 = vmatprep.mubr.bf16.mxu0 %v11502_v40  ;;  %v3932_v57 = vrot.slane %v3928_v7, 4  ;;  %v4673_v20 = vpop.f32.mrb[165].mxu0  ;;  %v4947_v32 = vpop.f32.mrb[165].mxu1  ;;  %v11503_v3 = vld [vmem:[#allocation20_spill] sm:$0xff] }
 0x29d   : > { %7542 = vst [vmem:[%s10396_s18 + $0x78] sm:$0xf] %v3915_v55  ;;  %v11077_v4 = vadd.f32 %v4934_v22, %v4661_v21  ;;  %v4038_v11 = vsel %vm10891_vm7, %v3931_v28, %v7544_v29  ;;  %v8728_v46 = vpop.f32.mrb[166].mxu0  ;;  %v8776_v31 = vpop.f32.mrb[166].mxu1  ;;  %v11504_v55 = vld [vmem:[#allocation21_spill] sm:$0xff]  ;;  %v6194_v25 = vshll.u32 %v10941_v49, 16 }
 0x29e   : > { %v3934_v27 = vshrl.u32 %v7776_v17, 16  ;;  %v3937_v26 = vshll.u32 %v7776_v17, 16  ;;  %7545 = vst [vmem:[%s10396_s18 + $0x80] sm:$0xf] %v4038_v11  ;;  %v4676_v42 = vpop.f32.mrb[167].mxu0  ;;  %v4950_v30 = vpop.f32.mrb[167].mxu1 }
 0x29f   : > { %v4677_v19 = vadd.f32 %v4676_v42, %v10888_v63  ;;  %v8731_v45 = vpop.f32.mrb[168].mxu0  ;;  %v8779_v0 = vpop.f32.mrb[168].mxu1  ;;  %v6198_v62 = vshrl.u32 %v10941_v49, 16  ;;  %v6196_v29 = vrot.slane %v6194_v25, 1  ;;  %v9345_v28 = vld [vmem:[%s9682_s29 + $0x120] ss:$0 sps:$4 sm:$0xff]  }
 0x2a0   : > { %v3936_v52 = vrot.slane %v3934_v27, 7  ;;  %v4689_v17 = vpop.f32.mrb[169].mxu0  ;;  %v4963_v63 = vpop.f32.mrb[169].mxu1  ;;  %v11505_v27 = vld [vmem:[#allocation25_spill] sm:$0xff]  ;;  %v6474_v40 = vrot.slane %v10941_v49, 1 }
 0x2a1   : > { %v4690_v16 = vadd.f32 %v4689_v17, %v10910_v53  ;;  %v8732_v1 = vpop.f32.mrb[170].mxu0  ;;  %v8780_v48 = vpop.f32.mrb[170].mxu1  ;;  %v11506_v53 = vld [vmem:[#allocation26_spill] sm:$0xff] }
 0x2a2   : > { %v3939_v60 = vor.u32 %v3937_v26, %v3936_v52  ;;  %v3941_v39 = vrot.slane %v3936_v52, 4  ;;  %9026 = vmatmul.mubr.bf16.gmra.mrb[16].mxu0 %v11503_v3  ;;  %v4692_v7 = vpop.f32.mrb[171].mxu0  ;;  %v4966_v22 = vpop.f32.mrb[171].mxu1  ;;  %v6200_v52 = vor.u32 %v6198_v62, %v6196_v29 }
 0x2a3   : > { %9070 = vmatmul.mubr.bf16.gmra.mrb[12].mxu1 %v10613_v14  ;;  %v4674_v14 = vadd.f32 %v4673_v20, %v10885_v41  ;;  %v11097_v41 = vadd.f32 %v4950_v30, %v4677_v19  ;;  %9029 = vmatprep.mubr.bf16.mxu0 %v11504_v55  ;;  %v11106_v21 = vadd.f32 %v4963_v63, %v4690_v16  ;;  %v6206_v20 = vshrl.u32 %v10978_v44, 16 }
 0x2a4   : > { %9073 = vmatprep.mubr.bf16.mxu1 %v10619_v35  ;;  %v3940_v10 = vsel %vm10649_vm4, %v3932_v57, %v3939_v60  ;;  %v3949_v35 = vsel %vm10649_vm4, %v3941_v39, %v10609_v6  ;;  %v6478_v19 = vrot.slane %v9345_v28, 1 }
 0x2a5   : > { %7546 = vst [vmem:[%s10396_s18 + $0x84] sm:$0xf] %v3940_v10  ;;  %7547 = vst [vmem:[%s10396_s18 + $0x88] sm:$0xf] %v3949_v35  ;;  %v11093_v24 = vadd.f32 %v4947_v32, %v4674_v14  ;;  %v8735_v11 = vpop.f32.mrb[172].mxu0  ;;  %v6210_v14 = vshll.u32 %v9345_v28, 16 }
 0x2a6   : > { %v8783_v15 = vpop.f32.mrb[172].mxu1  ;;  %v4705_v57 = vpop.f32.mrb[173].mxu0 }
 0x2a7   : > { %v4706_v60 = vadd.f32 %v4705_v57, %v10934_v23  ;;  %v4979_v39 = vpop.f32.mrb[173].mxu1  ;;  %v8736_v8 = vpop.f32.mrb[174].mxu0 }
 0x2a8   : > { %v8784_v49 = vpop.f32.mrb[174].mxu1  ;;  %v4708_v32 = vpop.f32.mrb[175].mxu0 }
 0x2a9   : > { %v11125_v10 = vadd.f32 %v4979_v39, %v4706_v60  ;;  %v4709_v35 = vadd.f32 %v4708_v32, %v10956_v51  ;;  %v4982_v23 = vpop.f32.mrb[175].mxu1 }
 0x2aa   : > { %9030 = vmatmul.mubr.bf16.gmra.mrb[20].mxu0 %v11505_v27 }
 0x2ab   : > { %9074 = vmatmul.mubr.bf16.gmra.mrb[16].mxu1 %v10633_v61  ;;  %v6202_v61 = vshll.u32 %v10978_v44, 16  ;;  %9033 = vmatprep.mubr.bf16.mxu0 %v11506_v53  ;;  %v11129_v42 = vadd.f32 %v4982_v23, %v4709_v35 }
 0x2ac   : > { %9077 = vmatprep.mubr.bf16.mxu1 %v10640_v50  ;;  %v4693_v50 = vadd.f32 %v4692_v7, %v10916_v54  ;;  %v6476_v54 = vrot.slane %v10978_v44, 1  ;;  %v6212_v44 = vrot.slane %v6210_v14, 1 }
 0x2ad   : > { %v6204_v26 = vrot.slane %v6202_v61, 1  ;;  %v8739_v30 = vpop.f32.mrb[176].mxu0 }
 0x2ae   : > { %v11110_v9 = vadd.f32 %v4966_v22, %v4693_v50  ;;  %v6477_v31 = vsel %vm1490_vm1, %v6474_v40, %v6476_v54  ;;  %v4721_v3 = vpop.f32.mrb[177].mxu0  ;;  %v6479_v16 = vsel %vm1490_vm1, %v6476_v54, %v6478_v19 }
 0x2af   : > { %v6205_v46 = vsel %vm890_vm0, %v6200_v52, %v6204_v26  ;;  %v4722_v55 = vadd.f32 %v4721_v3, %v10973_v37  ;;  %v8740_v25 = vpop.f32.mrb[178].mxu0 }
 0x2b0   : > { %v4724_v17 = vpop.f32.mrb[179].mxu0 }
 0x2b1   : > { %v4725_v1 = vadd.f32 %v4724_v17, %v10984_v13 }
 0x2b3   : > { %9078 = vmatmul.mubr.bf16.gmra.mrb[20].mxu1 %v10938_v2  ;;  %v6197_v2 = vsel %vm890_vm0, %v10822_v58, %v6196_v29  ;;  %v6208_v58 = vor.u32 %v6206_v20, %v6204_v26 }
 0x2b4   : > { %9081 = vmatprep.mubr.bf16.mxu1 %v10950_v33  ;;  %v6475_v33 = vsel %vm1490_vm1, %v10927_v43, %v6474_v40  ;;  %9034 = vmatmul.mubr.bf16.gmra.mrb[24].mxu0 %v6197_v2  ;;  %v8787_v43 = vpop.f32.mrb[176].mxu1 }
 0x2b5   : > { %9037 = vmatprep.mubr.bf16.mxu0 %v6205_v46  ;;  %v4995_v45 = vpop.f32.mrb[177].mxu1  ;;  %v6213_v51 = vsel %vm890_vm0, %v6208_v58, %v6212_v44  ;;  %v8743_v62 = vpop.f32.mrb[180].mxu0 }
 0x2b6   : > { %v8788_v0 = vpop.f32.mrb[178].mxu1  ;;  %v11134_v63 = vadd.f32 %v4995_v45, %v4722_v55  ;;  %v4737_v37 = vpop.f32.mrb[181].mxu0 }
 0x2b7   : > { %v4998_v48 = vpop.f32.mrb[179].mxu1  ;;  %v4738_v50 = vadd.f32 %v4737_v37, %v10996_v47  ;;  %v8744_v29 = vpop.f32.mrb[182].mxu0 }
 0x2b8   : > { %v11137_v7 = vadd.f32 %v4998_v48, %v4725_v1  ;;  %v8791_v61 = vpop.f32.mrb[180].mxu1  ;;  %v4740_v53 = vpop.f32.mrb[183].mxu0 }
 0x2b9   : > { %v5011_v22 = vpop.f32.mrb[181].mxu1  ;;  %v4741_v40 = vadd.f32 %v4740_v53, %v11007_v18 }
 0x2ba   : > { %v8792_v27 = vpop.f32.mrb[182].mxu1  ;;  %v11140_v28 = vadd.f32 %v5011_v22, %v4738_v50 }
 0x2bb   : > { %9082 = vmatmul.mubr.bf16.gmra.mrb[24].mxu1 %v6475_v33  ;;  %v5014_v52 = vpop.f32.mrb[183].mxu1 }
 0x2bc   : > { %9085 = vmatprep.mubr.bf16.mxu1 %v6477_v31  ;;  %9038 = vmatmul.mubr.bf16.gmra.mrb[28].mxu0 %v6213_v51  ;;  %v11143_v13 = vadd.f32 %v5014_v52, %v4741_v40 }
 0x2bd   : > { %v8747_v26 = vpop.f32.mrb[184].mxu0 }
 0x2be   : > { %v4753_v54 = vpop.f32.mrb[185].mxu0 }
 0x2bf   : > { %v4754_v15 = vadd.f32 %v4753_v54, %v11023_v38  ;;  %v8748_v60 = vpop.f32.mrb[186].mxu0 }
 0x2c0   : > { %v4756_v47 = vpop.f32.mrb[187].mxu0 }
 0x2c1   : > { %v4757_v2 = vadd.f32 %v4756_v47, %v11029_v5 }
 0x2c3   : > { %9086 = vmatmul.mubr.bf16.gmra.mrb[28].mxu1 %v6479_v16 }
 0x2c5   : > { %v8751_v18 = vpop.f32.mrb[188].mxu0 }
 0x2c6   : > { %v4769_v32 = vpop.f32.mrb[189].mxu0 }
 0x2c7   : > { %v4770_v33 = vadd.f32 %v4769_v32, %v11042_v36  ;;  %v8752_v35 = vpop.f32.mrb[190].mxu0 }
 0x2c8   : > { %v4772_v38 = vpop.f32.mrb[191].mxu0 }
 0x2c9   : > { %v4773_v58 = vadd.f32 %v4772_v38, %v11053_v12 }
 0x2ce   : > { %v8795_v11 = vpop.f32.mrb[184].mxu1 }
 0x2cf   : > { %v5027_v57 = vpop.f32.mrb[185].mxu1 }
 0x2d0   : > { %v8796_v39 = vpop.f32.mrb[186].mxu1  ;;  %v11146_v8 = vadd.f32 %v5027_v57, %v4754_v15 }
 0x2d1   : > { %v5030_v20 = vpop.f32.mrb[187].mxu1 }
 0x2d2   : > { %v11149_v14 = vadd.f32 %v5030_v20, %v4757_v2 }
 0x2d3   : > { %v8819_v5 = vpop.f32.mrb[192].mxu0 }
 0x2d4   : > { %v5198_v43 = vpop.f32.mrb[193].mxu0 }
 0x2d5   : > { %v5325_v3 = vadd.f32 %v5198_v43, %v11074_v34  ;;  %v8820_v45 = vpop.f32.mrb[194].mxu0 }
 0x2d6   : > { %v8799_v49 = vpop.f32.mrb[188].mxu1  ;;  %v5201_v36 = vpop.f32.mrb[195].mxu0 }
 0x2d7   : > { %v5043_v46 = vpop.f32.mrb[189].mxu1  ;;  %v5326_v0 = vadd.f32 %v5201_v36, %v11077_v4 }
 0x2d8   : > { %v8800_v23 = vpop.f32.mrb[190].mxu1  ;;  %v11152_v31 = vadd.f32 %v5043_v46, %v4770_v33 }
 0x2d9   : > { %v5046_v44 = vpop.f32.mrb[191].mxu1 }
 0x2da   : > { %v11155_v19 = vadd.f32 %v5046_v44, %v4773_v58 }
 0x2dc   : > { %v8823_v12 = vpop.f32.mrb[196].mxu0 }
 0x2dd   : > { %v5214_v48 = vpop.f32.mrb[197].mxu0 }
 0x2de   : > { %v8867_v30 = vpop.f32.mrb[192].mxu1  ;;  %v5329_v62 = vadd.f32 %v5214_v48, %v11093_v24  ;;  %v8824_v37 = vpop.f32.mrb[198].mxu0 }
 0x2df   : > { %v5482_v55 = vpop.f32.mrb[193].mxu1  ;;  %v5217_v34 = vpop.f32.mrb[199].mxu0 }
 0x2e0   : > { %v8868_v25 = vpop.f32.mrb[194].mxu1  ;;  %v11158_v51 = vadd.f32 %v5482_v55, %v5325_v3  ;;  %v5330_v29 = vadd.f32 %v5217_v34, %v11097_v41 }
 0x2e1   : > { %v5485_v17 = vpop.f32.mrb[195].mxu1 }
 0x2e2   : > { %v11161_v16 = vadd.f32 %v5485_v17, %v5326_v0 }
 0x2e4   : > { %v8827_v4 = vpop.f32.mrb[200].mxu0 }
 0x2e5   : > { %v5230_v52 = vpop.f32.mrb[201].mxu0 }
 0x2e6   : > { %v8871_v1 = vpop.f32.mrb[196].mxu1  ;;  %v5333_v26 = vadd.f32 %v5230_v52, %v11106_v21  ;;  %v8828_v54 = vpop.f32.mrb[202].mxu0 }
 0x2e7   : > { %v5498_v61 = vpop.f32.mrb[197].mxu1  ;;  %v5233_v24 = vpop.f32.mrb[203].mxu0 }
 0x2e8   : > { %v8872_v50 = vpop.f32.mrb[198].mxu1  ;;  %v11164_v22 = vadd.f32 %v5498_v61, %v5329_v62  ;;  %v5334_v60 = vadd.f32 %v5233_v24, %v11110_v9 }
 0x2e9   : > { %v5501_v27 = vpop.f32.mrb[199].mxu1 }
 0x2ea   : > { %v11167_v53 = vadd.f32 %v5501_v27, %v5330_v29 }
 0x2ed   : > { %v8831_v41 = vpop.f32.mrb[204].mxu0 }
 0x2ee   : > { %v8875_v40 = vpop.f32.mrb[200].mxu1  ;;  %v5246_v20 = vpop.f32.mrb[205].mxu0 }
 0x2ef   : > { %v5514_v11 = vpop.f32.mrb[201].mxu1  ;;  %v5337_v18 = vadd.f32 %v5246_v20, %v11125_v10  ;;  %v8832_v32 = vpop.f32.mrb[206].mxu0 }
 0x2f0   : > { %v8876_v15 = vpop.f32.mrb[202].mxu1  ;;  %v11170_v57 = vadd.f32 %v5514_v11, %v5333_v26  ;;  %v5249_v21 = vpop.f32.mrb[207].mxu0 }
 0x2f1   : > { %v5517_v39 = vpop.f32.mrb[203].mxu1  ;;  %v5338_v35 = vadd.f32 %v5249_v21, %v11129_v42 }
 0x2f2   : > { %v11173_v47 = vadd.f32 %v5517_v39, %v5334_v60 }
 0x2f5   : > { %v8835_v9 = vpop.f32.mrb[208].mxu0 }
 0x2f6   : > { %v8879_v2 = vpop.f32.mrb[204].mxu1  ;;  %v5262_v44 = vpop.f32.mrb[209].mxu0 }
 0x2f7   : > { %v5530_v49 = vpop.f32.mrb[205].mxu1  ;;  %v5341_v5 = vadd.f32 %v5262_v44, %v11134_v63  ;;  %v8836_v43 = vpop.f32.mrb[210].mxu0 }
 0x2f8   : > { %v8880_v33 = vpop.f32.mrb[206].mxu1  ;;  %v11176_v46 = vadd.f32 %v5530_v49, %v5337_v18  ;;  %v5265_v10 = vpop.f32.mrb[211].mxu0 }
 0x2f9   : > { %v5533_v23 = vpop.f32.mrb[207].mxu1  ;;  %v5342_v45 = vadd.f32 %v5265_v10, %v11137_v7 }
 0x2fa   : > { %v11179_v38 = vadd.f32 %v5533_v23, %v5338_v35 }
 0x2fd   : > { %v8839_v42 = vpop.f32.mrb[212].mxu0 }
 0x2fe   : > { %v8883_v58 = vpop.f32.mrb[208].mxu1  ;;  %v5278_v17 = vpop.f32.mrb[213].mxu0 }
 0x2ff   : > { %v5546_v30 = vpop.f32.mrb[209].mxu1  ;;  %v5345_v12 = vadd.f32 %v5278_v17, %v11140_v28  ;;  %v8840_v48 = vpop.f32.mrb[214].mxu0 }
 0x300   : > { %v8884_v3 = vpop.f32.mrb[210].mxu1  ;;  %v11182_v55 = vadd.f32 %v5546_v30, %v5341_v5  ;;  %v5281_v63 = vpop.f32.mrb[215].mxu0 }
 0x301   : > { %v5549_v25 = vpop.f32.mrb[211].mxu1  ;;  %v5346_v37 = vadd.f32 %v5281_v63, %v11143_v13 }
 0x302   : > { %v11185_v36 = vadd.f32 %v5549_v25, %v5342_v45 }
 0x305   : > { %v8843_v7 = vpop.f32.mrb[216].mxu0 }
 0x306   : > { %v8887_v0 = vpop.f32.mrb[212].mxu1  ;;  %v5294_v27 = vpop.f32.mrb[217].mxu0 }
 0x307   : > { %v5562_v1 = vpop.f32.mrb[213].mxu1  ;;  %v5349_v4 = vadd.f32 %v5294_v27, %v11146_v8  ;;  %v8844_v52 = vpop.f32.mrb[218].mxu0 }
 0x308   : > { %v8888_v62 = vpop.f32.mrb[214].mxu1  ;;  %v11188_v61 = vadd.f32 %v5562_v1, %v5345_v12  ;;  %v5297_v28 = vpop.f32.mrb[219].mxu0 }
 0x309   : > { %v5565_v50 = vpop.f32.mrb[215].mxu1  ;;  %v5350_v54 = vadd.f32 %v5297_v28, %v11149_v14 }
 0x30a   : > { %v11191_v34 = vadd.f32 %v5565_v50, %v5346_v37 }
 0x30d   : > { %v8847_v13 = vpop.f32.mrb[220].mxu0 }
 0x30e   : > { %v8891_v29 = vpop.f32.mrb[216].mxu1  ;;  %v5310_v39 = vpop.f32.mrb[221].mxu0 }
 0x30f   : > { %v5578_v40 = vpop.f32.mrb[217].mxu1  ;;  %v5353_v41 = vadd.f32 %v5310_v39, %v11152_v31  ;;  %v8848_v20 = vpop.f32.mrb[222].mxu0 }
 0x310   : > { %v8892_v26 = vpop.f32.mrb[218].mxu1  ;;  %v11194_v11 = vadd.f32 %v5578_v40, %v5349_v4  ;;  %v5313_v8 = vpop.f32.mrb[223].mxu0 }
 0x311   : > { %v5581_v15 = vpop.f32.mrb[219].mxu1  ;;  %v5354_v32 = vadd.f32 %v5313_v8, %v11155_v19 }
 0x312   : > { %v11197_v24 = vadd.f32 %v5581_v15, %v5350_v54 }
 0x315   : > { %v8915_v14 = vpop.f32.mrb[224].mxu0 }
 0x316   : > { %v8895_v60 = vpop.f32.mrb[220].mxu1  ;;  %v5748_v23 = vpop.f32.mrb[225].mxu0 }
 0x317   : > { %v5594_v2 = vpop.f32.mrb[221].mxu1  ;;  %v5875_v9 = vadd.f32 %v5748_v23, %v11158_v51  ;;  %v8916_v44 = vpop.f32.mrb[226].mxu0 }
 0x318   : > { %v8896_v18 = vpop.f32.mrb[222].mxu1  ;;  %v11200_v49 = vadd.f32 %v5594_v2, %v5353_v41  ;;  %v5751_v31 = vpop.f32.mrb[227].mxu0 }
 0x319   : > { %v5597_v33 = vpop.f32.mrb[223].mxu1  ;;  %v5876_v43 = vadd.f32 %v5751_v31, %v11161_v16 }
 0x31a   : > { %v11203_v21 = vadd.f32 %v5597_v33, %v5354_v32 }
 0x31d   : > { %v8919_v19 = vpop.f32.mrb[228].mxu0 }
 0x31e   : > { %v8963_v35 = vpop.f32.mrb[224].mxu1  ;;  %v5764_v25 = vpop.f32.mrb[229].mxu0 }
 0x31f   : > { %v6015_v58 = vpop.f32.mrb[225].mxu1  ;;  %v5879_v42 = vadd.f32 %v5764_v25, %v11164_v22  ;;  %v8920_v17 = vpop.f32.mrb[230].mxu0 }
 0x320   : > { %v8964_v5 = vpop.f32.mrb[226].mxu1  ;;  %v11206_v30 = vadd.f32 %v6015_v58, %v5875_v9  ;;  %v5767_v51 = vpop.f32.mrb[231].mxu0 }
 0x321   : > { %v6018_v3 = vpop.f32.mrb[227].mxu1  ;;  %v5880_v48 = vadd.f32 %v5767_v51, %v11167_v53 }
 0x322   : > { %v11209_v10 = vadd.f32 %v6018_v3, %v5876_v43 }
 0x325   : > { %v8923_v16 = vpop.f32.mrb[232].mxu0 }
 0x326   : > { %v8967_v45 = vpop.f32.mrb[228].mxu1  ;;  %v5780_v50 = vpop.f32.mrb[233].mxu0 }
 0x327   : > { %v6031_v0 = vpop.f32.mrb[229].mxu1  ;;  %v5883_v7 = vadd.f32 %v5780_v50, %v11170_v57  ;;  %v8924_v27 = vpop.f32.mrb[234].mxu0 }
 0x328   : > { %v8968_v12 = vpop.f32.mrb[230].mxu1  ;;  %v11212_v1 = vadd.f32 %v6031_v0, %v5879_v42  ;;  %v5783_v22 = vpop.f32.mrb[235].mxu0 }
 0x329   : > { %v6034_v62 = vpop.f32.mrb[231].mxu1  ;;  %v5884_v52 = vadd.f32 %v5783_v22, %v11173_v47 }
 0x32a   : > { %v11215_v63 = vadd.f32 %v6034_v62, %v5880_v48 }
 0x32d   : > { %v8927_v53 = vpop.f32.mrb[236].mxu0 }
 0x32e   : > { %v8971_v37 = vpop.f32.mrb[232].mxu1  ;;  %v5796_v15 = vpop.f32.mrb[237].mxu0 }
 0x32f   : > { %v6047_v29 = vpop.f32.mrb[233].mxu1  ;;  %v5887_v13 = vadd.f32 %v5796_v15, %v11176_v46  ;;  %v8928_v39 = vpop.f32.mrb[238].mxu0 }
 0x330   : > { %v8972_v4 = vpop.f32.mrb[234].mxu1  ;;  %v11218_v40 = vadd.f32 %v6047_v29, %v5883_v7  ;;  %v5799_v57 = vpop.f32.mrb[239].mxu0 }
 0x331   : > { %v6050_v26 = vpop.f32.mrb[235].mxu1  ;;  %v5888_v20 = vadd.f32 %v5799_v57, %v11179_v38 }
 0x332   : > { %v11221_v28 = vadd.f32 %v6050_v26, %v5884_v52 }
 0x335   : > { %v8931_v47 = vpop.f32.mrb[240].mxu0 }
 0x336   : > { %v8975_v54 = vpop.f32.mrb[236].mxu1  ;;  %v5812_v33 = vpop.f32.mrb[241].mxu0 }
 0x337   : > { %v6063_v60 = vpop.f32.mrb[237].mxu1  ;;  %v5891_v14 = vadd.f32 %v5812_v33, %v11182_v55  ;;  %v8932_v23 = vpop.f32.mrb[242].mxu0 }
 0x338   : > { %v8976_v41 = vpop.f32.mrb[238].mxu1  ;;  %v11224_v2 = vadd.f32 %v6063_v60, %v5887_v13  ;;  %v5815_v46 = vpop.f32.mrb[243].mxu0 }
 0x339   : > { %v6066_v18 = vpop.f32.mrb[239].mxu1  ;;  %v5892_v44 = vadd.f32 %v5815_v46, %v11185_v36 }
 0x33a   : > { %v11227_v8 = vadd.f32 %v6066_v18, %v5888_v20 }
 0x33d   : > { %v8935_v38 = vpop.f32.mrb[244].mxu0 }
 0x33e   : > { %v8979_v32 = vpop.f32.mrb[240].mxu1  ;;  %v5828_v3 = vpop.f32.mrb[245].mxu0 }
 0x33f   : > { %v6079_v35 = vpop.f32.mrb[241].mxu1  ;;  %v5895_v19 = vadd.f32 %v5828_v3, %v11188_v61  ;;  %v8936_v25 = vpop.f32.mrb[246].mxu0 }
 0x340   : > { %v8980_v9 = vpop.f32.mrb[242].mxu1  ;;  %v11230_v58 = vadd.f32 %v6079_v35, %v5891_v14  ;;  %v5831_v55 = vpop.f32.mrb[247].mxu0 }
 0x341   : > { %v6082_v5 = vpop.f32.mrb[243].mxu1  ;;  %v5896_v17 = vadd.f32 %v5831_v55, %v11191_v34 }
 0x342   : > { %v11233_v31 = vadd.f32 %v6082_v5, %v5892_v44 }
 0x345   : > { %v8939_v36 = vpop.f32.mrb[248].mxu0 }
 0x346   : > { %v8983_v43 = vpop.f32.mrb[244].mxu1  ;;  %v5844_v62 = vpop.f32.mrb[249].mxu0 }
 0x347   : > { %v6095_v45 = vpop.f32.mrb[245].mxu1  ;;  %v5899_v16 = vadd.f32 %v5844_v62, %v11194_v11  ;;  %v8940_v50 = vpop.f32.mrb[250].mxu0 }
 0x348   : > { %v8984_v42 = vpop.f32.mrb[246].mxu1  ;;  %v11236_v0 = vadd.f32 %v6095_v45, %v5895_v19  ;;  %v5847_v61 = vpop.f32.mrb[251].mxu0 }
 0x349   : > { %v6098_v12 = vpop.f32.mrb[247].mxu1  ;;  %v5900_v27 = vadd.f32 %v5847_v61, %v11197_v24 }
 0x34a   : > { %v11239_v51 = vadd.f32 %v6098_v12, %v5896_v17 }
 0x34d   : > { %v8943_v34 = vpop.f32.mrb[252].mxu0 }
 0x34e   : > { %v8987_v48 = vpop.f32.mrb[248].mxu1  ;;  %v5860_v26 = vpop.f32.mrb[253].mxu0 }
 0x34f   : > { %v6111_v37 = vpop.f32.mrb[249].mxu1  ;;  %v5903_v53 = vadd.f32 %v5860_v26, %v11200_v49  ;;  %v8944_v15 = vpop.f32.mrb[254].mxu0  ;;  %v11257_v49 = vld [vmem:[%s11431_s2] ss:$0 sm:$0xff] }
 0x350   : > { %v8988_v7 = vpop.f32.mrb[250].mxu1  ;;  %v11242_v29 = vadd.f32 %v6111_v37, %v5899_v16  ;;  %v5863_v11 = vpop.f32.mrb[255].mxu0 }
 0x351   : > { %v6114_v4 = vpop.f32.mrb[251].mxu1  ;;  %v5904_v39 = vadd.f32 %v5863_v11, %v11203_v21 }
 0x352   : > { %v11245_v22 = vadd.f32 %v6114_v4, %v5900_v27  ;;  %v7718_v27 = vld [vmem:[%s10396_s18 + $0x90] sm:$0xf] }
 0x355   : > { %v9011_v24 = vpop.f32.mrb[0].mxu0 }
 0x356   : > { %v8991_v52 = vpop.f32.mrb[252].mxu1  ;;  %v6299_v18 = vpop.f32.mrb[1].mxu0 }
 0x357   : > { %v6127_v54 = vpop.f32.mrb[253].mxu1  ;;  %v6426_v47 = vadd.f32 %v6299_v18, %v11206_v30  ;;  %v9012_v33 = vpop.f32.mrb[2].mxu0 }
 0x358   : > { %v8992_v13 = vpop.f32.mrb[254].mxu1  ;;  %v11248_v60 = vadd.f32 %v6127_v54, %v5903_v53  ;;  %v6302_v35 = vpop.f32.mrb[3].mxu0 }
 0x359   : > { %v6130_v41 = vpop.f32.mrb[255].mxu1  ;;  %v6427_v21 = vadd.f32 %v6302_v35, %v11209_v10 }
 0x35a   : > { %v11251_v57 = vadd.f32 %v6130_v41, %v5904_v39 }
 0x35d   : > { %v9015_v30 = vpop.f32.mrb[4].mxu0 }
 0x35e   : > { %v9059_v20 = vpop.f32.mrb[0].mxu1  ;;  %v6315_v3 = vpop.f32.mrb[5].mxu0 }
 0x35f   : > { %v6565_v32 = vpop.f32.mrb[1].mxu1  ;;  %v6430_v25 = vadd.f32 %v6315_v3, %v11212_v1  ;;  %v9016_v55 = vpop.f32.mrb[6].mxu0 }
 0x360   : > { %v9060_v14 = vpop.f32.mrb[2].mxu1  ;;  %v6692_v23 = vadd.f32 %v6565_v32, %v6426_v47  ;;  %v6318_v12 = vpop.f32.mrb[7].mxu0 }
 0x361   : > { %v6568_v9 = vpop.f32.mrb[3].mxu1  ;;  %v6431_v16 = vadd.f32 %v6318_v12, %v11215_v63 }
 0x362   : > { %v6731_v46 = vadd.f32 %v11257_v49, %v6692_v23  ;;  %v6693_v44 = vadd.f32 %v6568_v9, %v6427_v21 }
 0x364   : > { %v6763_v5 = vmax.f32 %v6731_v46, 0.0  ;;  %v6732_v38 = vadd.f32 %v11257_v49, %v6693_v44 }
 0x365   : > { %v9019_v53 = vpop.f32.mrb[8].mxu0 }
 0x366   : > { %v9063_v43 = vpop.f32.mrb[4].mxu1  ;;  %v7777_v19 = vpack.c.bf16 %v6763_v5, %v6763_v5  ;;  %v6764_v45 = vmax.f32 %v6732_v38, 0.0  ;;  %v6331_v11 = vpop.f32.mrb[9].mxu0 }
 0x367   : > { %v6581_v42 = vpop.f32.mrb[5].mxu1  ;;  %v9020_v18 = vpop.f32.mrb[10].mxu0  ;;  %v6434_v32 = vadd.f32 %v6331_v11, %v11218_v40  ;;  %v7723_v40 = vld [vmem:[%s10396_s18 + $0xa0] sm:$0xf] }
 0x368   : > { %v9064_v17 = vpop.f32.mrb[6].mxu1  ;;  %v6924_v10 = vshrl.u32 %v7777_v19, 16  ;;  %v7778_v36 = vpack.c.bf16 %v6764_v45, %v6764_v45  ;;  %v6696_v48 = vadd.f32 %v6581_v42, %v6430_v25  ;;  %v6927_v50 = vshll.u32 %v7777_v19, 16  ;;  %v6334_v14 = vpop.f32.mrb[11].mxu0 }
 0x369   : > { %v6584_v62 = vpop.f32.mrb[7].mxu1  ;;  %v6435_v5 = vadd.f32 %v6334_v14, %v11221_v28 }
 0x36a   : > { %v6926_v37 = vrot.slane %v6924_v10, 7  ;;  %v6932_v7 = vshrl.u32 %v7778_v36, 16  ;;  %v6735_v61 = vadd.f32 %v11257_v49, %v6696_v48  ;;  %v6697_v4 = vadd.f32 %v6584_v62, %v6431_v16 }
 0x36b   : > { %v6935_v52 = vshll.u32 %v7778_v36, 16 }
 0x36c   : > { %v6929_v34 = vor.u32 %v6927_v50, %v6926_v37  ;;  %v6934_v1 = vrot.slane %v6932_v7, 7  ;;  %v6767_v26 = vmax.f32 %v6735_v61, 0.0  ;;  %v6930_v54 = vrot.slane %v6926_v37, 4 }
 0x36d   : > { %v6736_v15 = vadd.f32 %v11257_v49, %v6697_v4  ;;  %v9023_v25 = vpop.f32.mrb[12].mxu0 }
 0x36e   : > { %v9067_v13 = vpop.f32.mrb[8].mxu1  ;;  %v7229_v63 = vsel %vm10891_vm7, %v6929_v34, %v7718_v27  ;;  %v6937_v39 = vor.u32 %v6935_v52, %v6934_v1  ;;  %v6939_v41 = vrot.slane %v6934_v1, 4  ;;  %v7779_v24 = vpack.c.bf16 %v6767_v26, %v6767_v26  ;;  %v6347_v36 = vpop.f32.mrb[13].mxu0 }
 0x36f   : > { %v6597_v20 = vpop.f32.mrb[9].mxu1  ;;  %7719 = vst [vmem:[%s10396_s18 + $0x90] sm:$0xf] %v7229_v63  ;;  %v6768_v47 = vmax.f32 %v6736_v15, 0.0  ;;  %v6438_v62 = vadd.f32 %v6347_v36, %v11224_v2  ;;  %v9024_v37 = vpop.f32.mrb[14].mxu0 }
 0x370   : > { %v9068_v33 = vpop.f32.mrb[10].mxu1  ;;  %v6938_v35 = vsel %vm10649_vm4, %v6930_v54, %v6937_v39  ;;  %v6947_v23 = vsel %vm10649_vm4, %v6939_v41, %v10609_v6  ;;  %v6958_v21 = vshrl.u32 %v7779_v24, 16  ;;  %v6700_v44 = vadd.f32 %v6597_v20, %v6434_v32  ;;  %v6350_v34 = vpop.f32.mrb[15].mxu0  ;;  %v7728_v41 = vld [vmem:[%s10396_s18 + $0xb0] sm:$0xf] }
 0x371   : > { %v6600_v9 = vpop.f32.mrb[11].mxu1  ;;  %7720 = vst [vmem:[%s10396_s18 + $0x94] sm:$0xf] %v6938_v35  ;;  %7721 = vst [vmem:[%s10396_s18 + $0x98] sm:$0xf] %v6947_v23  ;;  %v7780_v46 = vpack.c.bf16 %v6768_v47, %v6768_v47  ;;  %v6961_v30 = vshll.u32 %v7779_v24, 16  ;;  %v6439_v52 = vadd.f32 %v6350_v34, %v11227_v8 }
 0x372   : > { %v6960_v38 = vrot.slane %v6958_v21, 7  ;;  %v6739_v3 = vadd.f32 %v11257_v49, %v6700_v44  ;;  %v6701_v19 = vadd.f32 %v6600_v9, %v6435_v5  ;;  %v7733_v36 = vld [vmem:[%s10396_s18 + $0xc0] sm:$0xf] }
 0x373   : > { %v6966_v43 = vshrl.u32 %v7780_v46, 16  ;;  %v6969_v55 = vshll.u32 %v7780_v46, 16 }
 0x374   : > { %v6963_v45 = vor.u32 %v6961_v30, %v6960_v38  ;;  %v6771_v17 = vmax.f32 %v6739_v3, 0.0  ;;  %v6740_v12 = vadd.f32 %v11257_v49, %v6701_v19  ;;  %v6964_v48 = vrot.slane %v6960_v38, 4 }
 0x375   : > { %v6968_v42 = vrot.slane %v6966_v43, 7  ;;  %v9027_v18 = vpop.f32.mrb[16].mxu0 }
 0x376   : > { %v9071_v10 = vpop.f32.mrb[12].mxu1  ;;  %v7235_v28 = vsel %vm10891_vm7, %v6963_v45, %v7723_v40  ;;  %v7781_v61 = vpack.c.bf16 %v6771_v17, %v6771_v17  ;;  %v6772_v27 = vmax.f32 %v6740_v12, 0.0  ;;  %v6363_v14 = vpop.f32.mrb[17].mxu0 }
 0x377   : > { %v6613_v16 = vpop.f32.mrb[13].mxu1  ;;  %7724 = vst [vmem:[%s10396_s18 + $0xa0] sm:$0xf] %v7235_v28  ;;  %v6971_v50 = vor.u32 %v6969_v55, %v6968_v42  ;;  %v6973_v7 = vrot.slane %v6968_v42, 4  ;;  %v6442_v9 = vadd.f32 %v6363_v14, %v11230_v58  ;;  %v9028_v44 = vpop.f32.mrb[18].mxu0 }
 0x378   : > { %v9072_v4 = vpop.f32.mrb[14].mxu1  ;;  %v6704_v1 = vadd.f32 %v6613_v16, %v6438_v62  ;;  %v6992_v54 = vshrl.u32 %v7781_v61, 16  ;;  %v7782_v15 = vpack.c.bf16 %v6772_v27, %v6772_v27  ;;  %v6995_v39 = vshll.u32 %v7781_v61, 16  ;;  %v6366_v30 = vpop.f32.mrb[19].mxu0 }
 0x379   : > { %v6616_v26 = vpop.f32.mrb[15].mxu1  ;;  %v6972_v53 = vsel %vm10649_vm4, %v6964_v48, %v6971_v50  ;;  %v6981_v2 = vsel %vm10649_vm4, %v6973_v7, %v10609_v6  ;;  %v6443_v58 = vadd.f32 %v6366_v30, %v11233_v31 }
 0x37a   : > { %7725 = vst [vmem:[%s10396_s18 + $0xa4] sm:$0xf] %v6972_v53  ;;  %7726 = vst [vmem:[%s10396_s18 + $0xa8] sm:$0xf] %v6981_v2  ;;  %v6743_v13 = vadd.f32 %v11257_v49, %v6704_v1  ;;  %v6705_v11 = vadd.f32 %v6616_v26, %v6439_v52  ;;  %v6994_v63 = vrot.slane %v6992_v54, 7  ;;  %v7000_v24 = vshrl.u32 %v7782_v15, 16 }
 0x37b   : > { %v7003_v32 = vshll.u32 %v7782_v15, 16 }
 0x37c   : > { %v6775_v8 = vmax.f32 %v6743_v13, 0.0  ;;  %v6744_v20 = vadd.f32 %v11257_v49, %v6705_v11  ;;  %v6997_v47 = vor.u32 %v6995_v39, %v6994_v63  ;;  %v7002_v35 = vrot.slane %v7000_v24, 7 }
 0x37d   : > { %v6998_v40 = vrot.slane %v6994_v63, 4  ;;  %v9031_v37 = vpop.f32.mrb[20].mxu0 }
 0x37e   : > { %v9075_v33 = vpop.f32.mrb[16].mxu1  ;;  %v7783_v23 = vpack.c.bf16 %v6775_v8, %v6775_v8  ;;  %v6776_v21 = vmax.f32 %v6744_v20, 0.0  ;;  %v7241_v5 = vsel %vm10891_vm7, %v6997_v47, %v7728_v41  ;;  %v7005_v43 = vor.u32 %v7003_v32, %v7002_v35  ;;  %v6379_v4 = vpop.f32.mrb[21].mxu0 }
 0x37f   : > { %v6629_v46 = vpop.f32.mrb[17].mxu1  ;;  %7729 = vst [vmem:[%s10396_s18 + $0xb0] sm:$0xf] %v7241_v5  ;;  %v7007_v3 = vrot.slane %v7002_v35, 4  ;;  %v6446_v52 = vadd.f32 %v6379_v4, %v11236_v0  ;;  %v9032_v53 = vpop.f32.mrb[22].mxu0 }
 0x380   : > { %v9076_v38 = vpop.f32.mrb[18].mxu1  ;;  %v7026_v19 = vshrl.u32 %v7783_v23, 16  ;;  %v7784_v25 = vpack.c.bf16 %v6776_v21, %v6776_v21  ;;  %v6708_v42 = vadd.f32 %v6629_v46, %v6442_v9  ;;  %v7006_v55 = vsel %vm10649_vm4, %v6998_v40, %v7005_v43  ;;  %v6382_v63 = vpop.f32.mrb[23].mxu0  ;;  %v7738_v35 = vld [vmem:[%s10396_s18 + $0xd0] sm:$0xf] }
 0x381   : > { %v6632_v45 = vpop.f32.mrb[19].mxu1  ;;  %v7015_v17 = vsel %vm10649_vm4, %v7007_v3, %v10609_v6  ;;  %v7029_v10 = vshll.u32 %v7783_v23, 16  ;;  %7730 = vst [vmem:[%s10396_s18 + $0xb4] sm:$0xf] %v7006_v55  ;;  %v6447_v41 = vadd.f32 %v6382_v63, %v11239_v51 }
 0x382   : > { %v7028_v12 = vrot.slane %v7026_v19, 7  ;;  %7731 = vst [vmem:[%s10396_s18 + $0xb8] sm:$0xf] %v7015_v17  ;;  %v7034_v48 = vshrl.u32 %v7784_v25, 16  ;;  %v6747_v28 = vadd.f32 %v11257_v49, %v6708_v42  ;;  %v6709_v62 = vadd.f32 %v6632_v45, %v6443_v58 }
 0x383   : > { %v7037_v50 = vshll.u32 %v7784_v25, 16 }
 0x384   : > { %v7031_v16 = vor.u32 %v7029_v10, %v7028_v12  ;;  %v7036_v31 = vrot.slane %v7034_v48, 7  ;;  %v6779_v7 = vmax.f32 %v6747_v28, 0.0  ;;  %v6748_v61 = vadd.f32 %v11257_v49, %v6709_v62 }
 0x385   : > { %v7032_v34 = vrot.slane %v7028_v12, 4 }
 0x386   : > { %v9079_v27 = vpop.f32.mrb[20].mxu1  ;;  %v7247_v1 = vsel %vm10891_vm7, %v7031_v16, %v7733_v36  ;;  %v7039_v2 = vor.u32 %v7037_v50, %v7036_v31  ;;  %v7041_v54 = vrot.slane %v7036_v31, 4  ;;  %v7785_v15 = vpack.c.bf16 %v6779_v7, %v6779_v7  ;;  %v7743_v50 = vld [vmem:[%s10396_s18 + $0xe0] sm:$0xf] }
 0x387   : > { %v6645_v26 = vpop.f32.mrb[21].mxu1  ;;  %7734 = vst [vmem:[%s10396_s18 + $0xc0] sm:$0xf] %v7247_v1  ;;  %v6780_v13 = vmax.f32 %v6748_v61, 0.0  ;;  %v9035_v9 = vpop.f32.mrb[24].mxu0 }
 0x388   : > { %v9080_v11 = vpop.f32.mrb[22].mxu1  ;;  %v6712_v39 = vadd.f32 %v6645_v26, %v6446_v52  ;;  %v7040_v8 = vsel %vm10649_vm4, %v7032_v34, %v7039_v2  ;;  %v7049_v0 = vsel %vm10649_vm4, %v7041_v54, %v10609_v6  ;;  %v7060_v20 = vshrl.u32 %v7785_v15, 16  ;;  %v6395_v38 = vpop.f32.mrb[25].mxu0 }
 0x389   : > { %v6648_v24 = vpop.f32.mrb[23].mxu1  ;;  %7735 = vst [vmem:[%s10396_s18 + $0xc4] sm:$0xf] %v7040_v8  ;;  %7736 = vst [vmem:[%s10396_s18 + $0xc8] sm:$0xf] %v7049_v0  ;;  %v7786_v18 = vpack.c.bf16 %v6780_v13, %v6780_v13  ;;  %v7063_v14 = vshll.u32 %v7785_v15, 16  ;;  %v6450_v3 = vadd.f32 %v6395_v38, %v11242_v29 }
 0x38a   : > { %v6751_v47 = vadd.f32 %v11257_v49, %v6712_v39  ;;  %v6713_v32 = vadd.f32 %v6648_v24, %v6447_v41  ;;  %v7062_v33 = vrot.slane %v7060_v20, 7  ;;  %v9036_v45 = vpop.f32.mrb[26].mxu0 }
 0x38b   : > { %v7068_v23 = vshrl.u32 %v7786_v18, 16  ;;  %v7071_v44 = vshll.u32 %v7786_v18, 16  ;;  %v6398_v58 = vpop.f32.mrb[27].mxu0 }
 0x38c   : > { %v6783_v51 = vmax.f32 %v6751_v47, 0.0  ;;  %v6752_v21 = vadd.f32 %v11257_v49, %v6713_v32  ;;  %v7065_v46 = vor.u32 %v7063_v14, %v7062_v33  ;;  %v7066_v55 = vrot.slane %v7062_v33, 4 }
 0x38d   : > { %v7070_v30 = vrot.slane %v7068_v23, 7  ;;  %v6451_v29 = vadd.f32 %v6398_v58, %v11245_v22 }
 0x38e   : > { %v9083_v5 = vpop.f32.mrb[24].mxu1  ;;  %v7787_v40 = vpack.c.bf16 %v6783_v51, %v6783_v51  ;;  %v6784_v43 = vmax.f32 %v6752_v21, 0.0  ;;  %v7253_v25 = vsel %vm10891_vm7, %v7065_v46, %v7738_v35  ;;  %v7748_v46 = vld [vmem:[%s10396_s18 + $0xf0] sm:$0xf] }
 0x38f   : > { %v6661_v19 = vpop.f32.mrb[25].mxu1  ;;  %7739 = vst [vmem:[%s10396_s18 + $0xd0] sm:$0xf] %v7253_v25  ;;  %v7073_v17 = vor.u32 %v7071_v44, %v7070_v30  ;;  %v7075_v12 = vrot.slane %v7070_v30, 4  ;;  %v9039_v34 = vpop.f32.mrb[28].mxu0 }
 0x390   : > { %v9084_v42 = vpop.f32.mrb[26].mxu1  ;;  %v7094_v10 = vshrl.u32 %v7787_v40, 16  ;;  %v7788_v48 = vpack.c.bf16 %v6784_v43, %v6784_v43  ;;  %v6716_v28 = vadd.f32 %v6661_v19, %v6450_v3  ;;  %v7097_v31 = vshll.u32 %v7787_v40, 16  ;;  %v6411_v2 = vpop.f32.mrb[29].mxu0 }
 0x391   : > { %v6664_v36 = vpop.f32.mrb[27].mxu1  ;;  %v7074_v62 = vsel %vm10649_vm4, %v7066_v55, %v7073_v17  ;;  %v7083_v16 = vsel %vm10649_vm4, %v7075_v12, %v10609_v6  ;;  %v6454_v13 = vadd.f32 %v6411_v2, %v11248_v60  ;;  %v9040_v63 = vpop.f32.mrb[30].mxu0 }
 0x392   : > { %v7096_v37 = vrot.slane %v7094_v10, 7  ;;  %7740 = vst [vmem:[%s10396_s18 + $0xd4] sm:$0xf] %v7074_v62  ;;  %7741 = vst [vmem:[%s10396_s18 + $0xd8] sm:$0xf] %v7083_v16  ;;  %v7102_v7 = vshrl.u32 %v7788_v48, 16  ;;  %v6755_v61 = vadd.f32 %v11257_v49, %v6716_v28  ;;  %v6717_v27 = vadd.f32 %v6664_v36, %v6451_v29 }
 0x393   : > { %v7105_v1 = vshll.u32 %v7788_v48, 16  ;;  %v6414_v20 = vpop.f32.mrb[31].mxu0  ;;  %v7753_v36 = vld [vmem:[%s10396_s18 + $0x100] sm:$0xf] }
 0x394   : > { %v7099_v4 = vor.u32 %v7097_v31, %v7096_v37  ;;  %v7104_v22 = vrot.slane %v7102_v7, 7  ;;  %v6787_v52 = vmax.f32 %v6755_v61, 0.0  ;;  %v6756_v26 = vadd.f32 %v11257_v49, %v6717_v27 }
 0x395   : > { %v7100_v54 = vrot.slane %v7096_v37, 4  ;;  %v6455_v47 = vadd.f32 %v6414_v20, %v11251_v57 }
 0x396   : > { %v9087_v53 = vpop.f32.mrb[28].mxu1  ;;  %v7259_v15 = vsel %vm10891_vm7, %v7099_v4, %v7743_v50  ;;  %v7107_v39 = vor.u32 %v7105_v1, %v7104_v22  ;;  %v7109_v41 = vrot.slane %v7104_v22, 4  ;;  %v7789_v24 = vpack.c.bf16 %v6787_v52, %v6787_v52 }
 0x397   : > { %v6677_v11 = vpop.f32.mrb[29].mxu1  ;;  %7744 = vst [vmem:[%s10396_s18 + $0xe0] sm:$0xf] %v7259_v15  ;;  %v6788_v8 = vmax.f32 %v6756_v26, 0.0 }
 0x398   : > { %v9088_v0 = vpop.f32.mrb[30].mxu1  ;;  %v6720_v18 = vadd.f32 %v6677_v11, %v6454_v13  ;;  %v7108_v33 = vsel %vm10649_vm4, %v7100_v54, %v7107_v39  ;;  %v7117_v60 = vsel %vm10649_vm4, %v7109_v41, %v10609_v6  ;;  %v7128_v14 = vshrl.u32 %v7789_v24, 16 }
 0x399   : > { %v6680_v32 = vpop.f32.mrb[31].mxu1  ;;  %7745 = vst [vmem:[%s10396_s18 + $0xe4] sm:$0xf] %v7108_v33  ;;  %7746 = vst [vmem:[%s10396_s18 + $0xe8] sm:$0xf] %v7117_v60  ;;  %v7790_v35 = vpack.c.bf16 %v6788_v8, %v6788_v8  ;;  %v7131_v9 = vshll.u32 %v7789_v24, 16 }
 0x39a   : > { %v6759_v23 = vadd.f32 %v11257_v49, %v6720_v18  ;;  %v6721_v51 = vadd.f32 %v6680_v32, %v6455_v47  ;;  %v7130_v21 = vrot.slane %v7128_v14, 7 }
 0x39b   : > { %v7136_v57 = vshrl.u32 %v7790_v35, 16  ;;  %v7139_v40 = vshll.u32 %v7790_v35, 16 }
 0x39c   : > { %v6791_v44 = vmax.f32 %v6759_v23, 0.0  ;;  %v6760_v5 = vadd.f32 %v11257_v49, %v6721_v51  ;;  %v7133_v38 = vor.u32 %v7131_v9, %v7130_v21  ;;  %v7134_v45 = vrot.slane %v7130_v21, 4 }
 0x39d   : > { %v7138_v30 = vrot.slane %v7136_v57, 7 }
 0x39e   : > { %v7791_v43 = vpack.c.bf16 %v6791_v44, %v6791_v44  ;;  %v6792_v3 = vmax.f32 %v6760_v5, 0.0  ;;  %v7265_v19 = vsel %vm10891_vm7, %v7133_v38, %v7748_v46 }
 0x39f   : > { %7749 = vst [vmem:[%s10396_s18 + $0xf0] sm:$0xf] %v7265_v19  ;;  %v7141_v25 = vor.u32 %v7139_v40, %v7138_v30  ;;  %v7143_v42 = vrot.slane %v7138_v30, 4 }
 0x3a0   : > { %v7162_v58 = vshrl.u32 %v7791_v43, 16  ;;  %v7792_v55 = vpack.c.bf16 %v6792_v3, %v6792_v3  ;;  %v7165_v10 = vshll.u32 %v7791_v43, 16 }
 0x3a1   : > { %v7142_v49 = vsel %vm10649_vm4, %v7134_v45, %v7141_v25  ;;  %v7151_v17 = vsel %vm10649_vm4, %v7143_v42, %v10609_v6 }
 0x3a2   : > { %v7164_v12 = vrot.slane %v7162_v58, 7  ;;  %7750 = vst [vmem:[%s10396_s18 + $0xf4] sm:$0xf] %v7142_v49  ;;  %7751 = vst [vmem:[%s10396_s18 + $0xf8] sm:$0xf] %v7151_v17  ;;  %v7170_v48 = vshrl.u32 %v7792_v55, 16 }
 0x3a3   : > { %v7173_v62 = vshll.u32 %v7792_v55, 16 }
 0x3a4   : > { %v7167_v28 = vor.u32 %v7165_v10, %v7164_v12  ;;  %v7172_v29 = vrot.slane %v7170_v48, 7  ;;  %v7168_v37 = vrot.slane %v7164_v12, 4 }
 0x3a6   : > { %v7271_v16 = vsel %vm10891_vm7, %v7167_v28, %v7753_v36  ;;  %v7175_v31 = vor.u32 %v7173_v62, %v7172_v29  ;;  %v7177_v50 = vrot.slane %v7172_v29, 4 }
 0x3a7   : > { %7754 = vst [vmem:[%s10396_s18 + $0x100] sm:$0xf] %v7271_v16 }
 0x3a8   : > { %v7176_v7 = vsel %vm10649_vm4, %v7168_v37, %v7175_v31  ;;  %v7185_v59 = vsel %vm10649_vm4, %v7177_v50, %v10609_v6 }
 0x3a9   : > { %7755 = vst [vmem:[%s10396_s18 + $0x104] sm:$0xf] %v7176_v7  ;;  %7756 = vst [vmem:[%s10396_s18 + $0x108] sm:$0xf] %v7185_v59 }
 0x3aa   : > { %9443 = shalt.err (!%p9440_p7)
}
 0x3ab   : > { %s9444_s7 = scalar_lea.hbm %s11376_s22, 4864  ;;  %s9448_s18 = scalar_lea.hbm %s11432_s3, 9728 }
 0x3ac   : > { %p9445_p9 = scmp.ne.s32.totalorder %s11376_s22, %s9444_s7  ;;  %p9449_p5 = scmp.lt.u32.totalorder %s11376_s22, %s11432_s3 }
 0x3ad   : > { %p9450_p13 = scmp.lt.u32.totalorder %s9448_s18, %s9444_s7  ;;  %p9452_p4 = scmp.lt.u32.totalorder %s9444_s7, %s11376_s22 }
 0x3ae   : > { %p9446_p1 = pnand %p9445_p9, %p9625_p12 }
 0x3af   : > { %p9451_p2 = por %p9450_p13, %p9449_p5 }
 0x3b0   : > { %p9447_p0 = pneg %p9446_p1 }
 0x3b1   : > { %p9453_p6 = por %p9452_p4, %p9451_p2 }
 0x3b3   : > { %p9454_p8 = pnand %p9453_p6, %p9447_p0 }
 0x3b5   : > { %9457 = shalt.err (!%p9454_p8)
}
 0x3b6   : > { %s9509_s9 = smov 64   ;;  %s9510_s25 = smov 4  }
 0x3b7   : > { %9099 = dma.vmem_to_hbm [thread:$0]  (%p9625_p12), %s11378_s5, 4864, %s11376_s22, %s7277_s16, %s9509_s9, %s9509_s9, %s9510_s25  }
 0x3b8 PF: > { %s7305_s4 = sand.u32 1, %s9488_s12   ;;  %p11507_p10 = scmp.ne.s32.totalorder %s11457_s19, 0 }
 0x3b9   : > { %p11508_p11 = scmp.ge.s32.totalorder %s9500_s15, 2  ;;  %s7306_s11 = scalar_lea.sflag [#allocation4], %s7305_s4 }
 0x3bb   : > { %p9110_p3 = pnand %p11508_p11, %p11507_p10 }
 0x3bd   : > { %9483 = dma.done.wait (!%p9110_p3), %s7306_s11, 4864  }
 0x3be   : > { %9485 = vsyncadd (!%p9110_p3), %s7306_s11, 4294962432  ;;  %p17_p7 = scmp.ge.s32.totalorder %s9587_s24, 4   ;;  %s11509_s12 = smov %s9492_s13 }
 0x3bf   : > { %s11510_s13 = smov %s9496_s14  ;;  %s11511_s14 = smov %s9621_s17 }
 0x3c0   : > { %s11512_s15 = smov %s9587_s24  ;;  %19 = sbr.rel (!%p17_p7) target bundleno = 6 (0x6), region = 93 }
 0x3c7   :  { %7311 = vsyncpa [#allocation3], 1 }
 0x3c8   :  { %7313 = vsyncpa [#allocation3 + $0x1], 1 }
 0x3c9   :  { %7314 = vsyncpa [#allocation6], 1 }
 0x3ca   :  { %7315 = vsyncpa [#allocation4], 1 }
 0x3cb   :  { %7317 = vsyncpa [#allocation4 + $0x1], 1 }

</bundles_post_ra>
